<compile_context>
chip_gen: v6e
topology: v6e:2x2x1
jax: 0.10.0
libtpu: 0.0.40
codegen_flags: <defaults>
</compile_context>

<pallas_src>
import numpy as np
import jax
import jax.numpy as jnp
from jax.experimental import pallas as pl
from jax.experimental.pallas import tpu as pltpu

# ----------------------------- hyper-parameters (small) ---------------------
BATCH      = 2
N_SAMPLES  = 288          # waveform length
WIN, HOP   = 64, 32       # frame size / hop  -> T = 8 frames
SR         = 16000
N_MELS     = 16           # input_dim
OUT_DIM    = 32           # output_dim (lin_neurons)
CH         = [32, 32, 32, 32, 96]       # channels (scaled-down ECAPA defaults)
KS         = [5, 3, 3, 3, 1]            # kernel sizes
DIL        = [1, 2, 3, 4, 1]            # dilations
SCALE      = 4            # res2net scale
SE_CH      = 16           # SE bottleneck channels
ATT_CH     = 16           # attention channels
BN_EPS     = 1e-5

T      = 1 + (N_SAMPLES - WIN) // HOP   # 8 frames
BT     = BATCH * T                      # 16 rows: activation layout (B*T, C)
N_FREQ = WIN // 2 + 1                   # 33 real DFT bins
NFP    = 64                             # freq bins padded to half a vreg
SUB    = CH[1] // SCALE                 # 8 res2net sub-channels
_LOG10 = float(np.log(10.0))

# const-stack slots: 0..4 block0 taps, 5..13 res2 taps (3 per block),
#                    14 time-mean pool (rows 0:B), 15 time-broadcast (cols 0:B)
_C_POOL, _C_BCAST = 14, 15

# wbig (bf16 arena, width 96) row offsets
_WB_MFA, _WB_WX, _WB_WM, _WB_WS, _WB_WC, _WB_FCM, _WB_FCS, _WB_ROWS = (
    0, 96, 192, 288, 384, 400, 496, 592)


# ----------------------------- aux-vector table layout -----------------------
def _aux_layout():
    order = [("b0_b", CH[0]), ("b0_s", CH[0]), ("b0_t", CH[0])]
    for i in range(1, 4):
        order += [(f"t1{i}_{s}", CH[i]) for s in "bst"]
        for j in range(1, SCALE):
            order += [(f"r{i}{j}_{s}", SUB) for s in "bst"]
        order += [(f"t2{i}_{s}", CH[i]) for s in "bst"]
        order += [(f"se1{i}_b", SE_CH), (f"se2{i}_b", CH[i])]
    order += [(f"mfa_{s}", CH[4]) for s in "bst"]
    order += [(f"asp_{s}", ATT_CH) for s in "bst"]
    order += [("aspc_b", CH[4]), ("fc_b", OUT_DIM)]
    return {nm: (r, n) for r, (nm, n) in enumerate(order)}, len(order)


AUX_ROW, _AUX_N = _aux_layout()
AUX_R = ((_AUX_N + 7) // 8) * 8          # 64 rows x 128 lanes, f32


# ----------------------------- host-side constant builders ------------------
def _mel_filterbank(n_mels, n_bins, sr, fmin=0.0, fmax=None):
    fmax = fmax if fmax is not None else sr / 2.0
    hz2mel = lambda h: 2595.0 * np.log10(1.0 + h / 700.0)
    mel2hz = lambda m: 700.0 * (10 ** (m / 2595.0) - 1.0)
    mel_pts = np.linspace(hz2mel(fmin), hz2mel(fmax), n_mels + 2)
    hz = mel2hz(mel_pts)
    bin_freqs = np.linspace(0.0, sr / 2.0, n_bins)
    fb = np.zeros((n_bins, n_mels), dtype=np.float32)
    for m in range(n_mels):
        l, c, r = hz[m], hz[m + 1], hz[m + 2]
        up = (bin_freqs - l) / max(c - l, 1e-6)
        down = (r - bin_freqs) / max(r - c, 1e-6)
        fb[:, m] = np.maximum(0.0, np.minimum(up, down))
    return fb


def _reflect(i, n):
    if i < 0:
        i = -i
    if i >= n:
        i = 2 * (n - 1) - i
    return i


def _shift_mat(off):
    """(BT, BT) block-diag matrix: output row b*T+t selects input row b*T+reflect(t+off)."""
    m = np.zeros((BT, BT), np.float32)
    for b in range(BATCH):
        for t in range(T):
            m[b * T + t, b * T + _reflect(t + off, T)] = 1.0
    return m


def _bn_affine(p):
    scale = np.asarray(p["gamma"]) / np.sqrt(np.asarray(p["var"]) + BN_EPS)
    shift = np.asarray(p["beta"]) - np.asarray(p["mean"]) * scale
    return scale, shift


def prepare_params(P):
    """One-time host-side packing of all weights into 8 DMA-friendly arrays."""
    f32 = np.float32

    # ---- frontend: Hamming-windowed DFT + mel projection (kept f32) --------
    n = np.arange(WIN)
    ham = 0.54 - 0.46 * np.cos(2.0 * np.pi * n / WIN)
    dft = np.zeros((WIN, 2 * NFP), f32)                # cols [cos 0:33 | pad | sin 64:97 | pad]
    for k in range(N_FREQ):
        dft[:, k]       = ham * np.cos(2.0 * np.pi * n * k / WIN)
        dft[:, NFP + k] = ham * np.sin(2.0 * np.pi * n * k / WIN)
    mel = _mel_filterbank(N_MELS, N_FREQ, SR)          # (33, 16)
    melmat = np.zeros((2 * NFP, N_MELS), f32)          # consumes re^2 and im^2 rows
    melmat[:N_FREQ, :] = mel
    melmat[NFP:NFP + N_FREQ, :] = mel

    # ---- tiny (BT, BT) constants: conv row-shift matrices + pool/broadcast --
    consts = np.zeros((16, BT, BT), f32)
    for k in range(KS[0]):
        consts[k] = _shift_mat(k * DIL[0] - (KS[0] - 1) * DIL[0] // 2)
    for i in range(1, 4):
        for k in range(KS[i]):
            consts[5 + 3 * (i - 1) + k] = _shift_mat(k * DIL[i] - (KS[i] - 1) * DIL[i] // 2)
    for b in range(BATCH):
        consts[_C_POOL, b, b * T:(b + 1) * T] = 1.0 / T     # mean over time
        consts[_C_BCAST, b * T:(b + 1) * T, b] = 1.0        # broadcast over time

    # ---- per-channel vectors (conv bias / BN scale / BN shift) -------------
    aux = np.zeros((AUX_R, 128), f32)

    def put(name, vec):
        r, nlen = AUX_ROW[name]
        aux[r, :nlen] = np.asarray(vec, f32)

    def put_tdnn(prefix, p):
        s, t = _bn_affine(p)
        put(prefix + "_b", p["b"]); put(prefix + "_s", s); put(prefix + "_t", t)

    # ---- block0 taps ---------------------------------------------------------
    w0 = np.zeros((KS[0], N_MELS, CH[0]), f32)
    wb0 = np.asarray(P["block0"]["w"])
    for k in range(KS[0]):
        w0[k] = wb0[:, :, k].T
    put_tdnn("b0", P["block0"])

    # ---- SE-Res2Net blocks ---------------------------------------------------
    wr  = np.zeros((27, SUB, SUB), f32)            # res2 taps, index (block,conv,tap)
    w32 = np.zeros((12, CH[1], CH[1]), f32)        # tdnn1 x3, tdnn2 x3, se1 x3, se2 x3
    for i in range(1, 4):
        blk = P[f"block{i}"]
        w32[i - 1] = np.asarray(blk["tdnn1"]["w"])[:, :, 0].T
        put_tdnn(f"t1{i}", blk["tdnn1"])
        for j in range(1, SCALE):
            pj = blk["res2"][j - 1]
            wj = np.asarray(pj["w"])
            for k in range(KS[i]):
                wr[(3 * (i - 1) + (j - 1)) * 3 + k] = wj[:, :, k].T
            put_tdnn(f"r{i}{j}", pj)
        w32[3 + i - 1] = np.asarray(blk["tdnn2"]["w"])[:, :, 0].T
        put_tdnn(f"t2{i}", blk["tdnn2"])
        w32[6 + i - 1][:, :SE_CH] = np.asarray(blk["se1"]["w"])[:, :, 0].T   # (32,16)
        w32[9 + i - 1][:SE_CH, :] = np.asarray(blk["se2"]["w"])[:, :, 0].T   # (16,32)
        put(f"se1{i}_b", blk["se1"]["b"])
        put(f"se2{i}_b", blk["se2"]["b"])

    # ---- MFA / ASP / FC (asp_bn folded into the FC) --------------------------
    wbig = np.zeros((_WB_ROWS, CH[4]), f32)
    wbig[_WB_MFA:_WB_MFA + 96, :] = np.asarray(P["mfa"]["w"])[:, :, 0].T
    put_tdnn("mfa", P["mfa"])
    wa = np.asarray(P["asp"]["tdnn"]["w"])[:, :, 0]            # (16, 288)
    wbig[_WB_WX:_WB_WX + 96, :ATT_CH] = wa[:, 0:96].T          # per-frame part
    wbig[_WB_WM:_WB_WM + 96, :ATT_CH] = wa[:, 96:192].T        # global mean part
    wbig[_WB_WS:_WB_WS + 96, :ATT_CH] = wa[:, 192:288].T       # global std part
    put_tdnn("asp", P["asp"]["tdnn"])
    wbig[_WB_WC:_WB_WC + 16, :] = np.asarray(P["asp"]["conv"]["w"])[:, :, 0].T
    put("aspc_b", P["asp"]["conv"]["b"])
    bn_s, bn_t = _bn_affine(P["asp_bn"])
    w_fc = np.asarray(P["fc"]["w"])[:, :, 0].T                 # (192, 32)
    w_eff = w_fc * bn_s[:, None]
    b_eff = np.asarray(P["fc"]["b"]) + bn_t @ w_fc
    wbig[_WB_FCM:_WB_FCM + 96, :OUT_DIM] = w_eff[0:96, :]
    wbig[_WB_FCS:_WB_FCS + 96, :OUT_DIM] = w_eff[96:192, :]
    put("fc_b", b_eff)

    bf = jnp.bfloat16
    return dict(
        dft=jnp.asarray(dft), mel=jnp.asarray(melmat),
        consts=jnp.asarray(consts), aux=jnp.asarray(aux),
        w0=jnp.asarray(w0, bf), wr=jnp.asarray(wr, bf),
        w32=jnp.asarray(w32, bf), wbig=jnp.asarray(wbig, bf),
    )


# ----------------------------- the fused Pallas kernel ----------------------
def _ecapa_kernel(wav_ref, dft_ref, mel_ref, consts_ref, aux_ref,
                  w0_ref, wr_ref, w32_ref, wbig_ref, out_ref, frames_ref):
    f32, bf16 = jnp.float32, jnp.bfloat16

    def mm(x, w):      # bf16 MXU matmul (w already bf16), f32 accumulation
        return jnp.dot(x.astype(bf16), w, preferred_element_type=f32)

    def mmf(x, w):     # exact f32 matmul (frontend / 0-1 shift matrices)
        return jnp.dot(x, w, preferred_element_type=f32)

    def arow(name):    # one per-channel vector as a (1, C) row
        r, n = AUX_ROW[name]
        return aux_ref[r:r + 1, :n]

    def tdnn_post(pre, prefix):   # conv-bias -> ReLU -> BatchNorm (eval affine)
        y = jnp.maximum(pre + arow(prefix + "_b"), 0.0)
        return y * arow(prefix + "_s") + arow(prefix + "_t")

    def time_conv(x, taps, slot0, ksize, dil, cout):
        # dilated 'same' reflect-padded conv:  y = sum_k  S_k @ x @ W_k
        pad = (ksize - 1) * dil // 2
        pre = jnp.zeros((BT, cout), f32)
        for k in range(ksize):
            xk = x if (k * dil - pad) == 0 else mmf(consts_ref[slot0 + k], x)
            pre = pre + mm(xk, taps[k])
        return pre

    # ---------------- Fbank frontend -----------------------------------------
    for b in range(BATCH):                      # static framing -> VMEM scratch
        for t in range(T):
            frames_ref[b * T + t:b * T + t + 1, :] = \
                wav_ref[b:b + 1, t * HOP:t * HOP + WIN]
    frames = frames_ref[...]                                   # (BT, 64)
    spec = mmf(frames, dft_ref[...])                           # (BT, 128) = [re | im]
    melv = mmf(spec * spec, mel_ref[...])                      # (BT, 16)
    logmel = (10.0 / _LOG10) * jnp.log(jnp.maximum(melv, 1e-10))
    parts = []                                                 # per-utterance top_db clamp
    for b in range(BATCH):
        blk = logmel[b * T:(b + 1) * T, :]
        mx = jnp.max(jnp.max(blk, axis=1, keepdims=True), axis=0, keepdims=True)
        parts.append(jnp.maximum(blk, mx - 80.0))
    x = jnp.concatenate(parts, axis=0)                         # (BT, 16)

    # ---------------- block0: TDNN(16 -> 32, K=5) ----------------------------
    taps0 = [w0_ref[k] for k in range(KS[0])]
    x = tdnn_post(time_conv(x, taps0, 0, KS[0], DIL[0], CH[0]), "b0")   # (BT, 32)

    # ---------------- SE-Res2Net blocks --------------------------------------
    pool  = consts_ref[_C_POOL][0:BATCH, :]                    # (B, BT)  mean over time
    bcast = consts_ref[_C_BCAST][:, 0:BATCH]                   # (BT, B)  broadcast over time
    feats = []
    for i in range(1, 4):
        res = x
        h = tdnn_post(mm(x, w32_ref[i - 1]), f"t1{i}")         # 1x1 conv, (BT, 32)
        # res2net: hierarchical dilated K=3 convs on 8-channel chunks
        ys, y_prev = [h[:, 0:SUB]], None
        for j in range(1, SCALE):
            cj = h[:, j * SUB:(j + 1) * SUB]
            inp = cj if j == 1 else cj + y_prev
            taps = [wr_ref[(3 * (i - 1) + (j - 1)) * 3 + k] for k in range(KS[i])]
            y_prev = tdnn_post(
                time_conv(inp, taps, 5 + 3 * (i - 1), KS[i], DIL[i], SUB), f"r{i}{j}")
            ys.append(y_prev)
        # tdnn2 1x1 conv, decomposed over input chunks (no lane concat needed)
        w2 = w32_ref[3 + i - 1]                                # (32, 32)
        h2 = jnp.zeros((BT, CH[i]), f32)
        for j in range(SCALE):
            h2 = h2 + mm(ys[j], w2[j * SUB:(j + 1) * SUB, :])
        h2 = tdnn_post(h2, f"t2{i}")
        # SE gate from the per-utterance time mean
        s = mmf(pool, h2)                                      # (B, 32)
        s = jnp.maximum(mm(s, w32_ref[6 + i - 1][:, :SE_CH]) + arow(f"se1{i}_b"), 0.0)
        g = jax.nn.sigmoid(mm(s, w32_ref[9 + i - 1][:SE_CH, :]) + arow(f"se2{i}_b"))
        x = h2 * mmf(bcast, g) + res
        feats.append(x)

    # ---------------- MFA (1x1 conv over concat of block outputs) ------------
    pre = jnp.zeros((BT, CH[4]), f32)
    for p in range(3):
        pre = pre + mm(feats[p], wbig_ref[_WB_MFA + 32 * p:_WB_MFA + 32 * (p + 1), :])
    xs = tdnn_post(pre, "mfa")                                 # (BT, 96)

    # ---------------- Attentive statistics pooling + FC ----------------------
    wx  = wbig_ref[_WB_WX:_WB_WX + 96, :ATT_CH]
    wm  = wbig_ref[_WB_WM:_WB_WM + 96, :ATT_CH]
    wsd = wbig_ref[_WB_WS:_WB_WS + 96, :ATT_CH]
    wc  = wbig_ref[_WB_WC:_WB_WC + 16, :]
    wfm = wbig_ref[_WB_FCM:_WB_FCM + 96, :OUT_DIM]
    wfs = wbig_ref[_WB_FCS:_WB_FCS + 96, :OUT_DIM]
    a_b, a_s, a_t = arow("asp_b"), arow("asp_s"), arow("asp_t")
    c_b, f_b = arow("aspc_b"), arow("fc_b")
    outs = []
    for b in range(BATCH):                                     # static 8-row utterance blocks
        xb = xs[b * T:(b + 1) * T, :]                          # (T, 96)
        mean_u = jnp.mean(xb, axis=0, keepdims=True)           # global-context stats
        dev = xb - mean_u
        std_u = jnp.sqrt(jnp.maximum(jnp.mean(dev * dev, axis=0, keepdims=True), 1e-12))
        a = mm(xb, wx) + mm(mean_u, wm) + mm(std_u, wsd)       # attention TDNN
        a = jnp.tanh(jnp.maximum(a + a_b, 0.0) * a_s + a_t)
        logits = mm(a, wc) + c_b                               # (T, 96)
        e = jnp.exp(logits - jnp.max(logits, axis=0, keepdims=True))
        wgt = e / jnp.sum(e, axis=0, keepdims=True)            # softmax over time
        mu = jnp.sum(wgt * xb, axis=0, keepdims=True)          # (1, 96)
        d = xb - mu
        sd = jnp.sqrt(jnp.maximum(jnp.sum(wgt * d * d, axis=0, keepdims=True), 1e-12))
        outs.append(mm(mu, wfm) + mm(sd, wfs) + f_b)           # asp_bn folded into wfm/wfs
    out_ref[...] = jnp.concatenate(outs, axis=0)               # (B, OUT_DIM)


# ----------------------------- wrapper ---------------------------------------
def ecapa_tdnn_forward(prep, x):
    """x: (B, 1, N_SAMPLES) -> (B, 1, OUT_DIM). One fused VMEM-resident kernel."""
    wav = x[:, 0, :]                                           # x.squeeze(1)
    out = pl.pallas_call(
        _ecapa_kernel,
        out_shape=jax.ShapeDtypeStruct((wav.shape[0], OUT_DIM), jnp.float32),
        in_specs=[pl.BlockSpec(memory_space=pltpu.MemorySpace.VMEM)] * 9,
        out_specs=pl.BlockSpec(memory_space=pltpu.MemorySpace.VMEM),
        scratch_shapes=[pltpu.VMEM((BT, WIN), jnp.float32)],
        compiler_params=pltpu.CompilerParams(vmem_limit_bytes=32 * 1024 * 1024),
    )(wav, prep["dft"], prep["mel"], prep["consts"], prep["aux"],
      prep["w0"], prep["wr"], prep["w32"], prep["wbig"])
    return out[:, None, :]                                     # (B, 1, lin) == transpose(1,2)


# ----------------------------- deterministic init ----------------------------
def _uinit(key, shape, fan_in):
    bound = 1.0 / np.sqrt(fan_in)
    return jax.random.uniform(key, shape, jnp.float32, -bound, bound)


def init_conv(key, cin, cout, k):
    k1, k2 = jax.random.split(key)
    return {"w": _uinit(k1, (cout, cin, k), cin * k),
            "b": _uinit(k2, (cout,), cin * k)}


def init_bn(c):
    return {"gamma": jnp.ones((c,), jnp.float32), "beta": jnp.zeros((c,), jnp.float32),
            "mean": jnp.zeros((c,), jnp.float32), "var": jnp.ones((c,), jnp.float32)}


def init_tdnn(key, cin, cout, k):
    p = init_conv(key, cin, cout, k)
    p.update(init_bn(cout))
    return p


def init_params(key):
    keys = iter(jax.random.split(key, 40))
    P = {"block0": init_tdnn(next(keys), N_MELS, CH[0], KS[0])}
    for i in range(1, 4):
        blk = {
            "tdnn1": init_tdnn(next(keys), CH[i - 1], CH[i], 1),
            "res2": [init_tdnn(next(keys), CH[i] // SCALE, CH[i] // SCALE, KS[i])
                     for _ in range(SCALE - 1)],
            "tdnn2": init_tdnn(next(keys), CH[i], CH[i], 1),
            "se1": init_conv(next(keys), CH[i], SE_CH, 1),
            "se2": init_conv(next(keys), SE_CH, CH[i], 1),
        }
        P[f"block{i}"] = blk
    P["mfa"] = init_tdnn(next(keys), CH[1] + CH[2] + CH[3], CH[4], KS[4])
    P["asp"] = {"tdnn": init_tdnn(next(keys), 3 * CH[4], ATT_CH, 1),
                "conv": init_conv(next(keys), ATT_CH, CH[4], 1)}
    P["asp_bn"] = init_bn(2 * CH[4])
    P["fc"] = init_conv(next(keys), 2 * CH[4], OUT_DIM, 1)
    return P


# ----------------------------- main -------------------------------------------
if __name__ == "__main__":
    key = jax.random.PRNGKey(0)
    pkey, xkey = jax.random.split(key)
    params = init_params(pkey)
    prep = prepare_params(params)        # one-time weight packing (not in the hot path)
    x = jax.random.normal(xkey, (BATCH, 1, N_SAMPLES), jnp.float32)

    fwd = jax.jit(ecapa_tdnn_forward)
    out = jax.block_until_ready(fwd(prep, x))

    assert out.shape == (BATCH, 1, OUT_DIM), out.shape
    assert bool(jnp.all(jnp.isfinite(out)))
    print("KERNEL_OK")
</pallas_src>

<mosaic_0001>
module attributes {stable_mosaic.version = 11 : i64} {
  func.func @_ecapa_kernel(%arg0: memref<2x288xf32, #tpu.memory_space<vmem>>, %arg1: memref<64x128xf32, #tpu.memory_space<vmem>>, %arg2: memref<128x16xf32, #tpu.memory_space<vmem>>, %arg3: memref<16x16x16xf32, #tpu.memory_space<vmem>>, %arg4: memref<64x128xf32, #tpu.memory_space<vmem>>, %arg5: memref<5x16x32xbf16, #tpu.memory_space<vmem>>, %arg6: memref<27x8x8xbf16, #tpu.memory_space<vmem>>, %arg7: memref<12x32x32xbf16, #tpu.memory_space<vmem>>, %arg8: memref<592x96xbf16, #tpu.memory_space<vmem>>, %arg9: memref<2x32xf32, #tpu.memory_space<vmem>>, %arg10: memref<16x64xf32, #tpu.memory_space<vmem>>) attributes {dimension_semantics = [], scalar_prefetch = 0 : i64, scratch_operands = 1 : i64, tpu.core_type = #tpu.core_type<tc>} {
    %c0 = arith.constant 0 : index
    %c0_0 = arith.constant 0 : index
    %0 = vector.load %arg0[%c0, %c0_0] : memref<2x288xf32, #tpu.memory_space<vmem>>, vector<1x64xf32>
    %c0_1 = arith.constant 0 : index
    %c0_2 = arith.constant 0 : index
    %1 = vector.load %arg10[%c0_1, %c0_2] : memref<16x64xf32, #tpu.memory_space<vmem>>, vector<1x64xf32>
    tpu.vector_store %arg10[%c0_1, %c0_2], %0 {strides = array<i32>} : memref<16x64xf32, #tpu.memory_space<vmem>>, vector<1x64xf32>,
    %c0_3 = arith.constant 0 : index
    %c32 = arith.constant 32 : index
    %2 = vector.load %arg0[%c0_3, %c32] : memref<2x288xf32, #tpu.memory_space<vmem>>, vector<1x64xf32>
    %c1 = arith.constant 1 : index
    %c0_4 = arith.constant 0 : index
    %3 = vector.load %arg10[%c1, %c0_4] : memref<16x64xf32, #tpu.memory_space<vmem>>, vector<1x64xf32>
    tpu.vector_store %arg10[%c1, %c0_4], %2 {strides = array<i32>} : memref<16x64xf32, #tpu.memory_space<vmem>>, vector<1x64xf32>,
    %c0_5 = arith.constant 0 : index
    %c64 = arith.constant 64 : index
    %4 = vector.load %arg0[%c0_5, %c64] : memref<2x288xf32, #tpu.memory_space<vmem>>, vector<1x64xf32>
    %c2 = arith.constant 2 : index
    %c0_6 = arith.constant 0 : index
    %5 = vector.load %arg10[%c2, %c0_6] : memref<16x64xf32, #tpu.memory_space<vmem>>, vector<1x64xf32>
    tpu.vector_store %arg10[%c2, %c0_6], %4 {strides = array<i32>} : memref<16x64xf32, #tpu.memory_space<vmem>>, vector<1x64xf32>,
    %c0_7 = arith.constant 0 : index
    %c96 = arith.constant 96 : index
    %6 = vector.load %arg0[%c0_7, %c96] : memref<2x288xf32, #tpu.memory_space<vmem>>, vector<1x64xf32>
    %c3 = arith.constant 3 : index
    %c0_8 = arith.constant 0 : index
    %7 = vector.load %arg10[%c3, %c0_8] : memref<16x64xf32, #tpu.memory_space<vmem>>, vector<1x64xf32>
    tpu.vector_store %arg10[%c3, %c0_8], %6 {strides = array<i32>} : memref<16x64xf32, #tpu.memory_space<vmem>>, vector<1x64xf32>,
    %c0_9 = arith.constant 0 : index
    %c128 = arith.constant 128 : index
    %8 = vector.load %arg0[%c0_9, %c128] : memref<2x288xf32, #tpu.memory_space<vmem>>, vector<1x64xf32>
    %c4 = arith.constant 4 : index
    %c0_10 = arith.constant 0 : index
    %9 = vector.load %arg10[%c4, %c0_10] : memref<16x64xf32, #tpu.memory_space<vmem>>, vector<1x64xf32>
    tpu.vector_store %arg10[%c4, %c0_10], %8 {strides = array<i32>} : memref<16x64xf32, #tpu.memory_space<vmem>>, vector<1x64xf32>,
    %c0_11 = arith.constant 0 : index
    %c160 = arith.constant 160 : index
    %10 = vector.load %arg0[%c0_11, %c160] : memref<2x288xf32, #tpu.memory_space<vmem>>, vector<1x64xf32>
    %c5 = arith.constant 5 : index
    %c0_12 = arith.constant 0 : index
    %11 = vector.load %arg10[%c5, %c0_12] : memref<16x64xf32, #tpu.memory_space<vmem>>, vector<1x64xf32>
    tpu.vector_store %arg10[%c5, %c0_12], %10 {strides = array<i32>} : memref<16x64xf32, #tpu.memory_space<vmem>>, vector<1x64xf32>,
    %c0_13 = arith.constant 0 : index
    %c192 = arith.constant 192 : index
    %12 = vector.load %arg0[%c0_13, %c192] : memref<2x288xf32, #tpu.memory_space<vmem>>, vector<1x64xf32>
    %c6 = arith.constant 6 : index
    %c0_14 = arith.constant 0 : index
    %13 = vector.load %arg10[%c6, %c0_14] : memref<16x64xf32, #tpu.memory_space<vmem>>, vector<1x64xf32>
    tpu.vector_store %arg10[%c6, %c0_14], %12 {strides = array<i32>} : memref<16x64xf32, #tpu.memory_space<vmem>>, vector<1x64xf32>,
    %c0_15 = arith.constant 0 : index
    %c224 = arith.constant 224 : index
    %14 = vector.load %arg0[%c0_15, %c224] : memref<2x288xf32, #tpu.memory_space<vmem>>, vector<1x64xf32>
    %c7 = arith.constant 7 : index
    %c0_16 = arith.constant 0 : index
    %15 = vector.load %arg10[%c7, %c0_16] : memref<16x64xf32, #tpu.memory_space<vmem>>, vector<1x64xf32>
    tpu.vector_store %arg10[%c7, %c0_16], %14 {strides = array<i32>} : memref<16x64xf32, #tpu.memory_space<vmem>>, vector<1x64xf32>,
    %c1_17 = arith.constant 1 : index
    %c0_18 = arith.constant 0 : index
    %16 = vector.load %arg0[%c1_17, %c0_18] : memref<2x288xf32, #tpu.memory_space<vmem>>, vector<1x64xf32>
    %c8 = arith.constant 8 : index
    %c0_19 = arith.constant 0 : index
    %17 = vector.load %arg10[%c8, %c0_19] : memref<16x64xf32, #tpu.memory_space<vmem>>, vector<1x64xf32>
    tpu.vector_store %arg10[%c8, %c0_19], %16 {strides = array<i32>} : memref<16x64xf32, #tpu.memory_space<vmem>>, vector<1x64xf32>,
    %c1_20 = arith.constant 1 : index
    %c32_21 = arith.constant 32 : index
    %18 = vector.load %arg0[%c1_20, %c32_21] : memref<2x288xf32, #tpu.memory_space<vmem>>, vector<1x64xf32>
    %c9 = arith.constant 9 : index
    %c0_22 = arith.constant 0 : index
    %19 = vector.load %arg10[%c9, %c0_22] : memref<16x64xf32, #tpu.memory_space<vmem>>, vector<1x64xf32>
    tpu.vector_store %arg10[%c9, %c0_22], %18 {strides = array<i32>} : memref<16x64xf32, #tpu.memory_space<vmem>>, vector<1x64xf32>,
    %c1_23 = arith.constant 1 : index
    %c64_24 = arith.constant 64 : index
    %20 = vector.load %arg0[%c1_23, %c64_24] : memref<2x288xf32, #tpu.memory_space<vmem>>, vector<1x64xf32>
    %c10 = arith.constant 10 : index
    %c0_25 = arith.constant 0 : index
    %21 = vector.load %arg10[%c10, %c0_25] : memref<16x64xf32, #tpu.memory_space<vmem>>, vector<1x64xf32>
    tpu.vector_store %arg10[%c10, %c0_25], %20 {strides = array<i32>} : memref<16x64xf32, #tpu.memory_space<vmem>>, vector<1x64xf32>,
    %c1_26 = arith.constant 1 : index
    %c96_27 = arith.constant 96 : index
    %22 = vector.load %arg0[%c1_26, %c96_27] : memref<2x288xf32, #tpu.memory_space<vmem>>, vector<1x64xf32>
    %c11 = arith.constant 11 : index
    %c0_28 = arith.constant 0 : index
    %23 = vector.load %arg10[%c11, %c0_28] : memref<16x64xf32, #tpu.memory_space<vmem>>, vector<1x64xf32>
    tpu.vector_store %arg10[%c11, %c0_28], %22 {strides = array<i32>} : memref<16x64xf32, #tpu.memory_space<vmem>>, vector<1x64xf32>,
    %c1_29 = arith.constant 1 : index
    %c128_30 = arith.constant 128 : index
    %24 = vector.load %arg0[%c1_29, %c128_30] : memref<2x288xf32, #tpu.memory_space<vmem>>, vector<1x64xf32>
    %c12 = arith.constant 12 : index
    %c0_31 = arith.constant 0 : index
    %25 = vector.load %arg10[%c12, %c0_31] : memref<16x64xf32, #tpu.memory_space<vmem>>, vector<1x64xf32>
    tpu.vector_store %arg10[%c12, %c0_31], %24 {strides = array<i32>} : memref<16x64xf32, #tpu.memory_space<vmem>>, vector<1x64xf32>,
    %c1_32 = arith.constant 1 : index
    %c160_33 = arith.constant 160 : index
    %26 = vector.load %arg0[%c1_32, %c160_33] : memref<2x288xf32, #tpu.memory_space<vmem>>, vector<1x64xf32>
    %c13 = arith.constant 13 : index
    %c0_34 = arith.constant 0 : index
    %27 = vector.load %arg10[%c13, %c0_34] : memref<16x64xf32, #tpu.memory_space<vmem>>, vector<1x64xf32>
    tpu.vector_store %arg10[%c13, %c0_34], %26 {strides = array<i32>} : memref<16x64xf32, #tpu.memory_space<vmem>>, vector<1x64xf32>,
    %c1_35 = arith.constant 1 : index
    %c192_36 = arith.constant 192 : index
    %28 = vector.load %arg0[%c1_35, %c192_36] : memref<2x288xf32, #tpu.memory_space<vmem>>, vector<1x64xf32>
    %c14 = arith.constant 14 : index
    %c0_37 = arith.constant 0 : index
    %29 = vector.load %arg10[%c14, %c0_37] : memref<16x64xf32, #tpu.memory_space<vmem>>, vector<1x64xf32>
    tpu.vector_store %arg10[%c14, %c0_37], %28 {strides = array<i32>} : memref<16x64xf32, #tpu.memory_space<vmem>>, vector<1x64xf32>,
    %c1_38 = arith.constant 1 : index
    %c224_39 = arith.constant 224 : index
    %30 = vector.load %arg0[%c1_38, %c224_39] : memref<2x288xf32, #tpu.memory_space<vmem>>, vector<1x64xf32>
    %c15 = arith.constant 15 : index
    %c0_40 = arith.constant 0 : index
    %31 = vector.load %arg10[%c15, %c0_40] : memref<16x64xf32, #tpu.memory_space<vmem>>, vector<1x64xf32>
    tpu.vector_store %arg10[%c15, %c0_40], %30 {strides = array<i32>} : memref<16x64xf32, #tpu.memory_space<vmem>>, vector<1x64xf32>,
    %c0_41 = arith.constant 0 : index
    %c0_42 = arith.constant 0 : index
    %32 = vector.load %arg10[%c0_41, %c0_42] : memref<16x64xf32, #tpu.memory_space<vmem>>, vector<16x64xf32>
    %c0_43 = arith.constant 0 : index
    %c0_44 = arith.constant 0 : index
    %33 = vector.load %arg1[%c0_43, %c0_44] : memref<64x128xf32, #tpu.memory_space<vmem>>, vector<64x128xf32>
    %cst = arith.constant dense<0.000000e+00> : vector<16x128xf32>
    %34 = tpu.matmul %32, %33, %cst {dimension_numbers = #tpu.dot_dimension_numbers<[1], [0], [0], [1], [0, 0, 1, 1], [], []>} : vector<16x64xf32>, vector<64x128xf32>, vector<16x128xf32> -> vector<16x128xf32>
    %35 = arith.mulf %34, %34 : vector<16x128xf32>
    %c0_45 = arith.constant 0 : index
    %c0_46 = arith.constant 0 : index
    %36 = vector.load %arg2[%c0_45, %c0_46] : memref<128x16xf32, #tpu.memory_space<vmem>>, vector<128x16xf32>
    %cst_47 = arith.constant dense<0.000000e+00> : vector<16x16xf32>
    %37 = tpu.matmul %35, %36, %cst_47 {dimension_numbers = #tpu.dot_dimension_numbers<[1], [0], [0], [1], [0, 0, 1, 1], [], []>} : vector<16x128xf32>, vector<128x16xf32>, vector<16x16xf32> -> vector<16x16xf32>
    %cst_48 = arith.constant 1.000000e-10 : f32
    %38 = vector.broadcast %cst_48 : f32 to vector<16x16xf32>
    %39 = arith.maximumf %37, %38 : vector<16x16xf32>
    %40 = math.log %39 : vector<16x16xf32>
    %cst_49 = arith.constant 4.34294462 : f32
    %41 = vector.broadcast %cst_49 : f32 to vector<16x16xf32>
    %42 = arith.mulf %41, %40 : vector<16x16xf32>
    %43 = vector.extract_strided_slice %42 {offsets = [0, 0], sizes = [8, 16], strides = [1, 1]} : vector<16x16xf32> to vector<8x16xf32>
    %cst_50 = arith.constant dense<0xFF800000> : vector<8xf32>
    %44 = vector.multi_reduction <maximumf>, %43, %cst_50 [1] : vector<8x16xf32> to vector<8xf32>
    %45 = vector.shape_cast %44 : vector<8xf32> to vector<8x1xf32>
    %cst_51 = arith.constant dense<0xFF800000> : vector<1xf32>
    %46 = vector.multi_reduction <maximumf>, %45, %cst_51 [0] : vector<8x1xf32> to vector<1xf32>
    %47 = vector.shape_cast %46 : vector<1xf32> to vector<1x1xf32>
    %cst_52 = arith.constant 8.000000e+01 : f32
    %48 = vector.broadcast %cst_52 : f32 to vector<1x1xf32>
    %49 = arith.subf %47, %48 : vector<1x1xf32>
    %50 = vector.broadcast %49 : vector<1x1xf32> to vector<8x16xf32>
    %51 = arith.maximumf %43, %50 : vector<8x16xf32>
    %52 = vector.extract_strided_slice %42 {offsets = [8, 0], sizes = [8, 16], strides = [1, 1]} : vector<16x16xf32> to vector<8x16xf32>
    %cst_53 = arith.constant dense<0xFF800000> : vector<8xf32>
    %53 = vector.multi_reduction <maximumf>, %52, %cst_53 [1] : vector<8x16xf32> to vector<8xf32>
    %54 = vector.shape_cast %53 : vector<8xf32> to vector<8x1xf32>
    %cst_54 = arith.constant dense<0xFF800000> : vector<1xf32>
    %55 = vector.multi_reduction <maximumf>, %54, %cst_54 [0] : vector<8x1xf32> to vector<1xf32>
    %56 = vector.shape_cast %55 : vector<1xf32> to vector<1x1xf32>
    %cst_55 = arith.constant 8.000000e+01 : f32
    %57 = vector.broadcast %cst_55 : f32 to vector<1x1xf32>
    %58 = arith.subf %56, %57 : vector<1x1xf32>
    %59 = vector.broadcast %58 : vector<1x1xf32> to vector<8x16xf32>
    %60 = arith.maximumf %52, %59 : vector<8x16xf32>
    %61 = tpu.concatenate %51, %60 in 0 : vector<8x16xf32>, vector<8x16xf32> -> vector<16x16xf32>
    %c0_56 = arith.constant 0 : index
    %c0_57 = arith.constant 0 : index
    %c0_58 = arith.constant 0 : index
    %62 = vector.load %arg5[%c0_56, %c0_57, %c0_58] : memref<5x16x32xbf16, #tpu.memory_space<vmem>>, vector<1x16x32xbf16>
    %63 = vector.shape_cast %62 : vector<1x16x32xbf16> to vector<16x32xbf16>
    %c1_59 = arith.constant 1 : index
    %c0_60 = arith.constant 0 : index
    %c0_61 = arith.constant 0 : index
    %64 = vector.load %arg5[%c1_59, %c0_60, %c0_61] : memref<5x16x32xbf16, #tpu.memory_space<vmem>>, vector<1x16x32xbf16>
    %65 = vector.shape_cast %64 : vector<1x16x32xbf16> to vector<16x32xbf16>
    %c2_62 = arith.constant 2 : index
    %c0_63 = arith.constant 0 : index
    %c0_64 = arith.constant 0 : index
    %66 = vector.load %arg5[%c2_62, %c0_63, %c0_64] : memref<5x16x32xbf16, #tpu.memory_space<vmem>>, vector<1x16x32xbf16>
    %67 = vector.shape_cast %66 : vector<1x16x32xbf16> to vector<16x32xbf16>
    %c3_65 = arith.constant 3 : index
    %c0_66 = arith.constant 0 : index
    %c0_67 = arith.constant 0 : index
    %68 = vector.load %arg5[%c3_65, %c0_66, %c0_67] : memref<5x16x32xbf16, #tpu.memory_space<vmem>>, vector<1x16x32xbf16>
    %69 = vector.shape_cast %68 : vector<1x16x32xbf16> to vector<16x32xbf16>
    %c4_68 = arith.constant 4 : index
    %c0_69 = arith.constant 0 : index
    %c0_70 = arith.constant 0 : index
    %70 = vector.load %arg5[%c4_68, %c0_69, %c0_70] : memref<5x16x32xbf16, #tpu.memory_space<vmem>>, vector<1x16x32xbf16>
    %71 = vector.shape_cast %70 : vector<1x16x32xbf16> to vector<16x32xbf16>
    %cst_71 = arith.constant 0.000000e+00 : f32
    %72 = vector.broadcast %cst_71 : f32 to vector<16x32xf32>
    %c0_72 = arith.constant 0 : index
    %c0_73 = arith.constant 0 : index
    %c0_74 = arith.constant 0 : index
    %73 = vector.load %arg3[%c0_72, %c0_73, %c0_74] : memref<16x16x16xf32, #tpu.memory_space<vmem>>, vector<1x16x16xf32>
    %74 = vector.shape_cast %73 : vector<1x16x16xf32> to vector<16x16xf32>
    %cst_75 = arith.constant dense<0.000000e+00> : vector<16x16xf32>
    %75 = tpu.matmul %74, %61, %cst_75 {dimension_numbers = #tpu.dot_dimension_numbers<[1], [0], [0], [1], [0, 0, 1, 1], [], []>} : vector<16x16xf32>, vector<16x16xf32>, vector<16x16xf32> -> vector<16x16xf32>
    %76 = arith.truncf %75 : vector<16x16xf32> to vector<16x16xbf16>
    %cst_76 = arith.constant dense<0.000000e+00> : vector<16x32xf32>
    %77 = tpu.matmul %76, %63, %cst_76 {dimension_numbers = #tpu.dot_dimension_numbers<[1], [0], [0], [1], [0, 0, 1, 1], [], []>} : vector<16x16xbf16>, vector<16x32xbf16>, vector<16x32xf32> -> vector<16x32xf32>
    %78 = arith.addf %72, %77 : vector<16x32xf32>
    %c1_77 = arith.constant 1 : index
    %c0_78 = arith.constant 0 : index
    %c0_79 = arith.constant 0 : index
    %79 = vector.load %arg3[%c1_77, %c0_78, %c0_79] : memref<16x16x16xf32, #tpu.memory_space<vmem>>, vector<1x16x16xf32>
    %80 = vector.shape_cast %79 : vector<1x16x16xf32> to vector<16x16xf32>
    %cst_80 = arith.constant dense<0.000000e+00> : vector<16x16xf32>
    %81 = tpu.matmul %80, %61, %cst_80 {dimension_numbers = #tpu.dot_dimension_numbers<[1], [0], [0], [1], [0, 0, 1, 1], [], []>} : vector<16x16xf32>, vector<16x16xf32>, vector<16x16xf32> -> vector<16x16xf32>
    %82 = arith.truncf %81 : vector<16x16xf32> to vector<16x16xbf16>
    %cst_81 = arith.constant dense<0.000000e+00> : vector<16x32xf32>
    %83 = tpu.matmul %82, %65, %cst_81 {dimension_numbers = #tpu.dot_dimension_numbers<[1], [0], [0], [1], [0, 0, 1, 1], [], []>} : vector<16x16xbf16>, vector<16x32xbf16>, vector<16x32xf32> -> vector<16x32xf32>
    %84 = arith.addf %78, %83 : vector<16x32xf32>
    %85 = arith.truncf %61 : vector<16x16xf32> to vector<16x16xbf16>
    %cst_82 = arith.constant dense<0.000000e+00> : vector<16x32xf32>
    %86 = tpu.matmul %85, %67, %cst_82 {dimension_numbers = #tpu.dot_dimension_numbers<[1], [0], [0], [1], [0, 0, 1, 1], [], []>} : vector<16x16xbf16>, vector<16x32xbf16>, vector<16x32xf32> -> vector<16x32xf32>
    %87 = arith.addf %84, %86 : vector<16x32xf32>
    %c3_83 = arith.constant 3 : index
    %c0_84 = arith.constant 0 : index
    %c0_85 = arith.constant 0 : index
    %88 = vector.load %arg3[%c3_83, %c0_84, %c0_85] : memref<16x16x16xf32, #tpu.memory_space<vmem>>, vector<1x16x16xf32>
    %89 = vector.shape_cast %88 : vector<1x16x16xf32> to vector<16x16xf32>
    %cst_86 = arith.constant dense<0.000000e+00> : vector<16x16xf32>
    %90 = tpu.matmul %89, %61, %cst_86 {dimension_numbers = #tpu.dot_dimension_numbers<[1], [0], [0], [1], [0, 0, 1, 1], [], []>} : vector<16x16xf32>, vector<16x16xf32>, vector<16x16xf32> -> vector<16x16xf32>
    %91 = arith.truncf %90 : vector<16x16xf32> to vector<16x16xbf16>
    %cst_87 = arith.constant dense<0.000000e+00> : vector<16x32xf32>
    %92 = tpu.matmul %91, %69, %cst_87 {dimension_numbers = #tpu.dot_dimension_numbers<[1], [0], [0], [1], [0, 0, 1, 1], [], []>} : vector<16x16xbf16>, vector<16x32xbf16>, vector<16x32xf32> -> vector<16x32xf32>
    %93 = arith.addf %87, %92 : vector<16x32xf32>
    %c4_88 = arith.constant 4 : index
    %c0_89 = arith.constant 0 : index
    %c0_90 = arith.constant 0 : index
    %94 = vector.load %arg3[%c4_88, %c0_89, %c0_90] : memref<16x16x16xf32, #tpu.memory_space<vmem>>, vector<1x16x16xf32>
    %95 = vector.shape_cast %94 : vector<1x16x16xf32> to vector<16x16xf32>
    %cst_91 = arith.constant dense<0.000000e+00> : vector<16x16xf32>
    %96 = tpu.matmul %95, %61, %cst_91 {dimension_numbers = #tpu.dot_dimension_numbers<[1], [0], [0], [1], [0, 0, 1, 1], [], []>} : vector<16x16xf32>, vector<16x16xf32>, vector<16x16xf32> -> vector<16x16xf32>
    %97 = arith.truncf %96 : vector<16x16xf32> to vector<16x16xbf16>
    %cst_92 = arith.constant dense<0.000000e+00> : vector<16x32xf32>
    %98 = tpu.matmul %97, %71, %cst_92 {dimension_numbers = #tpu.dot_dimension_numbers<[1], [0], [0], [1], [0, 0, 1, 1], [], []>} : vector<16x16xbf16>, vector<16x32xbf16>, vector<16x32xf32> -> vector<16x32xf32>
    %99 = arith.addf %93, %98 : vector<16x32xf32>
    %c0_93 = arith.constant 0 : index
    %c0_94 = arith.constant 0 : index
    %100 = vector.load %arg4[%c0_93, %c0_94] : memref<64x128xf32, #tpu.memory_space<vmem>>, vector<1x32xf32>
    %101 = vector.broadcast %100 : vector<1x32xf32> to vector<16x32xf32>
    %102 = arith.addf %99, %101 : vector<16x32xf32>
    %cst_95 = arith.constant 0.000000e+00 : f32
    %103 = vector.broadcast %cst_95 : f32 to vector<16x32xf32>
    %104 = arith.maximumf %102, %103 : vector<16x32xf32>
    %c1_96 = arith.constant 1 : index
    %c0_97 = arith.constant 0 : index
    %105 = vector.load %arg4[%c1_96, %c0_97] : memref<64x128xf32, #tpu.memory_space<vmem>>, vector<1x32xf32>
    %106 = vector.broadcast %105 : vector<1x32xf32> to vector<16x32xf32>
    %107 = arith.mulf %104, %106 : vector<16x32xf32>
    %c2_98 = arith.constant 2 : index
    %c0_99 = arith.constant 0 : index
    %108 = vector.load %arg4[%c2_98, %c0_99] : memref<64x128xf32, #tpu.memory_space<vmem>>, vector<1x32xf32>
    %109 = vector.broadcast %108 : vector<1x32xf32> to vector<16x32xf32>
    %110 = arith.addf %107, %109 : vector<16x32xf32>
    %c14_100 = arith.constant 14 : index
    %c0_101 = arith.constant 0 : index
    %c0_102 = arith.constant 0 : index
    %111 = vector.load %arg3[%c14_100, %c0_101, %c0_102] : memref<16x16x16xf32, #tpu.memory_space<vmem>>, vector<1x16x16xf32>
    %112 = vector.shape_cast %111 : vector<1x16x16xf32> to vector<16x16xf32>
    %113 = vector.extract_strided_slice %112 {offsets = [0, 0], sizes = [2, 16], strides = [1, 1]} : vector<16x16xf32> to vector<2x16xf32>
    %c15_103 = arith.constant 15 : index
    %c0_104 = arith.constant 0 : index
    %c0_105 = arith.constant 0 : index
    %114 = vector.load %arg3[%c15_103, %c0_104, %c0_105] : memref<16x16x16xf32, #tpu.memory_space<vmem>>, vector<1x16x16xf32>
    %115 = vector.shape_cast %114 : vector<1x16x16xf32> to vector<16x16xf32>
    %116 = vector.extract_strided_slice %115 {offsets = [0, 0], sizes = [16, 2], strides = [1, 1]} : vector<16x16xf32> to vector<16x2xf32>
    %c0_106 = arith.constant 0 : index
    %c0_107 = arith.constant 0 : index
    %c0_108 = arith.constant 0 : index
    %117 = vector.load %arg7[%c0_106, %c0_107, %c0_108] : memref<12x32x32xbf16, #tpu.memory_space<vmem>>, vector<1x32x32xbf16>
    %118 = vector.shape_cast %117 : vector<1x32x32xbf16> to vector<32x32xbf16>
    %119 = arith.truncf %110 : vector<16x32xf32> to vector<16x32xbf16>
    %cst_109 = arith.constant dense<0.000000e+00> : vector<16x32xf32>
    %120 = tpu.matmul %119, %118, %cst_109 {dimension_numbers = #tpu.dot_dimension_numbers<[1], [0], [0], [1], [0, 0, 1, 1], [], []>} : vector<16x32xbf16>, vector<32x32xbf16>, vector<16x32xf32> -> vector<16x32xf32>
    %c3_110 = arith.constant 3 : index
    %c0_111 = arith.constant 0 : index
    %121 = vector.load %arg4[%c3_110, %c0_111] : memref<64x128xf32, #tpu.memory_space<vmem>>, vector<1x32xf32>
    %122 = vector.broadcast %121 : vector<1x32xf32> to vector<16x32xf32>
    %123 = arith.addf %120, %122 : vector<16x32xf32>
    %cst_112 = arith.constant 0.000000e+00 : f32
    %124 = vector.broadcast %cst_112 : f32 to vector<16x32xf32>
    %125 = arith.maximumf %123, %124 : vector<16x32xf32>
    %c4_113 = arith.constant 4 : index
    %c0_114 = arith.constant 0 : index
    %126 = vector.load %arg4[%c4_113, %c0_114] : memref<64x128xf32, #tpu.memory_space<vmem>>, vector<1x32xf32>
    %127 = vector.broadcast %126 : vector<1x32xf32> to vector<16x32xf32>
    %128 = arith.mulf %125, %127 : vector<16x32xf32>
    %c5_115 = arith.constant 5 : index
    %c0_116 = arith.constant 0 : index
    %129 = vector.load %arg4[%c5_115, %c0_116] : memref<64x128xf32, #tpu.memory_space<vmem>>, vector<1x32xf32>
    %130 = vector.broadcast %129 : vector<1x32xf32> to vector<16x32xf32>
    %131 = arith.addf %128, %130 : vector<16x32xf32>
    %132 = vector.extract_strided_slice %131 {offsets = [0, 0], sizes = [16, 8], strides = [1, 1]} : vector<16x32xf32> to vector<16x8xf32>
    %133 = vector.extract_strided_slice %131 {offsets = [0, 8], sizes = [16, 8], strides = [1, 1]} : vector<16x32xf32> to vector<16x8xf32>
    %c0_117 = arith.constant 0 : index
    %c0_118 = arith.constant 0 : index
    %c0_119 = arith.constant 0 : index
    %134 = vector.load %arg6[%c0_117, %c0_118, %c0_119] : memref<27x8x8xbf16, #tpu.memory_space<vmem>>, vector<1x8x8xbf16>
    %135 = vector.shape_cast %134 : vector<1x8x8xbf16> to vector<8x8xbf16>
    %c1_120 = arith.constant 1 : index
    %c0_121 = arith.constant 0 : index
    %c0_122 = arith.constant 0 : index
    %136 = vector.load %arg6[%c1_120, %c0_121, %c0_122] : memref<27x8x8xbf16, #tpu.memory_space<vmem>>, vector<1x8x8xbf16>
    %137 = vector.shape_cast %136 : vector<1x8x8xbf16> to vector<8x8xbf16>
    %c2_123 = arith.constant 2 : index
    %c0_124 = arith.constant 0 : index
    %c0_125 = arith.constant 0 : index
    %138 = vector.load %arg6[%c2_123, %c0_124, %c0_125] : memref<27x8x8xbf16, #tpu.memory_space<vmem>>, vector<1x8x8xbf16>
    %139 = vector.shape_cast %138 : vector<1x8x8xbf16> to vector<8x8xbf16>
    %cst_126 = arith.constant 0.000000e+00 : f32
    %140 = vector.broadcast %cst_126 : f32 to vector<16x8xf32>
    %c5_127 = arith.constant 5 : index
    %c0_128 = arith.constant 0 : index
    %c0_129 = arith.constant 0 : index
    %141 = vector.load %arg3[%c5_127, %c0_128, %c0_129] : memref<16x16x16xf32, #tpu.memory_space<vmem>>, vector<1x16x16xf32>
    %142 = vector.shape_cast %141 : vector<1x16x16xf32> to vector<16x16xf32>
    %cst_130 = arith.constant dense<0.000000e+00> : vector<16x8xf32>
    %143 = tpu.matmul %142, %133, %cst_130 {dimension_numbers = #tpu.dot_dimension_numbers<[1], [0], [0], [1], [0, 0, 1, 1], [], []>} : vector<16x16xf32>, vector<16x8xf32>, vector<16x8xf32> -> vector<16x8xf32>
    %144 = arith.truncf %143 : vector<16x8xf32> to vector<16x8xbf16>
    %cst_131 = arith.constant dense<0.000000e+00> : vector<16x8xf32>
    %145 = tpu.matmul %144, %135, %cst_131 {dimension_numbers = #tpu.dot_dimension_numbers<[1], [0], [0], [1], [0, 0, 1, 1], [], []>} : vector<16x8xbf16>, vector<8x8xbf16>, vector<16x8xf32> -> vector<16x8xf32>
    %146 = arith.addf %140, %145 : vector<16x8xf32>
    %147 = arith.truncf %133 : vector<16x8xf32> to vector<16x8xbf16>
    %cst_132 = arith.constant dense<0.000000e+00> : vector<16x8xf32>
    %148 = tpu.matmul %147, %137, %cst_132 {dimension_numbers = #tpu.dot_dimension_numbers<[1], [0], [0], [1], [0, 0, 1, 1], [], []>} : vector<16x8xbf16>, vector<8x8xbf16>, vector<16x8xf32> -> vector<16x8xf32>
    %149 = arith.addf %146, %148 : vector<16x8xf32>
    %c7_133 = arith.constant 7 : index
    %c0_134 = arith.constant 0 : index
    %c0_135 = arith.constant 0 : index
    %150 = vector.load %arg3[%c7_133, %c0_134, %c0_135] : memref<16x16x16xf32, #tpu.memory_space<vmem>>, vector<1x16x16xf32>
    %151 = vector.shape_cast %150 : vector<1x16x16xf32> to vector<16x16xf32>
    %cst_136 = arith.constant dense<0.000000e+00> : vector<16x8xf32>
    %152 = tpu.matmul %151, %133, %cst_136 {dimension_numbers = #tpu.dot_dimension_numbers<[1], [0], [0], [1], [0, 0, 1, 1], [], []>} : vector<16x16xf32>, vector<16x8xf32>, vector<16x8xf32> -> vector<16x8xf32>
    %153 = arith.truncf %152 : vector<16x8xf32> to vector<16x8xbf16>
    %cst_137 = arith.constant dense<0.000000e+00> : vector<16x8xf32>
    %154 = tpu.matmul %153, %139, %cst_137 {dimension_numbers = #tpu.dot_dimension_numbers<[1], [0], [0], [1], [0, 0, 1, 1], [], []>} : vector<16x8xbf16>, vector<8x8xbf16>, vector<16x8xf32> -> vector<16x8xf32>
    %155 = arith.addf %149, %154 : vector<16x8xf32>
    %c6_138 = arith.constant 6 : index
    %c0_139 = arith.constant 0 : index
    %156 = vector.load %arg4[%c6_138, %c0_139] : memref<64x128xf32, #tpu.memory_space<vmem>>, vector<1x8xf32>
    %157 = vector.broadcast %156 : vector<1x8xf32> to vector<16x8xf32>
    %158 = arith.addf %155, %157 : vector<16x8xf32>
    %cst_140 = arith.constant 0.000000e+00 : f32
    %159 = vector.broadcast %cst_140 : f32 to vector<16x8xf32>
    %160 = arith.maximumf %158, %159 : vector<16x8xf32>
    %c7_141 = arith.constant 7 : index
    %c0_142 = arith.constant 0 : index
    %161 = vector.load %arg4[%c7_141, %c0_142] : memref<64x128xf32, #tpu.memory_space<vmem>>, vector<1x8xf32>
    %162 = vector.broadcast %161 : vector<1x8xf32> to vector<16x8xf32>
    %163 = arith.mulf %160, %162 : vector<16x8xf32>
    %c8_143 = arith.constant 8 : index
    %c0_144 = arith.constant 0 : index
    %164 = vector.load %arg4[%c8_143, %c0_144] : memref<64x128xf32, #tpu.memory_space<vmem>>, vector<1x8xf32>
    %165 = vector.broadcast %164 : vector<1x8xf32> to vector<16x8xf32>
    %166 = arith.addf %163, %165 : vector<16x8xf32>
    %167 = vector.extract_strided_slice %131 {offsets = [0, 16], sizes = [16, 8], strides = [1, 1]} : vector<16x32xf32> to vector<16x8xf32>
    %168 = arith.addf %167, %166 : vector<16x8xf32>
    %c3_145 = arith.constant 3 : index
    %c0_146 = arith.constant 0 : index
    %c0_147 = arith.constant 0 : index
    %169 = vector.load %arg6[%c3_145, %c0_146, %c0_147] : memref<27x8x8xbf16, #tpu.memory_space<vmem>>, vector<1x8x8xbf16>
    %170 = vector.shape_cast %169 : vector<1x8x8xbf16> to vector<8x8xbf16>
    %c4_148 = arith.constant 4 : index
    %c0_149 = arith.constant 0 : index
    %c0_150 = arith.constant 0 : index
    %171 = vector.load %arg6[%c4_148, %c0_149, %c0_150] : memref<27x8x8xbf16, #tpu.memory_space<vmem>>, vector<1x8x8xbf16>
    %172 = vector.shape_cast %171 : vector<1x8x8xbf16> to vector<8x8xbf16>
    %c5_151 = arith.constant 5 : index
    %c0_152 = arith.constant 0 : index
    %c0_153 = arith.constant 0 : index
    %173 = vector.load %arg6[%c5_151, %c0_152, %c0_153] : memref<27x8x8xbf16, #tpu.memory_space<vmem>>, vector<1x8x8xbf16>
    %174 = vector.shape_cast %173 : vector<1x8x8xbf16> to vector<8x8xbf16>
    %cst_154 = arith.constant 0.000000e+00 : f32
    %175 = vector.broadcast %cst_154 : f32 to vector<16x8xf32>
    %c5_155 = arith.constant 5 : index
    %c0_156 = arith.constant 0 : index
    %c0_157 = arith.constant 0 : index
    %176 = vector.load %arg3[%c5_155, %c0_156, %c0_157] : memref<16x16x16xf32, #tpu.memory_space<vmem>>, vector<1x16x16xf32>
    %177 = vector.shape_cast %176 : vector<1x16x16xf32> to vector<16x16xf32>
    %cst_158 = arith.constant dense<0.000000e+00> : vector<16x8xf32>
    %178 = tpu.matmul %177, %168, %cst_158 {dimension_numbers = #tpu.dot_dimension_numbers<[1], [0], [0], [1], [0, 0, 1, 1], [], []>} : vector<16x16xf32>, vector<16x8xf32>, vector<16x8xf32> -> vector<16x8xf32>
    %179 = arith.truncf %178 : vector<16x8xf32> to vector<16x8xbf16>
    %cst_159 = arith.constant dense<0.000000e+00> : vector<16x8xf32>
    %180 = tpu.matmul %179, %170, %cst_159 {dimension_numbers = #tpu.dot_dimension_numbers<[1], [0], [0], [1], [0, 0, 1, 1], [], []>} : vector<16x8xbf16>, vector<8x8xbf16>, vector<16x8xf32> -> vector<16x8xf32>
    %181 = arith.addf %175, %180 : vector<16x8xf32>
    %182 = arith.truncf %168 : vector<16x8xf32> to vector<16x8xbf16>
    %cst_160 = arith.constant dense<0.000000e+00> : vector<16x8xf32>
    %183 = tpu.matmul %182, %172, %cst_160 {dimension_numbers = #tpu.dot_dimension_numbers<[1], [0], [0], [1], [0, 0, 1, 1], [], []>} : vector<16x8xbf16>, vector<8x8xbf16>, vector<16x8xf32> -> vector<16x8xf32>
    %184 = arith.addf %181, %183 : vector<16x8xf32>
    %c7_161 = arith.constant 7 : index
    %c0_162 = arith.constant 0 : index
    %c0_163 = arith.constant 0 : index
    %185 = vector.load %arg3[%c7_161, %c0_162, %c0_163] : memref<16x16x16xf32, #tpu.memory_space<vmem>>, vector<1x16x16xf32>
    %186 = vector.shape_cast %185 : vector<1x16x16xf32> to vector<16x16xf32>
    %cst_164 = arith.constant dense<0.000000e+00> : vector<16x8xf32>
    %187 = tpu.matmul %186, %168, %cst_164 {dimension_numbers = #tpu.dot_dimension_numbers<[1], [0], [0], [1], [0, 0, 1, 1], [], []>} : vector<16x16xf32>, vector<16x8xf32>, vector<16x8xf32> -> vector<16x8xf32>
    %188 = arith.truncf %187 : vector<16x8xf32> to vector<16x8xbf16>
    %cst_165 = arith.constant dense<0.000000e+00> : vector<16x8xf32>
    %189 = tpu.matmul %188, %174, %cst_165 {dimension_numbers = #tpu.dot_dimension_numbers<[1], [0], [0], [1], [0, 0, 1, 1], [], []>} : vector<16x8xbf16>, vector<8x8xbf16>, vector<16x8xf32> -> vector<16x8xf32>
    %190 = arith.addf %184, %189 : vector<16x8xf32>
    %c9_166 = arith.constant 9 : index
    %c0_167 = arith.constant 0 : index
    %191 = vector.load %arg4[%c9_166, %c0_167] : memref<64x128xf32, #tpu.memory_space<vmem>>, vector<1x8xf32>
    %192 = vector.broadcast %191 : vector<1x8xf32> to vector<16x8xf32>
    %193 = arith.addf %190, %192 : vector<16x8xf32>
    %cst_168 = arith.constant 0.000000e+00 : f32
    %194 = vector.broadcast %cst_168 : f32 to vector<16x8xf32>
    %195 = arith.maximumf %193, %194 : vector<16x8xf32>
    %c10_169 = arith.constant 10 : index
    %c0_170 = arith.constant 0 : index
    %196 = vector.load %arg4[%c10_169, %c0_170] : memref<64x128xf32, #tpu.memory_space<vmem>>, vector<1x8xf32>
    %197 = vector.broadcast %196 : vector<1x8xf32> to vector<16x8xf32>
    %198 = arith.mulf %195, %197 : vector<16x8xf32>
    %c11_171 = arith.constant 11 : index
    %c0_172 = arith.constant 0 : index
    %199 = vector.load %arg4[%c11_171, %c0_172] : memref<64x128xf32, #tpu.memory_space<vmem>>, vector<1x8xf32>
    %200 = vector.broadcast %199 : vector<1x8xf32> to vector<16x8xf32>
    %201 = arith.addf %198, %200 : vector<16x8xf32>
    %202 = vector.extract_strided_slice %131 {offsets = [0, 24], sizes = [16, 8], strides = [1, 1]} : vector<16x32xf32> to vector<16x8xf32>
    %203 = arith.addf %202, %201 : vector<16x8xf32>
    %c6_173 = arith.constant 6 : index
    %c0_174 = arith.constant 0 : index
    %c0_175 = arith.constant 0 : index
    %204 = vector.load %arg6[%c6_173, %c0_174, %c0_175] : memref<27x8x8xbf16, #tpu.memory_space<vmem>>, vector<1x8x8xbf16>
    %205 = vector.shape_cast %204 : vector<1x8x8xbf16> to vector<8x8xbf16>
    %c7_176 = arith.constant 7 : index
    %c0_177 = arith.constant 0 : index
    %c0_178 = arith.constant 0 : index
    %206 = vector.load %arg6[%c7_176, %c0_177, %c0_178] : memref<27x8x8xbf16, #tpu.memory_space<vmem>>, vector<1x8x8xbf16>
    %207 = vector.shape_cast %206 : vector<1x8x8xbf16> to vector<8x8xbf16>
    %c8_179 = arith.constant 8 : index
    %c0_180 = arith.constant 0 : index
    %c0_181 = arith.constant 0 : index
    %208 = vector.load %arg6[%c8_179, %c0_180, %c0_181] : memref<27x8x8xbf16, #tpu.memory_space<vmem>>, vector<1x8x8xbf16>
    %209 = vector.shape_cast %208 : vector<1x8x8xbf16> to vector<8x8xbf16>
    %cst_182 = arith.constant 0.000000e+00 : f32
    %210 = vector.broadcast %cst_182 : f32 to vector<16x8xf32>
    %c5_183 = arith.constant 5 : index
    %c0_184 = arith.constant 0 : index
    %c0_185 = arith.constant 0 : index
    %211 = vector.load %arg3[%c5_183, %c0_184, %c0_185] : memref<16x16x16xf32, #tpu.memory_space<vmem>>, vector<1x16x16xf32>
    %212 = vector.shape_cast %211 : vector<1x16x16xf32> to vector<16x16xf32>
    %cst_186 = arith.constant dense<0.000000e+00> : vector<16x8xf32>
    %213 = tpu.matmul %212, %203, %cst_186 {dimension_numbers = #tpu.dot_dimension_numbers<[1], [0], [0], [1], [0, 0, 1, 1], [], []>} : vector<16x16xf32>, vector<16x8xf32>, vector<16x8xf32> -> vector<16x8xf32>
    %214 = arith.truncf %213 : vector<16x8xf32> to vector<16x8xbf16>
    %cst_187 = arith.constant dense<0.000000e+00> : vector<16x8xf32>
    %215 = tpu.matmul %214, %205, %cst_187 {dimension_numbers = #tpu.dot_dimension_numbers<[1], [0], [0], [1], [0, 0, 1, 1], [], []>} : vector<16x8xbf16>, vector<8x8xbf16>, vector<16x8xf32> -> vector<16x8xf32>
    %216 = arith.addf %210, %215 : vector<16x8xf32>
    %217 = arith.truncf %203 : vector<16x8xf32> to vector<16x8xbf16>
    %cst_188 = arith.constant dense<0.000000e+00> : vector<16x8xf32>
    %218 = tpu.matmul %217, %207, %cst_188 {dimension_numbers = #tpu.dot_dimension_numbers<[1], [0], [0], [1], [0, 0, 1, 1], [], []>} : vector<16x8xbf16>, vector<8x8xbf16>, vector<16x8xf32> -> vector<16x8xf32>
    %219 = arith.addf %216, %218 : vector<16x8xf32>
    %c7_189 = arith.constant 7 : index
    %c0_190 = arith.constant 0 : index
    %c0_191 = arith.constant 0 : index
    %220 = vector.load %arg3[%c7_189, %c0_190, %c0_191] : memref<16x16x16xf32, #tpu.memory_space<vmem>>, vector<1x16x16xf32>
    %221 = vector.shape_cast %220 : vector<1x16x16xf32> to vector<16x16xf32>
    %cst_192 = arith.constant dense<0.000000e+00> : vector<16x8xf32>
    %222 = tpu.matmul %221, %203, %cst_192 {dimension_numbers = #tpu.dot_dimension_numbers<[1], [0], [0], [1], [0, 0, 1, 1], [], []>} : vector<16x16xf32>, vector<16x8xf32>, vector<16x8xf32> -> vector<16x8xf32>
    %223 = arith.truncf %222 : vector<16x8xf32> to vector<16x8xbf16>
    %cst_193 = arith.constant dense<0.000000e+00> : vector<16x8xf32>
    %224 = tpu.matmul %223, %209, %cst_193 {dimension_numbers = #tpu.dot_dimension_numbers<[1], [0], [0], [1], [0, 0, 1, 1], [], []>} : vector<16x8xbf16>, vector<8x8xbf16>, vector<16x8xf32> -> vector<16x8xf32>
    %225 = arith.addf %219, %224 : vector<16x8xf32>
    %c12_194 = arith.constant 12 : index
    %c0_195 = arith.constant 0 : index
    %226 = vector.load %arg4[%c12_194, %c0_195] : memref<64x128xf32, #tpu.memory_space<vmem>>, vector<1x8xf32>
    %227 = vector.broadcast %226 : vector<1x8xf32> to vector<16x8xf32>
    %228 = arith.addf %225, %227 : vector<16x8xf32>
    %cst_196 = arith.constant 0.000000e+00 : f32
    %229 = vector.broadcast %cst_196 : f32 to vector<16x8xf32>
    %230 = arith.maximumf %228, %229 : vector<16x8xf32>
    %c13_197 = arith.constant 13 : index
    %c0_198 = arith.constant 0 : index
    %231 = vector.load %arg4[%c13_197, %c0_198] : memref<64x128xf32, #tpu.memory_space<vmem>>, vector<1x8xf32>
    %232 = vector.broadcast %231 : vector<1x8xf32> to vector<16x8xf32>
    %233 = arith.mulf %230, %232 : vector<16x8xf32>
    %c14_199 = arith.constant 14 : index
    %c0_200 = arith.constant 0 : index
    %234 = vector.load %arg4[%c14_199, %c0_200] : memref<64x128xf32, #tpu.memory_space<vmem>>, vector<1x8xf32>
    %235 = vector.broadcast %234 : vector<1x8xf32> to vector<16x8xf32>
    %236 = arith.addf %233, %235 : vector<16x8xf32>
    %c3_201 = arith.constant 3 : index
    %c0_202 = arith.constant 0 : index
    %c0_203 = arith.constant 0 : index
    %237 = vector.load %arg7[%c3_201, %c0_202, %c0_203] : memref<12x32x32xbf16, #tpu.memory_space<vmem>>, vector<1x32x32xbf16>
    %238 = vector.shape_cast %237 : vector<1x32x32xbf16> to vector<32x32xbf16>
    %cst_204 = arith.constant 0.000000e+00 : f32
    %239 = vector.broadcast %cst_204 : f32 to vector<16x32xf32>
    %240 = vector.extract_strided_slice %238 {offsets = [0, 0], sizes = [8, 32], strides = [1, 1]} : vector<32x32xbf16> to vector<8x32xbf16>
    %241 = arith.truncf %132 : vector<16x8xf32> to vector<16x8xbf16>
    %cst_205 = arith.constant dense<0.000000e+00> : vector<16x32xf32>
    %242 = tpu.matmul %241, %240, %cst_205 {dimension_numbers = #tpu.dot_dimension_numbers<[1], [0], [0], [1], [0, 0, 1, 1], [], []>} : vector<16x8xbf16>, vector<8x32xbf16>, vector<16x32xf32> -> vector<16x32xf32>
    %243 = arith.addf %239, %242 : vector<16x32xf32>
    %244 = vector.extract_strided_slice %238 {offsets = [8, 0], sizes = [8, 32], strides = [1, 1]} : vector<32x32xbf16> to vector<8x32xbf16>
    %245 = arith.truncf %166 : vector<16x8xf32> to vector<16x8xbf16>
    %cst_206 = arith.constant dense<0.000000e+00> : vector<16x32xf32>
    %246 = tpu.matmul %245, %244, %cst_206 {dimension_numbers = #tpu.dot_dimension_numbers<[1], [0], [0], [1], [0, 0, 1, 1], [], []>} : vector<16x8xbf16>, vector<8x32xbf16>, vector<16x32xf32> -> vector<16x32xf32>
    %247 = arith.addf %243, %246 : vector<16x32xf32>
    %248 = vector.extract_strided_slice %238 {offsets = [16, 0], sizes = [8, 32], strides = [1, 1]} : vector<32x32xbf16> to vector<8x32xbf16>
    %249 = arith.truncf %201 : vector<16x8xf32> to vector<16x8xbf16>
    %cst_207 = arith.constant dense<0.000000e+00> : vector<16x32xf32>
    %250 = tpu.matmul %249, %248, %cst_207 {dimension_numbers = #tpu.dot_dimension_numbers<[1], [0], [0], [1], [0, 0, 1, 1], [], []>} : vector<16x8xbf16>, vector<8x32xbf16>, vector<16x32xf32> -> vector<16x32xf32>
    %251 = arith.addf %247, %250 : vector<16x32xf32>
    %252 = vector.extract_strided_slice %238 {offsets = [24, 0], sizes = [8, 32], strides = [1, 1]} : vector<32x32xbf16> to vector<8x32xbf16>
    %253 = arith.truncf %236 : vector<16x8xf32> to vector<16x8xbf16>
    %cst_208 = arith.constant dense<0.000000e+00> : vector<16x32xf32>
    %254 = tpu.matmul %253, %252, %cst_208 {dimension_numbers = #tpu.dot_dimension_numbers<[1], [0], [0], [1], [0, 0, 1, 1], [], []>} : vector<16x8xbf16>, vector<8x32xbf16>, vector<16x32xf32> -> vector<16x32xf32>
    %255 = arith.addf %251, %254 : vector<16x32xf32>
    %c15_209 = arith.constant 15 : index
    %c0_210 = arith.constant 0 : index
    %256 = vector.load %arg4[%c15_209, %c0_210] : memref<64x128xf32, #tpu.memory_space<vmem>>, vector<1x32xf32>
    %257 = vector.broadcast %256 : vector<1x32xf32> to vector<16x32xf32>
    %258 = arith.addf %255, %257 : vector<16x32xf32>
    %cst_211 = arith.constant 0.000000e+00 : f32
    %259 = vector.broadcast %cst_211 : f32 to vector<16x32xf32>
    %260 = arith.maximumf %258, %259 : vector<16x32xf32>
    %c16 = arith.constant 16 : index
    %c0_212 = arith.constant 0 : index
    %261 = vector.load %arg4[%c16, %c0_212] : memref<64x128xf32, #tpu.memory_space<vmem>>, vector<1x32xf32>
    %262 = vector.broadcast %261 : vector<1x32xf32> to vector<16x32xf32>
    %263 = arith.mulf %260, %262 : vector<16x32xf32>
    %c17 = arith.constant 17 : index
    %c0_213 = arith.constant 0 : index
    %264 = vector.load %arg4[%c17, %c0_213] : memref<64x128xf32, #tpu.memory_space<vmem>>, vector<1x32xf32>
    %265 = vector.broadcast %264 : vector<1x32xf32> to vector<16x32xf32>
    %266 = arith.addf %263, %265 : vector<16x32xf32>
    %cst_214 = arith.constant dense<0.000000e+00> : vector<2x32xf32>
    %267 = tpu.matmul %113, %266, %cst_214 {dimension_numbers = #tpu.dot_dimension_numbers<[1], [0], [0], [1], [0, 0, 1, 1], [], []>} : vector<2x16xf32>, vector<16x32xf32>, vector<2x32xf32> -> vector<2x32xf32>
    %c6_215 = arith.constant 6 : index
    %c0_216 = arith.constant 0 : index
    %c0_217 = arith.constant 0 : index
    %268 = vector.load %arg7[%c6_215, %c0_216, %c0_217] : memref<12x32x32xbf16, #tpu.memory_space<vmem>>, vector<1x32x32xbf16>
    %269 = vector.shape_cast %268 : vector<1x32x32xbf16> to vector<32x32xbf16>
    %270 = vector.extract_strided_slice %269 {offsets = [0, 0], sizes = [32, 16], strides = [1, 1]} : vector<32x32xbf16> to vector<32x16xbf16>
    %271 = arith.truncf %267 : vector<2x32xf32> to vector<2x32xbf16>
    %cst_218 = arith.constant dense<0.000000e+00> : vector<2x16xf32>
    %272 = tpu.matmul %271, %270, %cst_218 {dimension_numbers = #tpu.dot_dimension_numbers<[1], [0], [0], [1], [0, 0, 1, 1], [], []>} : vector<2x32xbf16>, vector<32x16xbf16>, vector<2x16xf32> -> vector<2x16xf32>
    %c18 = arith.constant 18 : index
    %c0_219 = arith.constant 0 : index
    %273 = vector.load %arg4[%c18, %c0_219] : memref<64x128xf32, #tpu.memory_space<vmem>>, vector<1x16xf32>
    %274 = vector.broadcast %273 : vector<1x16xf32> to vector<2x16xf32>
    %275 = arith.addf %272, %274 : vector<2x16xf32>
    %cst_220 = arith.constant 0.000000e+00 : f32
    %276 = vector.broadcast %cst_220 : f32 to vector<2x16xf32>
    %277 = arith.maximumf %275, %276 : vector<2x16xf32>
    %c9_221 = arith.constant 9 : index
    %c0_222 = arith.constant 0 : index
    %c0_223 = arith.constant 0 : index
    %278 = vector.load %arg7[%c9_221, %c0_222, %c0_223] : memref<12x32x32xbf16, #tpu.memory_space<vmem>>, vector<1x32x32xbf16>
    %279 = vector.shape_cast %278 : vector<1x32x32xbf16> to vector<32x32xbf16>
    %280 = vector.extract_strided_slice %279 {offsets = [0, 0], sizes = [16, 32], strides = [1, 1]} : vector<32x32xbf16> to vector<16x32xbf16>
    %281 = arith.truncf %277 : vector<2x16xf32> to vector<2x16xbf16>
    %cst_224 = arith.constant dense<0.000000e+00> : vector<2x32xf32>
    %282 = tpu.matmul %281, %280, %cst_224 {dimension_numbers = #tpu.dot_dimension_numbers<[1], [0], [0], [1], [0, 0, 1, 1], [], []>} : vector<2x16xbf16>, vector<16x32xbf16>, vector<2x32xf32> -> vector<2x32xf32>
    %c19 = arith.constant 19 : index
    %c0_225 = arith.constant 0 : index
    %283 = vector.load %arg4[%c19, %c0_225] : memref<64x128xf32, #tpu.memory_space<vmem>>, vector<1x32xf32>
    %284 = vector.broadcast %283 : vector<1x32xf32> to vector<2x32xf32>
    %285 = arith.addf %282, %284 : vector<2x32xf32>
    %286 = arith.negf %285 : vector<2x32xf32>
    %287 = math.exp %286 : vector<2x32xf32>
    %cst_226 = arith.constant 1.000000e+00 : f32
    %288 = vector.broadcast %cst_226 : f32 to vector<2x32xf32>
    %289 = arith.addf %288, %287 : vector<2x32xf32>
    %290 = arith.divf %288, %289 : vector<2x32xf32>
    %cst_227 = arith.constant dense<0.000000e+00> : vector<16x32xf32>
    %291 = tpu.matmul %116, %290, %cst_227 {dimension_numbers = #tpu.dot_dimension_numbers<[1], [0], [0], [1], [0, 0, 1, 1], [], []>} : vector<16x2xf32>, vector<2x32xf32>, vector<16x32xf32> -> vector<16x32xf32>
    %292 = arith.mulf %266, %291 : vector<16x32xf32>
    %293 = arith.addf %292, %110 : vector<16x32xf32>
    %c1_228 = arith.constant 1 : index
    %c0_229 = arith.constant 0 : index
    %c0_230 = arith.constant 0 : index
    %294 = vector.load %arg7[%c1_228, %c0_229, %c0_230] : memref<12x32x32xbf16, #tpu.memory_space<vmem>>, vector<1x32x32xbf16>
    %295 = vector.shape_cast %294 : vector<1x32x32xbf16> to vector<32x32xbf16>
    %296 = arith.truncf %293 : vector<16x32xf32> to vector<16x32xbf16>
    %cst_231 = arith.constant dense<0.000000e+00> : vector<16x32xf32>
    %297 = tpu.matmul %296, %295, %cst_231 {dimension_numbers = #tpu.dot_dimension_numbers<[1], [0], [0], [1], [0, 0, 1, 1], [], []>} : vector<16x32xbf16>, vector<32x32xbf16>, vector<16x32xf32> -> vector<16x32xf32>
    %c20 = arith.constant 20 : index
    %c0_232 = arith.constant 0 : index
    %298 = vector.load %arg4[%c20, %c0_232] : memref<64x128xf32, #tpu.memory_space<vmem>>, vector<1x32xf32>
    %299 = vector.broadcast %298 : vector<1x32xf32> to vector<16x32xf32>
    %300 = arith.addf %297, %299 : vector<16x32xf32>
    %cst_233 = arith.constant 0.000000e+00 : f32
    %301 = vector.broadcast %cst_233 : f32 to vector<16x32xf32>
    %302 = arith.maximumf %300, %301 : vector<16x32xf32>
    %c21 = arith.constant 21 : index
    %c0_234 = arith.constant 0 : index
    %303 = vector.load %arg4[%c21, %c0_234] : memref<64x128xf32, #tpu.memory_space<vmem>>, vector<1x32xf32>
    %304 = vector.broadcast %303 : vector<1x32xf32> to vector<16x32xf32>
    %305 = arith.mulf %302, %304 : vector<16x32xf32>
    %c22 = arith.constant 22 : index
    %c0_235 = arith.constant 0 : index
    %306 = vector.load %arg4[%c22, %c0_235] : memref<64x128xf32, #tpu.memory_space<vmem>>, vector<1x32xf32>
    %307 = vector.broadcast %306 : vector<1x32xf32> to vector<16x32xf32>
    %308 = arith.addf %305, %307 : vector<16x32xf32>
    %309 = vector.extract_strided_slice %308 {offsets = [0, 0], sizes = [16, 8], strides = [1, 1]} : vector<16x32xf32> to vector<16x8xf32>
    %310 = vector.extract_strided_slice %308 {offsets = [0, 8], sizes = [16, 8], strides = [1, 1]} : vector<16x32xf32> to vector<16x8xf32>
    %c9_236 = arith.constant 9 : index
    %c0_237 = arith.constant 0 : index
    %c0_238 = arith.constant 0 : index
    %311 = vector.load %arg6[%c9_236, %c0_237, %c0_238] : memref<27x8x8xbf16, #tpu.memory_space<vmem>>, vector<1x8x8xbf16>
    %312 = vector.shape_cast %311 : vector<1x8x8xbf16> to vector<8x8xbf16>
    %c10_239 = arith.constant 10 : index
    %c0_240 = arith.constant 0 : index
    %c0_241 = arith.constant 0 : index
    %313 = vector.load %arg6[%c10_239, %c0_240, %c0_241] : memref<27x8x8xbf16, #tpu.memory_space<vmem>>, vector<1x8x8xbf16>
    %314 = vector.shape_cast %313 : vector<1x8x8xbf16> to vector<8x8xbf16>
    %c11_242 = arith.constant 11 : index
    %c0_243 = arith.constant 0 : index
    %c0_244 = arith.constant 0 : index
    %315 = vector.load %arg6[%c11_242, %c0_243, %c0_244] : memref<27x8x8xbf16, #tpu.memory_space<vmem>>, vector<1x8x8xbf16>
    %316 = vector.shape_cast %315 : vector<1x8x8xbf16> to vector<8x8xbf16>
    %cst_245 = arith.constant 0.000000e+00 : f32
    %317 = vector.broadcast %cst_245 : f32 to vector<16x8xf32>
    %c8_246 = arith.constant 8 : index
    %c0_247 = arith.constant 0 : index
    %c0_248 = arith.constant 0 : index
    %318 = vector.load %arg3[%c8_246, %c0_247, %c0_248] : memref<16x16x16xf32, #tpu.memory_space<vmem>>, vector<1x16x16xf32>
    %319 = vector.shape_cast %318 : vector<1x16x16xf32> to vector<16x16xf32>
    %cst_249 = arith.constant dense<0.000000e+00> : vector<16x8xf32>
    %320 = tpu.matmul %319, %310, %cst_249 {dimension_numbers = #tpu.dot_dimension_numbers<[1], [0], [0], [1], [0, 0, 1, 1], [], []>} : vector<16x16xf32>, vector<16x8xf32>, vector<16x8xf32> -> vector<16x8xf32>
    %321 = arith.truncf %320 : vector<16x8xf32> to vector<16x8xbf16>
    %cst_250 = arith.constant dense<0.000000e+00> : vector<16x8xf32>
    %322 = tpu.matmul %321, %312, %cst_250 {dimension_numbers = #tpu.dot_dimension_numbers<[1], [0], [0], [1], [0, 0, 1, 1], [], []>} : vector<16x8xbf16>, vector<8x8xbf16>, vector<16x8xf32> -> vector<16x8xf32>
    %323 = arith.addf %317, %322 : vector<16x8xf32>
    %324 = arith.truncf %310 : vector<16x8xf32> to vector<16x8xbf16>
    %cst_251 = arith.constant dense<0.000000e+00> : vector<16x8xf32>
    %325 = tpu.matmul %324, %314, %cst_251 {dimension_numbers = #tpu.dot_dimension_numbers<[1], [0], [0], [1], [0, 0, 1, 1], [], []>} : vector<16x8xbf16>, vector<8x8xbf16>, vector<16x8xf32> -> vector<16x8xf32>
    %326 = arith.addf %323, %325 : vector<16x8xf32>
    %c10_252 = arith.constant 10 : index
    %c0_253 = arith.constant 0 : index
    %c0_254 = arith.constant 0 : index
    %327 = vector.load %arg3[%c10_252, %c0_253, %c0_254] : memref<16x16x16xf32, #tpu.memory_space<vmem>>, vector<1x16x16xf32>
    %328 = vector.shape_cast %327 : vector<1x16x16xf32> to vector<16x16xf32>
    %cst_255 = arith.constant dense<0.000000e+00> : vector<16x8xf32>
    %329 = tpu.matmul %328, %310, %cst_255 {dimension_numbers = #tpu.dot_dimension_numbers<[1], [0], [0], [1], [0, 0, 1, 1], [], []>} : vector<16x16xf32>, vector<16x8xf32>, vector<16x8xf32> -> vector<16x8xf32>
    %330 = arith.truncf %329 : vector<16x8xf32> to vector<16x8xbf16>
    %cst_256 = arith.constant dense<0.000000e+00> : vector<16x8xf32>
    %331 = tpu.matmul %330, %316, %cst_256 {dimension_numbers = #tpu.dot_dimension_numbers<[1], [0], [0], [1], [0, 0, 1, 1], [], []>} : vector<16x8xbf16>, vector<8x8xbf16>, vector<16x8xf32> -> vector<16x8xf32>
    %332 = arith.addf %326, %331 : vector<16x8xf32>
    %c23 = arith.constant 23 : index
    %c0_257 = arith.constant 0 : index
    %333 = vector.load %arg4[%c23, %c0_257] : memref<64x128xf32, #tpu.memory_space<vmem>>, vector<1x8xf32>
    %334 = vector.broadcast %333 : vector<1x8xf32> to vector<16x8xf32>
    %335 = arith.addf %332, %334 : vector<16x8xf32>
    %cst_258 = arith.constant 0.000000e+00 : f32
    %336 = vector.broadcast %cst_258 : f32 to vector<16x8xf32>
    %337 = arith.maximumf %335, %336 : vector<16x8xf32>
    %c24 = arith.constant 24 : index
    %c0_259 = arith.constant 0 : index
    %338 = vector.load %arg4[%c24, %c0_259] : memref<64x128xf32, #tpu.memory_space<vmem>>, vector<1x8xf32>
    %339 = vector.broadcast %338 : vector<1x8xf32> to vector<16x8xf32>
    %340 = arith.mulf %337, %339 : vector<16x8xf32>
    %c25 = arith.constant 25 : index
    %c0_260 = arith.constant 0 : index
    %341 = vector.load %arg4[%c25, %c0_260] : memref<64x128xf32, #tpu.memory_space<vmem>>, vector<1x8xf32>
    %342 = vector.broadcast %341 : vector<1x8xf32> to vector<16x8xf32>
    %343 = arith.addf %340, %342 : vector<16x8xf32>
    %344 = vector.extract_strided_slice %308 {offsets = [0, 16], sizes = [16, 8], strides = [1, 1]} : vector<16x32xf32> to vector<16x8xf32>
    %345 = arith.addf %344, %343 : vector<16x8xf32>
    %c12_261 = arith.constant 12 : index
    %c0_262 = arith.constant 0 : index
    %c0_263 = arith.constant 0 : index
    %346 = vector.load %arg6[%c12_261, %c0_262, %c0_263] : memref<27x8x8xbf16, #tpu.memory_space<vmem>>, vector<1x8x8xbf16>
    %347 = vector.shape_cast %346 : vector<1x8x8xbf16> to vector<8x8xbf16>
    %c13_264 = arith.constant 13 : index
    %c0_265 = arith.constant 0 : index
    %c0_266 = arith.constant 0 : index
    %348 = vector.load %arg6[%c13_264, %c0_265, %c0_266] : memref<27x8x8xbf16, #tpu.memory_space<vmem>>, vector<1x8x8xbf16>
    %349 = vector.shape_cast %348 : vector<1x8x8xbf16> to vector<8x8xbf16>
    %c14_267 = arith.constant 14 : index
    %c0_268 = arith.constant 0 : index
    %c0_269 = arith.constant 0 : index
    %350 = vector.load %arg6[%c14_267, %c0_268, %c0_269] : memref<27x8x8xbf16, #tpu.memory_space<vmem>>, vector<1x8x8xbf16>
    %351 = vector.shape_cast %350 : vector<1x8x8xbf16> to vector<8x8xbf16>
    %cst_270 = arith.constant 0.000000e+00 : f32
    %352 = vector.broadcast %cst_270 : f32 to vector<16x8xf32>
    %c8_271 = arith.constant 8 : index
    %c0_272 = arith.constant 0 : index
    %c0_273 = arith.constant 0 : index
    %353 = vector.load %arg3[%c8_271, %c0_272, %c0_273] : memref<16x16x16xf32, #tpu.memory_space<vmem>>, vector<1x16x16xf32>
    %354 = vector.shape_cast %353 : vector<1x16x16xf32> to vector<16x16xf32>
    %cst_274 = arith.constant dense<0.000000e+00> : vector<16x8xf32>
    %355 = tpu.matmul %354, %345, %cst_274 {dimension_numbers = #tpu.dot_dimension_numbers<[1], [0], [0], [1], [0, 0, 1, 1], [], []>} : vector<16x16xf32>, vector<16x8xf32>, vector<16x8xf32> -> vector<16x8xf32>
    %356 = arith.truncf %355 : vector<16x8xf32> to vector<16x8xbf16>
    %cst_275 = arith.constant dense<0.000000e+00> : vector<16x8xf32>
    %357 = tpu.matmul %356, %347, %cst_275 {dimension_numbers = #tpu.dot_dimension_numbers<[1], [0], [0], [1], [0, 0, 1, 1], [], []>} : vector<16x8xbf16>, vector<8x8xbf16>, vector<16x8xf32> -> vector<16x8xf32>
    %358 = arith.addf %352, %357 : vector<16x8xf32>
    %359 = arith.truncf %345 : vector<16x8xf32> to vector<16x8xbf16>
    %cst_276 = arith.constant dense<0.000000e+00> : vector<16x8xf32>
    %360 = tpu.matmul %359, %349, %cst_276 {dimension_numbers = #tpu.dot_dimension_numbers<[1], [0], [0], [1], [0, 0, 1, 1], [], []>} : vector<16x8xbf16>, vector<8x8xbf16>, vector<16x8xf32> -> vector<16x8xf32>
    %361 = arith.addf %358, %360 : vector<16x8xf32>
    %c10_277 = arith.constant 10 : index
    %c0_278 = arith.constant 0 : index
    %c0_279 = arith.constant 0 : index
    %362 = vector.load %arg3[%c10_277, %c0_278, %c0_279] : memref<16x16x16xf32, #tpu.memory_space<vmem>>, vector<1x16x16xf32>
    %363 = vector.shape_cast %362 : vector<1x16x16xf32> to vector<16x16xf32>
    %cst_280 = arith.constant dense<0.000000e+00> : vector<16x8xf32>
    %364 = tpu.matmul %363, %345, %cst_280 {dimension_numbers = #tpu.dot_dimension_numbers<[1], [0], [0], [1], [0, 0, 1, 1], [], []>} : vector<16x16xf32>, vector<16x8xf32>, vector<16x8xf32> -> vector<16x8xf32>
    %365 = arith.truncf %364 : vector<16x8xf32> to vector<16x8xbf16>
    %cst_281 = arith.constant dense<0.000000e+00> : vector<16x8xf32>
    %366 = tpu.matmul %365, %351, %cst_281 {dimension_numbers = #tpu.dot_dimension_numbers<[1], [0], [0], [1], [0, 0, 1, 1], [], []>} : vector<16x8xbf16>, vector<8x8xbf16>, vector<16x8xf32> -> vector<16x8xf32>
    %367 = arith.addf %361, %366 : vector<16x8xf32>
    %c26 = arith.constant 26 : index
    %c0_282 = arith.constant 0 : index
    %368 = vector.load %arg4[%c26, %c0_282] : memref<64x128xf32, #tpu.memory_space<vmem>>, vector<1x8xf32>
    %369 = vector.broadcast %368 : vector<1x8xf32> to vector<16x8xf32>
    %370 = arith.addf %367, %369 : vector<16x8xf32>
    %cst_283 = arith.constant 0.000000e+00 : f32
    %371 = vector.broadcast %cst_283 : f32 to vector<16x8xf32>
    %372 = arith.maximumf %370, %371 : vector<16x8xf32>
    %c27 = arith.constant 27 : index
    %c0_284 = arith.constant 0 : index
    %373 = vector.load %arg4[%c27, %c0_284] : memref<64x128xf32, #tpu.memory_space<vmem>>, vector<1x8xf32>
    %374 = vector.broadcast %373 : vector<1x8xf32> to vector<16x8xf32>
    %375 = arith.mulf %372, %374 : vector<16x8xf32>
    %c28 = arith.constant 28 : index
    %c0_285 = arith.constant 0 : index
    %376 = vector.load %arg4[%c28, %c0_285] : memref<64x128xf32, #tpu.memory_space<vmem>>, vector<1x8xf32>
    %377 = vector.broadcast %376 : vector<1x8xf32> to vector<16x8xf32>
    %378 = arith.addf %375, %377 : vector<16x8xf32>
    %379 = vector.extract_strided_slice %308 {offsets = [0, 24], sizes = [16, 8], strides = [1, 1]} : vector<16x32xf32> to vector<16x8xf32>
    %380 = arith.addf %379, %378 : vector<16x8xf32>
    %c15_286 = arith.constant 15 : index
    %c0_287 = arith.constant 0 : index
    %c0_288 = arith.constant 0 : index
    %381 = vector.load %arg6[%c15_286, %c0_287, %c0_288] : memref<27x8x8xbf16, #tpu.memory_space<vmem>>, vector<1x8x8xbf16>
    %382 = vector.shape_cast %381 : vector<1x8x8xbf16> to vector<8x8xbf16>
    %c16_289 = arith.constant 16 : index
    %c0_290 = arith.constant 0 : index
    %c0_291 = arith.constant 0 : index
    %383 = vector.load %arg6[%c16_289, %c0_290, %c0_291] : memref<27x8x8xbf16, #tpu.memory_space<vmem>>, vector<1x8x8xbf16>
    %384 = vector.shape_cast %383 : vector<1x8x8xbf16> to vector<8x8xbf16>
    %c17_292 = arith.constant 17 : index
    %c0_293 = arith.constant 0 : index
    %c0_294 = arith.constant 0 : index
    %385 = vector.load %arg6[%c17_292, %c0_293, %c0_294] : memref<27x8x8xbf16, #tpu.memory_space<vmem>>, vector<1x8x8xbf16>
    %386 = vector.shape_cast %385 : vector<1x8x8xbf16> to vector<8x8xbf16>
    %cst_295 = arith.constant 0.000000e+00 : f32
    %387 = vector.broadcast %cst_295 : f32 to vector<16x8xf32>
    %c8_296 = arith.constant 8 : index
    %c0_297 = arith.constant 0 : index
    %c0_298 = arith.constant 0 : index
    %388 = vector.load %arg3[%c8_296, %c0_297, %c0_298] : memref<16x16x16xf32, #tpu.memory_space<vmem>>, vector<1x16x16xf32>
    %389 = vector.shape_cast %388 : vector<1x16x16xf32> to vector<16x16xf32>
    %cst_299 = arith.constant dense<0.000000e+00> : vector<16x8xf32>
    %390 = tpu.matmul %389, %380, %cst_299 {dimension_numbers = #tpu.dot_dimension_numbers<[1], [0], [0], [1], [0, 0, 1, 1], [], []>} : vector<16x16xf32>, vector<16x8xf32>, vector<16x8xf32> -> vector<16x8xf32>
    %391 = arith.truncf %390 : vector<16x8xf32> to vector<16x8xbf16>
    %cst_300 = arith.constant dense<0.000000e+00> : vector<16x8xf32>
    %392 = tpu.matmul %391, %382, %cst_300 {dimension_numbers = #tpu.dot_dimension_numbers<[1], [0], [0], [1], [0, 0, 1, 1], [], []>} : vector<16x8xbf16>, vector<8x8xbf16>, vector<16x8xf32> -> vector<16x8xf32>
    %393 = arith.addf %387, %392 : vector<16x8xf32>
    %394 = arith.truncf %380 : vector<16x8xf32> to vector<16x8xbf16>
    %cst_301 = arith.constant dense<0.000000e+00> : vector<16x8xf32>
    %395 = tpu.matmul %394, %384, %cst_301 {dimension_numbers = #tpu.dot_dimension_numbers<[1], [0], [0], [1], [0, 0, 1, 1], [], []>} : vector<16x8xbf16>, vector<8x8xbf16>, vector<16x8xf32> -> vector<16x8xf32>
    %396 = arith.addf %393, %395 : vector<16x8xf32>
    %c10_302 = arith.constant 10 : index
    %c0_303 = arith.constant 0 : index
    %c0_304 = arith.constant 0 : index
    %397 = vector.load %arg3[%c10_302, %c0_303, %c0_304] : memref<16x16x16xf32, #tpu.memory_space<vmem>>, vector<1x16x16xf32>
    %398 = vector.shape_cast %397 : vector<1x16x16xf32> to vector<16x16xf32>
    %cst_305 = arith.constant dense<0.000000e+00> : vector<16x8xf32>
    %399 = tpu.matmul %398, %380, %cst_305 {dimension_numbers = #tpu.dot_dimension_numbers<[1], [0], [0], [1], [0, 0, 1, 1], [], []>} : vector<16x16xf32>, vector<16x8xf32>, vector<16x8xf32> -> vector<16x8xf32>
    %400 = arith.truncf %399 : vector<16x8xf32> to vector<16x8xbf16>
    %cst_306 = arith.constant dense<0.000000e+00> : vector<16x8xf32>
    %401 = tpu.matmul %400, %386, %cst_306 {dimension_numbers = #tpu.dot_dimension_numbers<[1], [0], [0], [1], [0, 0, 1, 1], [], []>} : vector<16x8xbf16>, vector<8x8xbf16>, vector<16x8xf32> -> vector<16x8xf32>
    %402 = arith.addf %396, %401 : vector<16x8xf32>
    %c29 = arith.constant 29 : index
    %c0_307 = arith.constant 0 : index
    %403 = vector.load %arg4[%c29, %c0_307] : memref<64x128xf32, #tpu.memory_space<vmem>>, vector<1x8xf32>
    %404 = vector.broadcast %403 : vector<1x8xf32> to vector<16x8xf32>
    %405 = arith.addf %402, %404 : vector<16x8xf32>
    %cst_308 = arith.constant 0.000000e+00 : f32
    %406 = vector.broadcast %cst_308 : f32 to vector<16x8xf32>
    %407 = arith.maximumf %405, %406 : vector<16x8xf32>
    %c30 = arith.constant 30 : index
    %c0_309 = arith.constant 0 : index
    %408 = vector.load %arg4[%c30, %c0_309] : memref<64x128xf32, #tpu.memory_space<vmem>>, vector<1x8xf32>
    %409 = vector.broadcast %408 : vector<1x8xf32> to vector<16x8xf32>
    %410 = arith.mulf %407, %409 : vector<16x8xf32>
    %c31 = arith.constant 31 : index
    %c0_310 = arith.constant 0 : index
    %411 = vector.load %arg4[%c31, %c0_310] : memref<64x128xf32, #tpu.memory_space<vmem>>, vector<1x8xf32>
    %412 = vector.broadcast %411 : vector<1x8xf32> to vector<16x8xf32>
    %413 = arith.addf %410, %412 : vector<16x8xf32>
    %c4_311 = arith.constant 4 : index
    %c0_312 = arith.constant 0 : index
    %c0_313 = arith.constant 0 : index
    %414 = vector.load %arg7[%c4_311, %c0_312, %c0_313] : memref<12x32x32xbf16, #tpu.memory_space<vmem>>, vector<1x32x32xbf16>
    %415 = vector.shape_cast %414 : vector<1x32x32xbf16> to vector<32x32xbf16>
    %cst_314 = arith.constant 0.000000e+00 : f32
    %416 = vector.broadcast %cst_314 : f32 to vector<16x32xf32>
    %417 = vector.extract_strided_slice %415 {offsets = [0, 0], sizes = [8, 32], strides = [1, 1]} : vector<32x32xbf16> to vector<8x32xbf16>
    %418 = arith.truncf %309 : vector<16x8xf32> to vector<16x8xbf16>
    %cst_315 = arith.constant dense<0.000000e+00> : vector<16x32xf32>
    %419 = tpu.matmul %418, %417, %cst_315 {dimension_numbers = #tpu.dot_dimension_numbers<[1], [0], [0], [1], [0, 0, 1, 1], [], []>} : vector<16x8xbf16>, vector<8x32xbf16>, vector<16x32xf32> -> vector<16x32xf32>
    %420 = arith.addf %416, %419 : vector<16x32xf32>
    %421 = vector.extract_strided_slice %415 {offsets = [8, 0], sizes = [8, 32], strides = [1, 1]} : vector<32x32xbf16> to vector<8x32xbf16>
    %422 = arith.truncf %343 : vector<16x8xf32> to vector<16x8xbf16>
    %cst_316 = arith.constant dense<0.000000e+00> : vector<16x32xf32>
    %423 = tpu.matmul %422, %421, %cst_316 {dimension_numbers = #tpu.dot_dimension_numbers<[1], [0], [0], [1], [0, 0, 1, 1], [], []>} : vector<16x8xbf16>, vector<8x32xbf16>, vector<16x32xf32> -> vector<16x32xf32>
    %424 = arith.addf %420, %423 : vector<16x32xf32>
    %425 = vector.extract_strided_slice %415 {offsets = [16, 0], sizes = [8, 32], strides = [1, 1]} : vector<32x32xbf16> to vector<8x32xbf16>
    %426 = arith.truncf %378 : vector<16x8xf32> to vector<16x8xbf16>
    %cst_317 = arith.constant dense<0.000000e+00> : vector<16x32xf32>
    %427 = tpu.matmul %426, %425, %cst_317 {dimension_numbers = #tpu.dot_dimension_numbers<[1], [0], [0], [1], [0, 0, 1, 1], [], []>} : vector<16x8xbf16>, vector<8x32xbf16>, vector<16x32xf32> -> vector<16x32xf32>
    %428 = arith.addf %424, %427 : vector<16x32xf32>
    %429 = vector.extract_strided_slice %415 {offsets = [24, 0], sizes = [8, 32], strides = [1, 1]} : vector<32x32xbf16> to vector<8x32xbf16>
    %430 = arith.truncf %413 : vector<16x8xf32> to vector<16x8xbf16>
    %cst_318 = arith.constant dense<0.000000e+00> : vector<16x32xf32>
    %431 = tpu.matmul %430, %429, %cst_318 {dimension_numbers = #tpu.dot_dimension_numbers<[1], [0], [0], [1], [0, 0, 1, 1], [], []>} : vector<16x8xbf16>, vector<8x32xbf16>, vector<16x32xf32> -> vector<16x32xf32>
    %432 = arith.addf %428, %431 : vector<16x32xf32>
    %c32_319 = arith.constant 32 : index
    %c0_320 = arith.constant 0 : index
    %433 = vector.load %arg4[%c32_319, %c0_320] : memref<64x128xf32, #tpu.memory_space<vmem>>, vector<1x32xf32>
    %434 = vector.broadcast %433 : vector<1x32xf32> to vector<16x32xf32>
    %435 = arith.addf %432, %434 : vector<16x32xf32>
    %cst_321 = arith.constant 0.000000e+00 : f32
    %436 = vector.broadcast %cst_321 : f32 to vector<16x32xf32>
    %437 = arith.maximumf %435, %436 : vector<16x32xf32>
    %c33 = arith.constant 33 : index
    %c0_322 = arith.constant 0 : index
    %438 = vector.load %arg4[%c33, %c0_322] : memref<64x128xf32, #tpu.memory_space<vmem>>, vector<1x32xf32>
    %439 = vector.broadcast %438 : vector<1x32xf32> to vector<16x32xf32>
    %440 = arith.mulf %437, %439 : vector<16x32xf32>
    %c34 = arith.constant 34 : index
    %c0_323 = arith.constant 0 : index
    %441 = vector.load %arg4[%c34, %c0_323] : memref<64x128xf32, #tpu.memory_space<vmem>>, vector<1x32xf32>
    %442 = vector.broadcast %441 : vector<1x32xf32> to vector<16x32xf32>
    %443 = arith.addf %440, %442 : vector<16x32xf32>
    %cst_324 = arith.constant dense<0.000000e+00> : vector<2x32xf32>
    %444 = tpu.matmul %113, %443, %cst_324 {dimension_numbers = #tpu.dot_dimension_numbers<[1], [0], [0], [1], [0, 0, 1, 1], [], []>} : vector<2x16xf32>, vector<16x32xf32>, vector<2x32xf32> -> vector<2x32xf32>
    %c7_325 = arith.constant 7 : index
    %c0_326 = arith.constant 0 : index
    %c0_327 = arith.constant 0 : index
    %445 = vector.load %arg7[%c7_325, %c0_326, %c0_327] : memref<12x32x32xbf16, #tpu.memory_space<vmem>>, vector<1x32x32xbf16>
    %446 = vector.shape_cast %445 : vector<1x32x32xbf16> to vector<32x32xbf16>
    %447 = vector.extract_strided_slice %446 {offsets = [0, 0], sizes = [32, 16], strides = [1, 1]} : vector<32x32xbf16> to vector<32x16xbf16>
    %448 = arith.truncf %444 : vector<2x32xf32> to vector<2x32xbf16>
    %cst_328 = arith.constant dense<0.000000e+00> : vector<2x16xf32>
    %449 = tpu.matmul %448, %447, %cst_328 {dimension_numbers = #tpu.dot_dimension_numbers<[1], [0], [0], [1], [0, 0, 1, 1], [], []>} : vector<2x32xbf16>, vector<32x16xbf16>, vector<2x16xf32> -> vector<2x16xf32>
    %c35 = arith.constant 35 : index
    %c0_329 = arith.constant 0 : index
    %450 = vector.load %arg4[%c35, %c0_329] : memref<64x128xf32, #tpu.memory_space<vmem>>, vector<1x16xf32>
    %451 = vector.broadcast %450 : vector<1x16xf32> to vector<2x16xf32>
    %452 = arith.addf %449, %451 : vector<2x16xf32>
    %cst_330 = arith.constant 0.000000e+00 : f32
    %453 = vector.broadcast %cst_330 : f32 to vector<2x16xf32>
    %454 = arith.maximumf %452, %453 : vector<2x16xf32>
    %c10_331 = arith.constant 10 : index
    %c0_332 = arith.constant 0 : index
    %c0_333 = arith.constant 0 : index
    %455 = vector.load %arg7[%c10_331, %c0_332, %c0_333] : memref<12x32x32xbf16, #tpu.memory_space<vmem>>, vector<1x32x32xbf16>
    %456 = vector.shape_cast %455 : vector<1x32x32xbf16> to vector<32x32xbf16>
    %457 = vector.extract_strided_slice %456 {offsets = [0, 0], sizes = [16, 32], strides = [1, 1]} : vector<32x32xbf16> to vector<16x32xbf16>
    %458 = arith.truncf %454 : vector<2x16xf32> to vector<2x16xbf16>
    %cst_334 = arith.constant dense<0.000000e+00> : vector<2x32xf32>
    %459 = tpu.matmul %458, %457, %cst_334 {dimension_numbers = #tpu.dot_dimension_numbers<[1], [0], [0], [1], [0, 0, 1, 1], [], []>} : vector<2x16xbf16>, vector<16x32xbf16>, vector<2x32xf32> -> vector<2x32xf32>
    %c36 = arith.constant 36 : index
    %c0_335 = arith.constant 0 : index
    %460 = vector.load %arg4[%c36, %c0_335] : memref<64x128xf32, #tpu.memory_space<vmem>>, vector<1x32xf32>
    %461 = vector.broadcast %460 : vector<1x32xf32> to vector<2x32xf32>
    %462 = arith.addf %459, %461 : vector<2x32xf32>
    %463 = arith.negf %462 : vector<2x32xf32>
    %464 = math.exp %463 : vector<2x32xf32>
    %cst_336 = arith.constant 1.000000e+00 : f32
    %465 = vector.broadcast %cst_336 : f32 to vector<2x32xf32>
    %466 = arith.addf %465, %464 : vector<2x32xf32>
    %467 = arith.divf %465, %466 : vector<2x32xf32>
    %cst_337 = arith.constant dense<0.000000e+00> : vector<16x32xf32>
    %468 = tpu.matmul %116, %467, %cst_337 {dimension_numbers = #tpu.dot_dimension_numbers<[1], [0], [0], [1], [0, 0, 1, 1], [], []>} : vector<16x2xf32>, vector<2x32xf32>, vector<16x32xf32> -> vector<16x32xf32>
    %469 = arith.mulf %443, %468 : vector<16x32xf32>
    %470 = arith.addf %469, %293 : vector<16x32xf32>
    %c2_338 = arith.constant 2 : index
    %c0_339 = arith.constant 0 : index
    %c0_340 = arith.constant 0 : index
    %471 = vector.load %arg7[%c2_338, %c0_339, %c0_340] : memref<12x32x32xbf16, #tpu.memory_space<vmem>>, vector<1x32x32xbf16>
    %472 = vector.shape_cast %471 : vector<1x32x32xbf16> to vector<32x32xbf16>
    %473 = arith.truncf %470 : vector<16x32xf32> to vector<16x32xbf16>
    %cst_341 = arith.constant dense<0.000000e+00> : vector<16x32xf32>
    %474 = tpu.matmul %473, %472, %cst_341 {dimension_numbers = #tpu.dot_dimension_numbers<[1], [0], [0], [1], [0, 0, 1, 1], [], []>} : vector<16x32xbf16>, vector<32x32xbf16>, vector<16x32xf32> -> vector<16x32xf32>
    %c37 = arith.constant 37 : index
    %c0_342 = arith.constant 0 : index
    %475 = vector.load %arg4[%c37, %c0_342] : memref<64x128xf32, #tpu.memory_space<vmem>>, vector<1x32xf32>
    %476 = vector.broadcast %475 : vector<1x32xf32> to vector<16x32xf32>
    %477 = arith.addf %474, %476 : vector<16x32xf32>
    %cst_343 = arith.constant 0.000000e+00 : f32
    %478 = vector.broadcast %cst_343 : f32 to vector<16x32xf32>
    %479 = arith.maximumf %477, %478 : vector<16x32xf32>
    %c38 = arith.constant 38 : index
    %c0_344 = arith.constant 0 : index
    %480 = vector.load %arg4[%c38, %c0_344] : memref<64x128xf32, #tpu.memory_space<vmem>>, vector<1x32xf32>
    %481 = vector.broadcast %480 : vector<1x32xf32> to vector<16x32xf32>
    %482 = arith.mulf %479, %481 : vector<16x32xf32>
    %c39 = arith.constant 39 : index
    %c0_345 = arith.constant 0 : index
    %483 = vector.load %arg4[%c39, %c0_345] : memref<64x128xf32, #tpu.memory_space<vmem>>, vector<1x32xf32>
    %484 = vector.broadcast %483 : vector<1x32xf32> to vector<16x32xf32>
    %485 = arith.addf %482, %484 : vector<16x32xf32>
    %486 = vector.extract_strided_slice %485 {offsets = [0, 0], sizes = [16, 8], strides = [1, 1]} : vector<16x32xf32> to vector<16x8xf32>
    %487 = vector.extract_strided_slice %485 {offsets = [0, 8], sizes = [16, 8], strides = [1, 1]} : vector<16x32xf32> to vector<16x8xf32>
    %c18_346 = arith.constant 18 : index
    %c0_347 = arith.constant 0 : index
    %c0_348 = arith.constant 0 : index
    %488 = vector.load %arg6[%c18_346, %c0_347, %c0_348] : memref<27x8x8xbf16, #tpu.memory_space<vmem>>, vector<1x8x8xbf16>
    %489 = vector.shape_cast %488 : vector<1x8x8xbf16> to vector<8x8xbf16>
    %c19_349 = arith.constant 19 : index
    %c0_350 = arith.constant 0 : index
    %c0_351 = arith.constant 0 : index
    %490 = vector.load %arg6[%c19_349, %c0_350, %c0_351] : memref<27x8x8xbf16, #tpu.memory_space<vmem>>, vector<1x8x8xbf16>
    %491 = vector.shape_cast %490 : vector<1x8x8xbf16> to vector<8x8xbf16>
    %c20_352 = arith.constant 20 : index
    %c0_353 = arith.constant 0 : index
    %c0_354 = arith.constant 0 : index
    %492 = vector.load %arg6[%c20_352, %c0_353, %c0_354] : memref<27x8x8xbf16, #tpu.memory_space<vmem>>, vector<1x8x8xbf16>
    %493 = vector.shape_cast %492 : vector<1x8x8xbf16> to vector<8x8xbf16>
    %cst_355 = arith.constant 0.000000e+00 : f32
    %494 = vector.broadcast %cst_355 : f32 to vector<16x8xf32>
    %c11_356 = arith.constant 11 : index
    %c0_357 = arith.constant 0 : index
    %c0_358 = arith.constant 0 : index
    %495 = vector.load %arg3[%c11_356, %c0_357, %c0_358] : memref<16x16x16xf32, #tpu.memory_space<vmem>>, vector<1x16x16xf32>
    %496 = vector.shape_cast %495 : vector<1x16x16xf32> to vector<16x16xf32>
    %cst_359 = arith.constant dense<0.000000e+00> : vector<16x8xf32>
    %497 = tpu.matmul %496, %487, %cst_359 {dimension_numbers = #tpu.dot_dimension_numbers<[1], [0], [0], [1], [0, 0, 1, 1], [], []>} : vector<16x16xf32>, vector<16x8xf32>, vector<16x8xf32> -> vector<16x8xf32>
    %498 = arith.truncf %497 : vector<16x8xf32> to vector<16x8xbf16>
    %cst_360 = arith.constant dense<0.000000e+00> : vector<16x8xf32>
    %499 = tpu.matmul %498, %489, %cst_360 {dimension_numbers = #tpu.dot_dimension_numbers<[1], [0], [0], [1], [0, 0, 1, 1], [], []>} : vector<16x8xbf16>, vector<8x8xbf16>, vector<16x8xf32> -> vector<16x8xf32>
    %500 = arith.addf %494, %499 : vector<16x8xf32>
    %501 = arith.truncf %487 : vector<16x8xf32> to vector<16x8xbf16>
    %cst_361 = arith.constant dense<0.000000e+00> : vector<16x8xf32>
    %502 = tpu.matmul %501, %491, %cst_361 {dimension_numbers = #tpu.dot_dimension_numbers<[1], [0], [0], [1], [0, 0, 1, 1], [], []>} : vector<16x8xbf16>, vector<8x8xbf16>, vector<16x8xf32> -> vector<16x8xf32>
    %503 = arith.addf %500, %502 : vector<16x8xf32>
    %c13_362 = arith.constant 13 : index
    %c0_363 = arith.constant 0 : index
    %c0_364 = arith.constant 0 : index
    %504 = vector.load %arg3[%c13_362, %c0_363, %c0_364] : memref<16x16x16xf32, #tpu.memory_space<vmem>>, vector<1x16x16xf32>
    %505 = vector.shape_cast %504 : vector<1x16x16xf32> to vector<16x16xf32>
    %cst_365 = arith.constant dense<0.000000e+00> : vector<16x8xf32>
    %506 = tpu.matmul %505, %487, %cst_365 {dimension_numbers = #tpu.dot_dimension_numbers<[1], [0], [0], [1], [0, 0, 1, 1], [], []>} : vector<16x16xf32>, vector<16x8xf32>, vector<16x8xf32> -> vector<16x8xf32>
    %507 = arith.truncf %506 : vector<16x8xf32> to vector<16x8xbf16>
    %cst_366 = arith.constant dense<0.000000e+00> : vector<16x8xf32>
    %508 = tpu.matmul %507, %493, %cst_366 {dimension_numbers = #tpu.dot_dimension_numbers<[1], [0], [0], [1], [0, 0, 1, 1], [], []>} : vector<16x8xbf16>, vector<8x8xbf16>, vector<16x8xf32> -> vector<16x8xf32>
    %509 = arith.addf %503, %508 : vector<16x8xf32>
    %c40 = arith.constant 40 : index
    %c0_367 = arith.constant 0 : index
    %510 = vector.load %arg4[%c40, %c0_367] : memref<64x128xf32, #tpu.memory_space<vmem>>, vector<1x8xf32>
    %511 = vector.broadcast %510 : vector<1x8xf32> to vector<16x8xf32>
    %512 = arith.addf %509, %511 : vector<16x8xf32>
    %cst_368 = arith.constant 0.000000e+00 : f32
    %513 = vector.broadcast %cst_368 : f32 to vector<16x8xf32>
    %514 = arith.maximumf %512, %513 : vector<16x8xf32>
    %c41 = arith.constant 41 : index
    %c0_369 = arith.constant 0 : index
    %515 = vector.load %arg4[%c41, %c0_369] : memref<64x128xf32, #tpu.memory_space<vmem>>, vector<1x8xf32>
    %516 = vector.broadcast %515 : vector<1x8xf32> to vector<16x8xf32>
    %517 = arith.mulf %514, %516 : vector<16x8xf32>
    %c42 = arith.constant 42 : index
    %c0_370 = arith.constant 0 : index
    %518 = vector.load %arg4[%c42, %c0_370] : memref<64x128xf32, #tpu.memory_space<vmem>>, vector<1x8xf32>
    %519 = vector.broadcast %518 : vector<1x8xf32> to vector<16x8xf32>
    %520 = arith.addf %517, %519 : vector<16x8xf32>
    %521 = vector.extract_strided_slice %485 {offsets = [0, 16], sizes = [16, 8], strides = [1, 1]} : vector<16x32xf32> to vector<16x8xf32>
    %522 = arith.addf %521, %520 : vector<16x8xf32>
    %c21_371 = arith.constant 21 : index
    %c0_372 = arith.constant 0 : index
    %c0_373 = arith.constant 0 : index
    %523 = vector.load %arg6[%c21_371, %c0_372, %c0_373] : memref<27x8x8xbf16, #tpu.memory_space<vmem>>, vector<1x8x8xbf16>
    %524 = vector.shape_cast %523 : vector<1x8x8xbf16> to vector<8x8xbf16>
    %c22_374 = arith.constant 22 : index
    %c0_375 = arith.constant 0 : index
    %c0_376 = arith.constant 0 : index
    %525 = vector.load %arg6[%c22_374, %c0_375, %c0_376] : memref<27x8x8xbf16, #tpu.memory_space<vmem>>, vector<1x8x8xbf16>
    %526 = vector.shape_cast %525 : vector<1x8x8xbf16> to vector<8x8xbf16>
    %c23_377 = arith.constant 23 : index
    %c0_378 = arith.constant 0 : index
    %c0_379 = arith.constant 0 : index
    %527 = vector.load %arg6[%c23_377, %c0_378, %c0_379] : memref<27x8x8xbf16, #tpu.memory_space<vmem>>, vector<1x8x8xbf16>
    %528 = vector.shape_cast %527 : vector<1x8x8xbf16> to vector<8x8xbf16>
    %cst_380 = arith.constant 0.000000e+00 : f32
    %529 = vector.broadcast %cst_380 : f32 to vector<16x8xf32>
    %c11_381 = arith.constant 11 : index
    %c0_382 = arith.constant 0 : index
    %c0_383 = arith.constant 0 : index
    %530 = vector.load %arg3[%c11_381, %c0_382, %c0_383] : memref<16x16x16xf32, #tpu.memory_space<vmem>>, vector<1x16x16xf32>
    %531 = vector.shape_cast %530 : vector<1x16x16xf32> to vector<16x16xf32>
    %cst_384 = arith.constant dense<0.000000e+00> : vector<16x8xf32>
    %532 = tpu.matmul %531, %522, %cst_384 {dimension_numbers = #tpu.dot_dimension_numbers<[1], [0], [0], [1], [0, 0, 1, 1], [], []>} : vector<16x16xf32>, vector<16x8xf32>, vector<16x8xf32> -> vector<16x8xf32>
    %533 = arith.truncf %532 : vector<16x8xf32> to vector<16x8xbf16>
    %cst_385 = arith.constant dense<0.000000e+00> : vector<16x8xf32>
    %534 = tpu.matmul %533, %524, %cst_385 {dimension_numbers = #tpu.dot_dimension_numbers<[1], [0], [0], [1], [0, 0, 1, 1], [], []>} : vector<16x8xbf16>, vector<8x8xbf16>, vector<16x8xf32> -> vector<16x8xf32>
    %535 = arith.addf %529, %534 : vector<16x8xf32>
    %536 = arith.truncf %522 : vector<16x8xf32> to vector<16x8xbf16>
    %cst_386 = arith.constant dense<0.000000e+00> : vector<16x8xf32>
    %537 = tpu.matmul %536, %526, %cst_386 {dimension_numbers = #tpu.dot_dimension_numbers<[1], [0], [0], [1], [0, 0, 1, 1], [], []>} : vector<16x8xbf16>, vector<8x8xbf16>, vector<16x8xf32> -> vector<16x8xf32>
    %538 = arith.addf %535, %537 : vector<16x8xf32>
    %c13_387 = arith.constant 13 : index
    %c0_388 = arith.constant 0 : index
    %c0_389 = arith.constant 0 : index
    %539 = vector.load %arg3[%c13_387, %c0_388, %c0_389] : memref<16x16x16xf32, #tpu.memory_space<vmem>>, vector<1x16x16xf32>
    %540 = vector.shape_cast %539 : vector<1x16x16xf32> to vector<16x16xf32>
    %cst_390 = arith.constant dense<0.000000e+00> : vector<16x8xf32>
    %541 = tpu.matmul %540, %522, %cst_390 {dimension_numbers = #tpu.dot_dimension_numbers<[1], [0], [0], [1], [0, 0, 1, 1], [], []>} : vector<16x16xf32>, vector<16x8xf32>, vector<16x8xf32> -> vector<16x8xf32>
    %542 = arith.truncf %541 : vector<16x8xf32> to vector<16x8xbf16>
    %cst_391 = arith.constant dense<0.000000e+00> : vector<16x8xf32>
    %543 = tpu.matmul %542, %528, %cst_391 {dimension_numbers = #tpu.dot_dimension_numbers<[1], [0], [0], [1], [0, 0, 1, 1], [], []>} : vector<16x8xbf16>, vector<8x8xbf16>, vector<16x8xf32> -> vector<16x8xf32>
    %544 = arith.addf %538, %543 : vector<16x8xf32>
    %c43 = arith.constant 43 : index
    %c0_392 = arith.constant 0 : index
    %545 = vector.load %arg4[%c43, %c0_392] : memref<64x128xf32, #tpu.memory_space<vmem>>, vector<1x8xf32>
    %546 = vector.broadcast %545 : vector<1x8xf32> to vector<16x8xf32>
    %547 = arith.addf %544, %546 : vector<16x8xf32>
    %cst_393 = arith.constant 0.000000e+00 : f32
    %548 = vector.broadcast %cst_393 : f32 to vector<16x8xf32>
    %549 = arith.maximumf %547, %548 : vector<16x8xf32>
    %c44 = arith.constant 44 : index
    %c0_394 = arith.constant 0 : index
    %550 = vector.load %arg4[%c44, %c0_394] : memref<64x128xf32, #tpu.memory_space<vmem>>, vector<1x8xf32>
    %551 = vector.broadcast %550 : vector<1x8xf32> to vector<16x8xf32>
    %552 = arith.mulf %549, %551 : vector<16x8xf32>
    %c45 = arith.constant 45 : index
    %c0_395 = arith.constant 0 : index
    %553 = vector.load %arg4[%c45, %c0_395] : memref<64x128xf32, #tpu.memory_space<vmem>>, vector<1x8xf32>
    %554 = vector.broadcast %553 : vector<1x8xf32> to vector<16x8xf32>
    %555 = arith.addf %552, %554 : vector<16x8xf32>
    %556 = vector.extract_strided_slice %485 {offsets = [0, 24], sizes = [16, 8], strides = [1, 1]} : vector<16x32xf32> to vector<16x8xf32>
    %557 = arith.addf %556, %555 : vector<16x8xf32>
    %c24_396 = arith.constant 24 : index
    %c0_397 = arith.constant 0 : index
    %c0_398 = arith.constant 0 : index
    %558 = vector.load %arg6[%c24_396, %c0_397, %c0_398] : memref<27x8x8xbf16, #tpu.memory_space<vmem>>, vector<1x8x8xbf16>
    %559 = vector.shape_cast %558 : vector<1x8x8xbf16> to vector<8x8xbf16>
    %c25_399 = arith.constant 25 : index
    %c0_400 = arith.constant 0 : index
    %c0_401 = arith.constant 0 : index
    %560 = vector.load %arg6[%c25_399, %c0_400, %c0_401] : memref<27x8x8xbf16, #tpu.memory_space<vmem>>, vector<1x8x8xbf16>
    %561 = vector.shape_cast %560 : vector<1x8x8xbf16> to vector<8x8xbf16>
    %c26_402 = arith.constant 26 : index
    %c0_403 = arith.constant 0 : index
    %c0_404 = arith.constant 0 : index
    %562 = vector.load %arg6[%c26_402, %c0_403, %c0_404] : memref<27x8x8xbf16, #tpu.memory_space<vmem>>, vector<1x8x8xbf16>
    %563 = vector.shape_cast %562 : vector<1x8x8xbf16> to vector<8x8xbf16>
    %cst_405 = arith.constant 0.000000e+00 : f32
    %564 = vector.broadcast %cst_405 : f32 to vector<16x8xf32>
    %c11_406 = arith.constant 11 : index
    %c0_407 = arith.constant 0 : index
    %c0_408 = arith.constant 0 : index
    %565 = vector.load %arg3[%c11_406, %c0_407, %c0_408] : memref<16x16x16xf32, #tpu.memory_space<vmem>>, vector<1x16x16xf32>
    %566 = vector.shape_cast %565 : vector<1x16x16xf32> to vector<16x16xf32>
    %cst_409 = arith.constant dense<0.000000e+00> : vector<16x8xf32>
    %567 = tpu.matmul %566, %557, %cst_409 {dimension_numbers = #tpu.dot_dimension_numbers<[1], [0], [0], [1], [0, 0, 1, 1], [], []>} : vector<16x16xf32>, vector<16x8xf32>, vector<16x8xf32> -> vector<16x8xf32>
    %568 = arith.truncf %567 : vector<16x8xf32> to vector<16x8xbf16>
    %cst_410 = arith.constant dense<0.000000e+00> : vector<16x8xf32>
    %569 = tpu.matmul %568, %559, %cst_410 {dimension_numbers = #tpu.dot_dimension_numbers<[1], [0], [0], [1], [0, 0, 1, 1], [], []>} : vector<16x8xbf16>, vector<8x8xbf16>, vector<16x8xf32> -> vector<16x8xf32>
    %570 = arith.addf %564, %569 : vector<16x8xf32>
    %571 = arith.truncf %557 : vector<16x8xf32> to vector<16x8xbf16>
    %cst_411 = arith.constant dense<0.000000e+00> : vector<16x8xf32>
    %572 = tpu.matmul %571, %561, %cst_411 {dimension_numbers = #tpu.dot_dimension_numbers<[1], [0], [0], [1], [0, 0, 1, 1], [], []>} : vector<16x8xbf16>, vector<8x8xbf16>, vector<16x8xf32> -> vector<16x8xf32>
    %573 = arith.addf %570, %572 : vector<16x8xf32>
    %c13_412 = arith.constant 13 : index
    %c0_413 = arith.constant 0 : index
    %c0_414 = arith.constant 0 : index
    %574 = vector.load %arg3[%c13_412, %c0_413, %c0_414] : memref<16x16x16xf32, #tpu.memory_space<vmem>>, vector<1x16x16xf32>
    %575 = vector.shape_cast %574 : vector<1x16x16xf32> to vector<16x16xf32>
    %cst_415 = arith.constant dense<0.000000e+00> : vector<16x8xf32>
    %576 = tpu.matmul %575, %557, %cst_415 {dimension_numbers = #tpu.dot_dimension_numbers<[1], [0], [0], [1], [0, 0, 1, 1], [], []>} : vector<16x16xf32>, vector<16x8xf32>, vector<16x8xf32> -> vector<16x8xf32>
    %577 = arith.truncf %576 : vector<16x8xf32> to vector<16x8xbf16>
    %cst_416 = arith.constant dense<0.000000e+00> : vector<16x8xf32>
    %578 = tpu.matmul %577, %563, %cst_416 {dimension_numbers = #tpu.dot_dimension_numbers<[1], [0], [0], [1], [0, 0, 1, 1], [], []>} : vector<16x8xbf16>, vector<8x8xbf16>, vector<16x8xf32> -> vector<16x8xf32>
    %579 = arith.addf %573, %578 : vector<16x8xf32>
    %c46 = arith.constant 46 : index
    %c0_417 = arith.constant 0 : index
    %580 = vector.load %arg4[%c46, %c0_417] : memref<64x128xf32, #tpu.memory_space<vmem>>, vector<1x8xf32>
    %581 = vector.broadcast %580 : vector<1x8xf32> to vector<16x8xf32>
    %582 = arith.addf %579, %581 : vector<16x8xf32>
    %cst_418 = arith.constant 0.000000e+00 : f32
    %583 = vector.broadcast %cst_418 : f32 to vector<16x8xf32>
    %584 = arith.maximumf %582, %583 : vector<16x8xf32>
    %c47 = arith.constant 47 : index
    %c0_419 = arith.constant 0 : index
    %585 = vector.load %arg4[%c47, %c0_419] : memref<64x128xf32, #tpu.memory_space<vmem>>, vector<1x8xf32>
    %586 = vector.broadcast %585 : vector<1x8xf32> to vector<16x8xf32>
    %587 = arith.mulf %584, %586 : vector<16x8xf32>
    %c48 = arith.constant 48 : index
    %c0_420 = arith.constant 0 : index
    %588 = vector.load %arg4[%c48, %c0_420] : memref<64x128xf32, #tpu.memory_space<vmem>>, vector<1x8xf32>
    %589 = vector.broadcast %588 : vector<1x8xf32> to vector<16x8xf32>
    %590 = arith.addf %587, %589 : vector<16x8xf32>
    %c5_421 = arith.constant 5 : index
    %c0_422 = arith.constant 0 : index
    %c0_423 = arith.constant 0 : index
    %591 = vector.load %arg7[%c5_421, %c0_422, %c0_423] : memref<12x32x32xbf16, #tpu.memory_space<vmem>>, vector<1x32x32xbf16>
    %592 = vector.shape_cast %591 : vector<1x32x32xbf16> to vector<32x32xbf16>
    %cst_424 = arith.constant 0.000000e+00 : f32
    %593 = vector.broadcast %cst_424 : f32 to vector<16x32xf32>
    %594 = vector.extract_strided_slice %592 {offsets = [0, 0], sizes = [8, 32], strides = [1, 1]} : vector<32x32xbf16> to vector<8x32xbf16>
    %595 = arith.truncf %486 : vector<16x8xf32> to vector<16x8xbf16>
    %cst_425 = arith.constant dense<0.000000e+00> : vector<16x32xf32>
    %596 = tpu.matmul %595, %594, %cst_425 {dimension_numbers = #tpu.dot_dimension_numbers<[1], [0], [0], [1], [0, 0, 1, 1], [], []>} : vector<16x8xbf16>, vector<8x32xbf16>, vector<16x32xf32> -> vector<16x32xf32>
    %597 = arith.addf %593, %596 : vector<16x32xf32>
    %598 = vector.extract_strided_slice %592 {offsets = [8, 0], sizes = [8, 32], strides = [1, 1]} : vector<32x32xbf16> to vector<8x32xbf16>
    %599 = arith.truncf %520 : vector<16x8xf32> to vector<16x8xbf16>
    %cst_426 = arith.constant dense<0.000000e+00> : vector<16x32xf32>
    %600 = tpu.matmul %599, %598, %cst_426 {dimension_numbers = #tpu.dot_dimension_numbers<[1], [0], [0], [1], [0, 0, 1, 1], [], []>} : vector<16x8xbf16>, vector<8x32xbf16>, vector<16x32xf32> -> vector<16x32xf32>
    %601 = arith.addf %597, %600 : vector<16x32xf32>
    %602 = vector.extract_strided_slice %592 {offsets = [16, 0], sizes = [8, 32], strides = [1, 1]} : vector<32x32xbf16> to vector<8x32xbf16>
    %603 = arith.truncf %555 : vector<16x8xf32> to vector<16x8xbf16>
    %cst_427 = arith.constant dense<0.000000e+00> : vector<16x32xf32>
    %604 = tpu.matmul %603, %602, %cst_427 {dimension_numbers = #tpu.dot_dimension_numbers<[1], [0], [0], [1], [0, 0, 1, 1], [], []>} : vector<16x8xbf16>, vector<8x32xbf16>, vector<16x32xf32> -> vector<16x32xf32>
    %605 = arith.addf %601, %604 : vector<16x32xf32>
    %606 = vector.extract_strided_slice %592 {offsets = [24, 0], sizes = [8, 32], strides = [1, 1]} : vector<32x32xbf16> to vector<8x32xbf16>
    %607 = arith.truncf %590 : vector<16x8xf32> to vector<16x8xbf16>
    %cst_428 = arith.constant dense<0.000000e+00> : vector<16x32xf32>
    %608 = tpu.matmul %607, %606, %cst_428 {dimension_numbers = #tpu.dot_dimension_numbers<[1], [0], [0], [1], [0, 0, 1, 1], [], []>} : vector<16x8xbf16>, vector<8x32xbf16>, vector<16x32xf32> -> vector<16x32xf32>
    %609 = arith.addf %605, %608 : vector<16x32xf32>
    %c49 = arith.constant 49 : index
    %c0_429 = arith.constant 0 : index
    %610 = vector.load %arg4[%c49, %c0_429] : memref<64x128xf32, #tpu.memory_space<vmem>>, vector<1x32xf32>
    %611 = vector.broadcast %610 : vector<1x32xf32> to vector<16x32xf32>
    %612 = arith.addf %609, %611 : vector<16x32xf32>
    %cst_430 = arith.constant 0.000000e+00 : f32
    %613 = vector.broadcast %cst_430 : f32 to vector<16x32xf32>
    %614 = arith.maximumf %612, %613 : vector<16x32xf32>
    %c50 = arith.constant 50 : index
    %c0_431 = arith.constant 0 : index
    %615 = vector.load %arg4[%c50, %c0_431] : memref<64x128xf32, #tpu.memory_space<vmem>>, vector<1x32xf32>
    %616 = vector.broadcast %615 : vector<1x32xf32> to vector<16x32xf32>
    %617 = arith.mulf %614, %616 : vector<16x32xf32>
    %c51 = arith.constant 51 : index
    %c0_432 = arith.constant 0 : index
    %618 = vector.load %arg4[%c51, %c0_432] : memref<64x128xf32, #tpu.memory_space<vmem>>, vector<1x32xf32>
    %619 = vector.broadcast %618 : vector<1x32xf32> to vector<16x32xf32>
    %620 = arith.addf %617, %619 : vector<16x32xf32>
    %cst_433 = arith.constant dense<0.000000e+00> : vector<2x32xf32>
    %621 = tpu.matmul %113, %620, %cst_433 {dimension_numbers = #tpu.dot_dimension_numbers<[1], [0], [0], [1], [0, 0, 1, 1], [], []>} : vector<2x16xf32>, vector<16x32xf32>, vector<2x32xf32> -> vector<2x32xf32>
    %c8_434 = arith.constant 8 : index
    %c0_435 = arith.constant 0 : index
    %c0_436 = arith.constant 0 : index
    %622 = vector.load %arg7[%c8_434, %c0_435, %c0_436] : memref<12x32x32xbf16, #tpu.memory_space<vmem>>, vector<1x32x32xbf16>
    %623 = vector.shape_cast %622 : vector<1x32x32xbf16> to vector<32x32xbf16>
    %624 = vector.extract_strided_slice %623 {offsets = [0, 0], sizes = [32, 16], strides = [1, 1]} : vector<32x32xbf16> to vector<32x16xbf16>
    %625 = arith.truncf %621 : vector<2x32xf32> to vector<2x32xbf16>
    %cst_437 = arith.constant dense<0.000000e+00> : vector<2x16xf32>
    %626 = tpu.matmul %625, %624, %cst_437 {dimension_numbers = #tpu.dot_dimension_numbers<[1], [0], [0], [1], [0, 0, 1, 1], [], []>} : vector<2x32xbf16>, vector<32x16xbf16>, vector<2x16xf32> -> vector<2x16xf32>
    %c52 = arith.constant 52 : index
    %c0_438 = arith.constant 0 : index
    %627 = vector.load %arg4[%c52, %c0_438] : memref<64x128xf32, #tpu.memory_space<vmem>>, vector<1x16xf32>
    %628 = vector.broadcast %627 : vector<1x16xf32> to vector<2x16xf32>
    %629 = arith.addf %626, %628 : vector<2x16xf32>
    %cst_439 = arith.constant 0.000000e+00 : f32
    %630 = vector.broadcast %cst_439 : f32 to vector<2x16xf32>
    %631 = arith.maximumf %629, %630 : vector<2x16xf32>
    %c11_440 = arith.constant 11 : index
    %c0_441 = arith.constant 0 : index
    %c0_442 = arith.constant 0 : index
    %632 = vector.load %arg7[%c11_440, %c0_441, %c0_442] : memref<12x32x32xbf16, #tpu.memory_space<vmem>>, vector<1x32x32xbf16>
    %633 = vector.shape_cast %632 : vector<1x32x32xbf16> to vector<32x32xbf16>
    %634 = vector.extract_strided_slice %633 {offsets = [0, 0], sizes = [16, 32], strides = [1, 1]} : vector<32x32xbf16> to vector<16x32xbf16>
    %635 = arith.truncf %631 : vector<2x16xf32> to vector<2x16xbf16>
    %cst_443 = arith.constant dense<0.000000e+00> : vector<2x32xf32>
    %636 = tpu.matmul %635, %634, %cst_443 {dimension_numbers = #tpu.dot_dimension_numbers<[1], [0], [0], [1], [0, 0, 1, 1], [], []>} : vector<2x16xbf16>, vector<16x32xbf16>, vector<2x32xf32> -> vector<2x32xf32>
    %c53 = arith.constant 53 : index
    %c0_444 = arith.constant 0 : index
    %637 = vector.load %arg4[%c53, %c0_444] : memref<64x128xf32, #tpu.memory_space<vmem>>, vector<1x32xf32>
    %638 = vector.broadcast %637 : vector<1x32xf32> to vector<2x32xf32>
    %639 = arith.addf %636, %638 : vector<2x32xf32>
    %640 = arith.negf %639 : vector<2x32xf32>
    %641 = math.exp %640 : vector<2x32xf32>
    %cst_445 = arith.constant 1.000000e+00 : f32
    %642 = vector.broadcast %cst_445 : f32 to vector<2x32xf32>
    %643 = arith.addf %642, %641 : vector<2x32xf32>
    %644 = arith.divf %642, %643 : vector<2x32xf32>
    %cst_446 = arith.constant dense<0.000000e+00> : vector<16x32xf32>
    %645 = tpu.matmul %116, %644, %cst_446 {dimension_numbers = #tpu.dot_dimension_numbers<[1], [0], [0], [1], [0, 0, 1, 1], [], []>} : vector<16x2xf32>, vector<2x32xf32>, vector<16x32xf32> -> vector<16x32xf32>
    %646 = arith.mulf %620, %645 : vector<16x32xf32>
    %647 = arith.addf %646, %470 : vector<16x32xf32>
    %cst_447 = arith.constant 0.000000e+00 : f32
    %648 = vector.broadcast %cst_447 : f32 to vector<16x96xf32>
    %c0_448 = arith.constant 0 : index
    %c0_449 = arith.constant 0 : index
    %649 = vector.load %arg8[%c0_448, %c0_449] : memref<592x96xbf16, #tpu.memory_space<vmem>>, vector<32x96xbf16>
    %650 = arith.truncf %293 : vector<16x32xf32> to vector<16x32xbf16>
    %cst_450 = arith.constant dense<0.000000e+00> : vector<16x96xf32>
    %651 = tpu.matmul %650, %649, %cst_450 {dimension_numbers = #tpu.dot_dimension_numbers<[1], [0], [0], [1], [0, 0, 1, 1], [], []>} : vector<16x32xbf16>, vector<32x96xbf16>, vector<16x96xf32> -> vector<16x96xf32>
    %652 = arith.addf %648, %651 : vector<16x96xf32>
    %c32_451 = arith.constant 32 : index
    %c0_452 = arith.constant 0 : index
    %653 = vector.load %arg8[%c32_451, %c0_452] : memref<592x96xbf16, #tpu.memory_space<vmem>>, vector<32x96xbf16>
    %654 = arith.truncf %470 : vector<16x32xf32> to vector<16x32xbf16>
    %cst_453 = arith.constant dense<0.000000e+00> : vector<16x96xf32>
    %655 = tpu.matmul %654, %653, %cst_453 {dimension_numbers = #tpu.dot_dimension_numbers<[1], [0], [0], [1], [0, 0, 1, 1], [], []>} : vector<16x32xbf16>, vector<32x96xbf16>, vector<16x96xf32> -> vector<16x96xf32>
    %656 = arith.addf %652, %655 : vector<16x96xf32>
    %c64_454 = arith.constant 64 : index
    %c0_455 = arith.constant 0 : index
    %657 = vector.load %arg8[%c64_454, %c0_455] : memref<592x96xbf16, #tpu.memory_space<vmem>>, vector<32x96xbf16>
    %658 = arith.truncf %647 : vector<16x32xf32> to vector<16x32xbf16>
    %cst_456 = arith.constant dense<0.000000e+00> : vector<16x96xf32>
    %659 = tpu.matmul %658, %657, %cst_456 {dimension_numbers = #tpu.dot_dimension_numbers<[1], [0], [0], [1], [0, 0, 1, 1], [], []>} : vector<16x32xbf16>, vector<32x96xbf16>, vector<16x96xf32> -> vector<16x96xf32>
    %660 = arith.addf %656, %659 : vector<16x96xf32>
    %c54 = arith.constant 54 : index
    %c0_457 = arith.constant 0 : index
    %661 = vector.load %arg4[%c54, %c0_457] : memref<64x128xf32, #tpu.memory_space<vmem>>, vector<1x96xf32>
    %662 = vector.broadcast %661 : vector<1x96xf32> to vector<16x96xf32>
    %663 = arith.addf %660, %662 : vector<16x96xf32>
    %cst_458 = arith.constant 0.000000e+00 : f32
    %664 = vector.broadcast %cst_458 : f32 to vector<16x96xf32>
    %665 = arith.maximumf %663, %664 : vector<16x96xf32>
    %c55 = arith.constant 55 : index
    %c0_459 = arith.constant 0 : index
    %666 = vector.load %arg4[%c55, %c0_459] : memref<64x128xf32, #tpu.memory_space<vmem>>, vector<1x96xf32>
    %667 = vector.broadcast %666 : vector<1x96xf32> to vector<16x96xf32>
    %668 = arith.mulf %665, %667 : vector<16x96xf32>
    %c56 = arith.constant 56 : index
    %c0_460 = arith.constant 0 : index
    %669 = vector.load %arg4[%c56, %c0_460] : memref<64x128xf32, #tpu.memory_space<vmem>>, vector<1x96xf32>
    %670 = vector.broadcast %669 : vector<1x96xf32> to vector<16x96xf32>
    %671 = arith.addf %668, %670 : vector<16x96xf32>
    %c96_461 = arith.constant 96 : index
    %c0_462 = arith.constant 0 : index
    %672 = vector.load %arg8[%c96_461, %c0_462] : memref<592x96xbf16, #tpu.memory_space<vmem>>, vector<96x16xbf16>
    %c192_463 = arith.constant 192 : index
    %c0_464 = arith.constant 0 : index
    %673 = vector.load %arg8[%c192_463, %c0_464] : memref<592x96xbf16, #tpu.memory_space<vmem>>, vector<96x16xbf16>
    %c288 = arith.constant 288 : index
    %c0_465 = arith.constant 0 : index
    %674 = vector.load %arg8[%c288, %c0_465] : memref<592x96xbf16, #tpu.memory_space<vmem>>, vector<96x16xbf16>
    %c384 = arith.constant 384 : index
    %c0_466 = arith.constant 0 : index
    %675 = vector.load %arg8[%c384, %c0_466] : memref<592x96xbf16, #tpu.memory_space<vmem>>, vector<16x96xbf16>
    %c400 = arith.constant 400 : index
    %c0_467 = arith.constant 0 : index
    %676 = vector.load %arg8[%c400, %c0_467] : memref<592x96xbf16, #tpu.memory_space<vmem>>, vector<96x32xbf16>
    %c496 = arith.constant 496 : index
    %c0_468 = arith.constant 0 : index
    %677 = vector.load %arg8[%c496, %c0_468] : memref<592x96xbf16, #tpu.memory_space<vmem>>, vector<96x32xbf16>
    %c57 = arith.constant 57 : index
    %c0_469 = arith.constant 0 : index
    %678 = vector.load %arg4[%c57, %c0_469] : memref<64x128xf32, #tpu.memory_space<vmem>>, vector<1x16xf32>
    %c58 = arith.constant 58 : index
    %c0_470 = arith.constant 0 : index
    %679 = vector.load %arg4[%c58, %c0_470] : memref<64x128xf32, #tpu.memory_space<vmem>>, vector<1x16xf32>
    %c59 = arith.constant 59 : index
    %c0_471 = arith.constant 0 : index
    %680 = vector.load %arg4[%c59, %c0_471] : memref<64x128xf32, #tpu.memory_space<vmem>>, vector<1x16xf32>
    %c60 = arith.constant 60 : index
    %c0_472 = arith.constant 0 : index
    %681 = vector.load %arg4[%c60, %c0_472] : memref<64x128xf32, #tpu.memory_space<vmem>>, vector<1x96xf32>
    %c61 = arith.constant 61 : index
    %c0_473 = arith.constant 0 : index
    %682 = vector.load %arg4[%c61, %c0_473] : memref<64x128xf32, #tpu.memory_space<vmem>>, vector<1x32xf32>
    %683 = vector.extract_strided_slice %671 {offsets = [0, 0], sizes = [8, 96], strides = [1, 1]} : vector<16x96xf32> to vector<8x96xf32>
    %cst_474 = arith.constant dense<0.000000e+00> : vector<96xf32>
    %684 = vector.multi_reduction <add>, %683, %cst_474 [0] : vector<8x96xf32> to vector<96xf32>
    %685 = vector.shape_cast %684 : vector<96xf32> to vector<1x96xf32>
    %cst_475 = arith.constant 8.000000e+00 : f32
    %686 = vector.broadcast %cst_475 : f32 to vector<1x96xf32>
    %687 = arith.divf %685, %686 : vector<1x96xf32>
    %688 = vector.broadcast %687 : vector<1x96xf32> to vector<8x96xf32>
    %689 = arith.subf %683, %688 : vector<8x96xf32>
    %690 = arith.mulf %689, %689 : vector<8x96xf32>
    %cst_476 = arith.constant dense<0.000000e+00> : vector<96xf32>
    %691 = vector.multi_reduction <add>, %690, %cst_476 [0] : vector<8x96xf32> to vector<96xf32>
    %692 = vector.shape_cast %691 : vector<96xf32> to vector<1x96xf32>
    %cst_477 = arith.constant 8.000000e+00 : f32
    %693 = vector.broadcast %cst_477 : f32 to vector<1x96xf32>
    %694 = arith.divf %692, %693 : vector<1x96xf32>
    %cst_478 = arith.constant 9.99999996E-13 : f32
    %695 = vector.broadcast %cst_478 : f32 to vector<1x96xf32>
    %696 = arith.maximumf %694, %695 : vector<1x96xf32>
    %697 = math.sqrt %696 : vector<1x96xf32>
    %698 = arith.truncf %683 : vector<8x96xf32> to vector<8x96xbf16>
    %cst_479 = arith.constant dense<0.000000e+00> : vector<8x16xf32>
    %699 = tpu.matmul %698, %672, %cst_479 {dimension_numbers = #tpu.dot_dimension_numbers<[1], [0], [0], [1], [0, 0, 1, 1], [], []>} : vector<8x96xbf16>, vector<96x16xbf16>, vector<8x16xf32> -> vector<8x16xf32>
    %700 = arith.truncf %687 : vector<1x96xf32> to vector<1x96xbf16>
    %cst_480 = arith.constant dense<0.000000e+00> : vector<1x16xf32>
    %701 = tpu.matmul %700, %673, %cst_480 {dimension_numbers = #tpu.dot_dimension_numbers<[1], [0], [0], [1], [0, 0, 1, 1], [], []>} : vector<1x96xbf16>, vector<96x16xbf16>, vector<1x16xf32> -> vector<1x16xf32>
    %702 = vector.broadcast %701 : vector<1x16xf32> to vector<8x16xf32>
    %703 = arith.addf %699, %702 : vector<8x16xf32>
    %704 = arith.truncf %697 : vector<1x96xf32> to vector<1x96xbf16>
    %cst_481 = arith.constant dense<0.000000e+00> : vector<1x16xf32>
    %705 = tpu.matmul %704, %674, %cst_481 {dimension_numbers = #tpu.dot_dimension_numbers<[1], [0], [0], [1], [0, 0, 1, 1], [], []>} : vector<1x96xbf16>, vector<96x16xbf16>, vector<1x16xf32> -> vector<1x16xf32>
    %706 = vector.broadcast %705 : vector<1x16xf32> to vector<8x16xf32>
    %707 = arith.addf %703, %706 : vector<8x16xf32>
    %708 = vector.broadcast %678 : vector<1x16xf32> to vector<8x16xf32>
    %709 = arith.addf %707, %708 : vector<8x16xf32>
    %cst_482 = arith.constant 0.000000e+00 : f32
    %710 = vector.broadcast %cst_482 : f32 to vector<8x16xf32>
    %711 = arith.maximumf %709, %710 : vector<8x16xf32>
    %712 = vector.broadcast %679 : vector<1x16xf32> to vector<8x16xf32>
    %713 = arith.mulf %711, %712 : vector<8x16xf32>
    %714 = vector.broadcast %680 : vector<1x16xf32> to vector<8x16xf32>
    %715 = arith.addf %713, %714 : vector<8x16xf32>
    %716 = math.tanh %715 : vector<8x16xf32>
    %717 = arith.truncf %716 : vector<8x16xf32> to vector<8x16xbf16>
    %cst_483 = arith.constant dense<0.000000e+00> : vector<8x96xf32>
    %718 = tpu.matmul %717, %675, %cst_483 {dimension_numbers = #tpu.dot_dimension_numbers<[1], [0], [0], [1], [0, 0, 1, 1], [], []>} : vector<8x16xbf16>, vector<16x96xbf16>, vector<8x96xf32> -> vector<8x96xf32>
    %719 = vector.broadcast %681 : vector<1x96xf32> to vector<8x96xf32>
    %720 = arith.addf %718, %719 : vector<8x96xf32>
    %cst_484 = arith.constant dense<0xFF800000> : vector<96xf32>
    %721 = vector.multi_reduction <maximumf>, %720, %cst_484 [0] : vector<8x96xf32> to vector<96xf32>
    %722 = vector.shape_cast %721 : vector<96xf32> to vector<1x96xf32>
    %723 = vector.broadcast %722 : vector<1x96xf32> to vector<8x96xf32>
    %724 = arith.subf %720, %723 : vector<8x96xf32>
    %725 = math.exp %724 : vector<8x96xf32>
    %cst_485 = arith.constant dense<0.000000e+00> : vector<96xf32>
    %726 = vector.multi_reduction <add>, %725, %cst_485 [0] : vector<8x96xf32> to vector<96xf32>
    %727 = vector.shape_cast %726 : vector<96xf32> to vector<1x96xf32>
    %728 = vector.broadcast %727 : vector<1x96xf32> to vector<8x96xf32>
    %729 = arith.divf %725, %728 : vector<8x96xf32>
    %730 = arith.mulf %729, %683 : vector<8x96xf32>
    %cst_486 = arith.constant dense<0.000000e+00> : vector<96xf32>
    %731 = vector.multi_reduction <add>, %730, %cst_486 [0] : vector<8x96xf32> to vector<96xf32>
    %732 = vector.shape_cast %731 : vector<96xf32> to vector<1x96xf32>
    %733 = vector.broadcast %732 : vector<1x96xf32> to vector<8x96xf32>
    %734 = arith.subf %683, %733 : vector<8x96xf32>
    %735 = arith.mulf %729, %734 : vector<8x96xf32>
    %736 = arith.mulf %735, %734 : vector<8x96xf32>
    %cst_487 = arith.constant dense<0.000000e+00> : vector<96xf32>
    %737 = vector.multi_reduction <add>, %736, %cst_487 [0] : vector<8x96xf32> to vector<96xf32>
    %738 = vector.shape_cast %737 : vector<96xf32> to vector<1x96xf32>
    %cst_488 = arith.constant 9.99999996E-13 : f32
    %739 = vector.broadcast %cst_488 : f32 to vector<1x96xf32>
    %740 = arith.maximumf %738, %739 : vector<1x96xf32>
    %741 = math.sqrt %740 : vector<1x96xf32>
    %742 = arith.truncf %732 : vector<1x96xf32> to vector<1x96xbf16>
    %cst_489 = arith.constant dense<0.000000e+00> : vector<1x32xf32>
    %743 = tpu.matmul %742, %676, %cst_489 {dimension_numbers = #tpu.dot_dimension_numbers<[1], [0], [0], [1], [0, 0, 1, 1], [], []>} : vector<1x96xbf16>, vector<96x32xbf16>, vector<1x32xf32> -> vector<1x32xf32>
    %744 = arith.truncf %741 : vector<1x96xf32> to vector<1x96xbf16>
    %cst_490 = arith.constant dense<0.000000e+00> : vector<1x32xf32>
    %745 = tpu.matmul %744, %677, %cst_490 {dimension_numbers = #tpu.dot_dimension_numbers<[1], [0], [0], [1], [0, 0, 1, 1], [], []>} : vector<1x96xbf16>, vector<96x32xbf16>, vector<1x32xf32> -> vector<1x32xf32>
    %746 = arith.addf %743, %745 : vector<1x32xf32>
    %747 = arith.addf %746, %682 : vector<1x32xf32>
    %748 = vector.extract_strided_slice %671 {offsets = [8, 0], sizes = [8, 96], strides = [1, 1]} : vector<16x96xf32> to vector<8x96xf32>
    %cst_491 = arith.constant dense<0.000000e+00> : vector<96xf32>
    %749 = vector.multi_reduction <add>, %748, %cst_491 [0] : vector<8x96xf32> to vector<96xf32>
    %750 = vector.shape_cast %749 : vector<96xf32> to vector<1x96xf32>
    %cst_492 = arith.constant 8.000000e+00 : f32
    %751 = vector.broadcast %cst_492 : f32 to vector<1x96xf32>
    %752 = arith.divf %750, %751 : vector<1x96xf32>
    %753 = vector.broadcast %752 : vector<1x96xf32> to vector<8x96xf32>
    %754 = arith.subf %748, %753 : vector<8x96xf32>
    %755 = arith.mulf %754, %754 : vector<8x96xf32>
    %cst_493 = arith.constant dense<0.000000e+00> : vector<96xf32>
    %756 = vector.multi_reduction <add>, %755, %cst_493 [0] : vector<8x96xf32> to vector<96xf32>
    %757 = vector.shape_cast %756 : vector<96xf32> to vector<1x96xf32>
    %cst_494 = arith.constant 8.000000e+00 : f32
    %758 = vector.broadcast %cst_494 : f32 to vector<1x96xf32>
    %759 = arith.divf %757, %758 : vector<1x96xf32>
    %cst_495 = arith.constant 9.99999996E-13 : f32
    %760 = vector.broadcast %cst_495 : f32 to vector<1x96xf32>
    %761 = arith.maximumf %759, %760 : vector<1x96xf32>
    %762 = math.sqrt %761 : vector<1x96xf32>
    %763 = arith.truncf %748 : vector<8x96xf32> to vector<8x96xbf16>
    %cst_496 = arith.constant dense<0.000000e+00> : vector<8x16xf32>
    %764 = tpu.matmul %763, %672, %cst_496 {dimension_numbers = #tpu.dot_dimension_numbers<[1], [0], [0], [1], [0, 0, 1, 1], [], []>} : vector<8x96xbf16>, vector<96x16xbf16>, vector<8x16xf32> -> vector<8x16xf32>
    %765 = arith.truncf %752 : vector<1x96xf32> to vector<1x96xbf16>
    %cst_497 = arith.constant dense<0.000000e+00> : vector<1x16xf32>
    %766 = tpu.matmul %765, %673, %cst_497 {dimension_numbers = #tpu.dot_dimension_numbers<[1], [0], [0], [1], [0, 0, 1, 1], [], []>} : vector<1x96xbf16>, vector<96x16xbf16>, vector<1x16xf32> -> vector<1x16xf32>
    %767 = vector.broadcast %766 : vector<1x16xf32> to vector<8x16xf32>
    %768 = arith.addf %764, %767 : vector<8x16xf32>
    %769 = arith.truncf %762 : vector<1x96xf32> to vector<1x96xbf16>
    %cst_498 = arith.constant dense<0.000000e+00> : vector<1x16xf32>
    %770 = tpu.matmul %769, %674, %cst_498 {dimension_numbers = #tpu.dot_dimension_numbers<[1], [0], [0], [1], [0, 0, 1, 1], [], []>} : vector<1x96xbf16>, vector<96x16xbf16>, vector<1x16xf32> -> vector<1x16xf32>
    %771 = vector.broadcast %770 : vector<1x16xf32> to vector<8x16xf32>
    %772 = arith.addf %768, %771 : vector<8x16xf32>
    %773 = vector.broadcast %678 : vector<1x16xf32> to vector<8x16xf32>
    %774 = arith.addf %772, %773 : vector<8x16xf32>
    %cst_499 = arith.constant 0.000000e+00 : f32
    %775 = vector.broadcast %cst_499 : f32 to vector<8x16xf32>
    %776 = arith.maximumf %774, %775 : vector<8x16xf32>
    %777 = vector.broadcast %679 : vector<1x16xf32> to vector<8x16xf32>
    %778 = arith.mulf %776, %777 : vector<8x16xf32>
    %779 = vector.broadcast %680 : vector<1x16xf32> to vector<8x16xf32>
    %780 = arith.addf %778, %779 : vector<8x16xf32>
    %781 = math.tanh %780 : vector<8x16xf32>
    %782 = arith.truncf %781 : vector<8x16xf32> to vector<8x16xbf16>
    %cst_500 = arith.constant dense<0.000000e+00> : vector<8x96xf32>
    %783 = tpu.matmul %782, %675, %cst_500 {dimension_numbers = #tpu.dot_dimension_numbers<[1], [0], [0], [1], [0, 0, 1, 1], [], []>} : vector<8x16xbf16>, vector<16x96xbf16>, vector<8x96xf32> -> vector<8x96xf32>
    %784 = vector.broadcast %681 : vector<1x96xf32> to vector<8x96xf32>
    %785 = arith.addf %783, %784 : vector<8x96xf32>
    %cst_501 = arith.constant dense<0xFF800000> : vector<96xf32>
    %786 = vector.multi_reduction <maximumf>, %785, %cst_501 [0] : vector<8x96xf32> to vector<96xf32>
    %787 = vector.shape_cast %786 : vector<96xf32> to vector<1x96xf32>
    %788 = vector.broadcast %787 : vector<1x96xf32> to vector<8x96xf32>
    %789 = arith.subf %785, %788 : vector<8x96xf32>
    %790 = math.exp %789 : vector<8x96xf32>
    %cst_502 = arith.constant dense<0.000000e+00> : vector<96xf32>
    %791 = vector.multi_reduction <add>, %790, %cst_502 [0] : vector<8x96xf32> to vector<96xf32>
    %792 = vector.shape_cast %791 : vector<96xf32> to vector<1x96xf32>
    %793 = vector.broadcast %792 : vector<1x96xf32> to vector<8x96xf32>
    %794 = arith.divf %790, %793 : vector<8x96xf32>
    %795 = arith.mulf %794, %748 : vector<8x96xf32>
    %cst_503 = arith.constant dense<0.000000e+00> : vector<96xf32>
    %796 = vector.multi_reduction <add>, %795, %cst_503 [0] : vector<8x96xf32> to vector<96xf32>
    %797 = vector.shape_cast %796 : vector<96xf32> to vector<1x96xf32>
    %798 = vector.broadcast %797 : vector<1x96xf32> to vector<8x96xf32>
    %799 = arith.subf %748, %798 : vector<8x96xf32>
    %800 = arith.mulf %794, %799 : vector<8x96xf32>
    %801 = arith.mulf %800, %799 : vector<8x96xf32>
    %cst_504 = arith.constant dense<0.000000e+00> : vector<96xf32>
    %802 = vector.multi_reduction <add>, %801, %cst_504 [0] : vector<8x96xf32> to vector<96xf32>
    %803 = vector.shape_cast %802 : vector<96xf32> to vector<1x96xf32>
    %cst_505 = arith.constant 9.99999996E-13 : f32
    %804 = vector.broadcast %cst_505 : f32 to vector<1x96xf32>
    %805 = arith.maximumf %803, %804 : vector<1x96xf32>
    %806 = math.sqrt %805 : vector<1x96xf32>
    %807 = arith.truncf %797 : vector<1x96xf32> to vector<1x96xbf16>
    %cst_506 = arith.constant dense<0.000000e+00> : vector<1x32xf32>
    %808 = tpu.matmul %807, %676, %cst_506 {dimension_numbers = #tpu.dot_dimension_numbers<[1], [0], [0], [1], [0, 0, 1, 1], [], []>} : vector<1x96xbf16>, vector<96x32xbf16>, vector<1x32xf32> -> vector<1x32xf32>
    %809 = arith.truncf %806 : vector<1x96xf32> to vector<1x96xbf16>
    %cst_507 = arith.constant dense<0.000000e+00> : vector<1x32xf32>
    %810 = tpu.matmul %809, %677, %cst_507 {dimension_numbers = #tpu.dot_dimension_numbers<[1], [0], [0], [1], [0, 0, 1, 1], [], []>} : vector<1x96xbf16>, vector<96x32xbf16>, vector<1x32xf32> -> vector<1x32xf32>
    %811 = arith.addf %808, %810 : vector<1x32xf32>
    %812 = arith.addf %811, %682 : vector<1x32xf32>
    %813 = tpu.concatenate %747, %812 in 0 : vector<1x32xf32>, vector<1x32xf32> -> vector<2x32xf32>
    %c0_508 = arith.constant 0 : index
    %c0_509 = arith.constant 0 : index
    %814 = vector.load %arg9[%c0_508, %c0_509] : memref<2x32xf32, #tpu.memory_space<vmem>>, vector<2x32xf32>
    tpu.vector_store %arg9[%c0_508, %c0_509], %813 {strides = array<i32>} : memref<2x32xf32, #tpu.memory_space<vmem>>, vector<2x32xf32>,
    return
  }
}

</mosaic_0001>

<bundles_post_ra>
// kernel: ecapa_tdnn_forward.1
= control target key start
LH: loop header
LB: loop body
LE: loop exit
PB: predicated region body
PF: predicated region fallthrough
CT: control target
= control target key end

     0   :  { %14 = vsyncpa [#allocation4], 0  ;;  %s10385_s0 = inlined_call_operand.vmem [shape: f32[2,288], index: 0, kind: input, shape index: {}]   ;;  %s10386_s1 = inlined_call_operand.vmem [shape: f32[64,128], index: 1, kind: input, shape index: {}]   ;;  %s10387_s2 = inlined_call_operand.vmem [shape: f32[128,16], index: 2, kind: input, shape index: {}]   ;;  %s10388_s3 = inlined_call_operand.vmem [shape: f32[16,16,16], index: 3, kind: input, shape index: {}]   ;;  %s10389_s4 = inlined_call_operand.vmem [shape: f32[64,128], index: 4, kind: input, shape index: {}]   ;;  %s10390_s5 = inlined_call_operand.hbm [shape: bf16[5,16,32], index: 5, kind: input, shape index: {}]   ;;  %s10391_s6 = inlined_call_operand.vmem [shape: bf16[27,8,8], index: 6, kind: input, shape index: {}]   ;;  %s10392_s7 = inlined_call_operand.vmem [shape: bf16[12,32,32], index: 7, kind: input, shape index: {}]   ;;  %s10393_s8 = inlined_call_operand.vmem [shape: bf16[592,96], index: 8, kind: input, shape index: {}]   ;;  %s10394_s9 = inlined_call_operand.hbm [shape: f32[2,32], index: 9, kind: output, shape index: {}]  }
   0x1   :  { %15 = vsyncpa [#allocation5], 0  ;;  %s8763_s30 = smov [#allocation3]  }
   0x2   :  { %s31_s10 = sshll.u32 %s8763_s30, 4  ;;  %s32_s10 = int_to_ptr.vmem [resolvable:$true] %s31_s10 }
   0x3   :  { %s8727_s11 = scalar_lea.vmem %s32_s10, 640  ;;  %p8732_p1 = scmp.lt.s32.totalorder %s32_s10, %s32_s10 }
   0x4   :  { %p8728_p0 = scmp.ne.s32.totalorder %s32_s10, %s8727_s11  ;;  %p8733_p2 = scmp.lt.s32.totalorder %s8727_s11, %s8727_s11 }
   0x6   :  { %p8734_p3 = por %p8733_p2, %p8732_p1 }
   0x8   :  { %p8735_p4 = pnand %p8734_p3, %p8728_p0 }
   0xa   :  { %8738 = shalt.err (!%p8735_p4)
}
   0xb   :  { %s8764_s12 = smov 64   ;;  %s8765_s13 = smov 4  }
   0xc   :  { %37 = dma.hbm_to_vmem [thread:$0]  %s10390_s5, 640, %s32_s10, [#allocation4], %s8764_s12, %s8764_s12, %s8765_s13  }
   0xd   :  { %8759 = dma.done.wait [#allocation4], 640  }
   0xe   :  { %8760 = vsyncadd [#allocation4], 4294966656  ;;  %v73_v0 = vlaneseq  ;;  %v7170_v3 = vld [vmem:[%s10385_s0] ss:$0 sm:$0xff]  ;;  %v111_v4 = vld [vmem:[%s10385_s0 + $0x2] sm:$0x5] }
   0xf   :  { %v71_v5 = vld [vmem:[%s10385_s0] sm:$0x5]  ;;  %67 = vrot.lane.b32.xlu1 %v7170_v3, %s8764_s12  ;;  %s8766_s5 = smov 96   ;;  %vm49_vm0 = vcmask 516096   ;;  %s8767_s26 = smov 32   ;;  %v215_v13 = vld [vmem:[%s10386_s1 + $0x38] sm:$0xff] }
  0x10   :  { %v74_v1 = vshrl.u32 %v73_v0, 7  ;;  %57 = vrot.lane.b32.xlu0 %v7170_v3, %s8766_s5  ;;  %v48_v9 = vld [vmem:[%s10385_s0] sm:$0x1]  ;;  %v89_v10 = vld [vmem:[%s10385_s0 + $0x2] sm:$0x1]  ;;  %7840 = vmatprep.subr.mxu0 %v215_v13  ;;  %v214_v16 = vld [vmem:[%s10386_s1 + $0x30] sm:$0xff] }
  0x11   :  { %50 = vst.msk [vmem:[#allocation2] sm:$0x1] %vm49_vm0, %v48_v9  ;;  %90 = vst.msk [vmem:[#allocation2 + $0x4] sm:$0x1] %vm49_vm0, %v89_v10  ;;  %v7172_v14 = vld [vmem:[%s10385_s0 + $0x2] ss:$0 sm:$0xff]  ;;  %7841 = vmatpush3.msra.mxu0 %v215_v13 }
  0x12   :  { %v8831_v2 = vsub.s32 0, %v74_v1  ;;  %v79_v8 = vsub.s32 2, %v74_v1  ;;  %v150_v15 = vld [vmem:[%s10385_s0 + $0x1] sm:$0x5]  ;;  %7842 = vmatprep.subr.mxu0 %v214_v16  ;;  %v213_v17 = vld [vmem:[%s10386_s1 + $0x28] sm:$0xff]  ;;  %v211_v24 = vld [vmem:[%s10386_s1 + $0x18] sm:$0xff] }
  0x13   :  { %v189_v18 = vld [vmem:[%s10385_s0 + $0x3] sm:$0x5]  ;;  %7843 = vmatpush3.msra.mxu0 %v214_v16  ;;  %v128_v22 = vld [vmem:[%s10385_s0 + $0x1] sm:$0x1]  ;;  %v210_v27 = vld [vmem:[%s10386_s1 + $0x10] sm:$0xff]  ;;  %vm85_vm1 = vcmask 261120  }
  0x14   :  { %v116_v6 = vrot.slane %v111_v4, %v8831_v2  ;;  %v76_v7 = vrot.slane %v71_v5, %v8831_v2  ;;  %v120_v11 = vrot.slane %v111_v4, %v79_v8  ;;  %v80_v12 = vrot.slane %v71_v5, %v79_v8  ;;  %v212_v19 = vld [vmem:[%s10386_s1 + $0x20] sm:$0xff]  ;;  %7844 = vmatprep.subr.mxu0 %v213_v17  ;;  %v209_v28 = vld [vmem:[%s10386_s1 + $0x8] sm:$0xff]  ;;  %v315_v31 = vld [vmem:[%s10387_s2 + $0x78] sm:$0xff]  ;;  %s8770_s11 = smov 120   ;;  %s8771_s25 = smov 16  }
  0x15   :  { %v159_v20 = vrot.slane %v150_v15, %v79_v8  ;;  %v155_v21 = vrot.slane %v150_v15, %v8831_v2  ;;  %7845 = vmatpush3.msra.mxu0 %v213_v17  ;;  %v167_v23 = vld [vmem:[%s10385_s0 + $0x3] sm:$0x1]  ;;  %129 = vst.msk [vmem:[#allocation2 + $0x8] sm:$0x1] %vm49_vm0, %v128_v22  ;;  %v198_v25 = vrot.slane %v189_v18, %v79_v8  ;;  %v7174_v29 = vld [vmem:[%s10385_s0 + $0x1] ss:$0 sm:$0xff] }
  0x16   :  { %121 = vrot.lane.b32.xlu1 %v116_v6, %s8767_s26  ;;  %81 = vrot.lane.b32.xlu0 %v76_v7, %s8767_s26  ;;  %168 = vst.msk [vmem:[#allocation2 + $0xc] sm:$0x1] %vm49_vm0, %v167_v23  ;;  %v194_v26 = vrot.slane %v189_v18, %v8831_v2  ;;  %v208_v30 = vld [vmem:[%s10386_s1] sm:$0xff]  ;;  %v314_v32 = vld [vmem:[%s10387_s2 + $0x70] sm:$0xff]  ;;  %vm216_vm2 = vcmask 523264   ;;  %vm399_vm3 = vcmask 130048  }
  0x17   :  { %7846 = vmatprep.subr.mxu0 %v212_v19  ;;  %v7176_v33 = vld [vmem:[%s10385_s0 + $0x3] ss:$0 sm:$0xff]  ;;  %7859 = vmatprep.subr.mxu1 %v315_v31  ;;  %v313_v34 = vld [vmem:[%s10387_s2 + $0x68] sm:$0xff]  ;;  %v311_v36 = vld [vmem:[%s10387_s2 + $0x58] sm:$0xff]  ;;  %vm8769_vm4 = vmmov 0   ;;  %vm1248_vm5 = vcmask 1043456  }
  0x18   :  { %7847 = vmatpush3.msra.mxu0 %v212_v19  ;;  %7860 = vmatpush3.msra.mxu1 %v315_v31  ;;  %v312_v35 = vld [vmem:[%s10387_s2 + $0x60] sm:$0xff]  ;;  %v310_v37 = vld [vmem:[%s10387_s2 + $0x50] sm:$0xff]  ;;  %v309_v38 = vld [vmem:[%s10387_s2 + $0x48] sm:$0xff]  ;;  %vm1244_vm6 = vcmask 64512   ;;  %s8772_s27 = smov 112   ;;  %s8773_s19 = smov 24  }
  0x19   :  { %7848 = vmatprep.subr.mxu0 %v211_v24  ;;  %7861 = vmatprep.subr.mxu1 %v314_v32  ;;  %v308_v39 = vld [vmem:[%s10387_s2 + $0x40] sm:$0xff]  ;;  %v307_v40 = vld [vmem:[%s10387_s2 + $0x38] sm:$0xff]  ;;  %v306_v41 = vld [vmem:[%s10387_s2 + $0x30] sm:$0xff]  ;;  %vm2616_vm7 = vcmask 15360   ;;  %vm2623_vm8 = vcmask 1041408   ;;  %vm6243_vm9 = vcmask 785408  }
  0x1a   :  { %123 = vrot.lane.b32.xlu1 %v120_v11, %s8767_s26  ;;  %83 = vrot.lane.b32.xlu0 %v80_v12, %s8767_s26  ;;  %v305_v42 = vld [vmem:[%s10387_s2 + $0x28] sm:$0xff]  ;;  %v304_v43 = vld [vmem:[%s10387_s2 + $0x20] sm:$0xff]  ;;  %s8775_s10 = smov [#allocation6]  }
  0x1b   :  { %7849 = vmatpush3.msra.mxu0 %v211_v24  ;;  %7862 = vmatpush3.msra.mxu1 %v314_v32  ;;  %v303_v44 = vld [vmem:[%s10387_s2 + $0x18] sm:$0xff]  ;;  %v302_v4 = vld [vmem:[%s10387_s2 + $0x10] sm:$0xff]  ;;  %v301_v5 = vld [vmem:[%s10387_s2 + $0x8] sm:$0xff]  ;;  %v8768_v24 = vmov 0.0   ;;  %s7160_s13 = sshll.u32 %s8775_s10, 4  ;;  %s7161_s13 = int_to_ptr.vmem [resolvable:$true] %s7160_s13 }
  0x1c   :  { %7850 = vmatprep.subr.mxu0 %v210_v27  ;;  %7863 = vmatprep.subr.mxu1 %v313_v34  ;;  %v300_v6 = vld [vmem:[%s10387_s2] sm:$0xff]  ;;  %s8739_s14 = scalar_lea.vmem %s7161_s13, 32  ;;  %p8744_p6 = scmp.lt.s32.totalorder %s7161_s13, %s7161_s13 }
  0x1d   :  { %7851 = vmatpush3.msra.mxu0 %v210_v27  ;;  %7864 = vmatpush3.msra.mxu1 %v313_v34  ;;  %v8623_v23 = vld [vmem:[#allocation3 + $0x10] sm:$0xff]   ;;  %p8740_p5 = scmp.ne.s32.totalorder %s7161_s13, %s8739_s14  ;;  %p8745_p7 = scmp.lt.s32.totalorder %s8739_s14, %s8739_s14 }
  0x1e   :  { %107 = vrot.lane.b32.xlu1 %v7172_v14, %s8764_s12  ;;  %97 = vrot.lane.b32.xlu0 %v7172_v14, %s8766_s5 }
  0x1f   :  { %7852 = vmatprep.subr.mxu0 %v209_v28  ;;  %7865 = vmatprep.subr.mxu1 %v312_v35  ;;  %p8746_p8 = por %p8745_p7, %p8744_p6 }
  0x20   :  { %7853 = vmatpush3.msra.mxu0 %v209_v28  ;;  %7866 = vmatpush3.msra.mxu1 %v312_v35 }
  0x21   :  { %7854 = vmatprep.subr.mxu0 %v208_v30  ;;  %7867 = vmatprep.subr.mxu1 %v311_v36  ;;  %p8747_p9 = pnand %p8746_p8, %p8740_p5 }
  0x22   :  { %162 = vrot.lane.b32.xlu1 %v159_v20, %s8767_s26  ;;  %160 = vrot.lane.b32.xlu0 %v155_v21, %s8767_s26 }
  0x23   :  { %7855 = vmatpush3.msra.mxu0 %v208_v30  ;;  %7868 = vmatpush3.msra.mxu1 %v311_v36 }
  0x24   :  { %7869 = vmatprep.subr.mxu1 %v310_v37 }
  0x25   :  { %7870 = vmatpush3.msra.mxu1 %v310_v37 }
  0x26   :  { %201 = vrot.lane.b32.xlu1 %v198_v25, %s8767_s26  ;;  %199 = vrot.lane.b32.xlu0 %v194_v26, %s8767_s26  ;;  %v436_v25 = vld [vmem:[%s10388_s3] sm:$0xff]  ;;  %s8774_s26 = smov 104  }
  0x27   :  { %7871 = vmatprep.subr.mxu1 %v309_v38 }
  0x28   :  { %7872 = vmatpush3.msra.mxu1 %v309_v38 }
  0x29   :  { %7873 = vmatprep.subr.mxu1 %v308_v39 }
  0x2a   :  { %146 = vrot.lane.b32.xlu1 %v7174_v29, %s8764_s12  ;;  %136 = vrot.lane.b32.xlu0 %v7174_v29, %s8766_s5 }
  0x2b   :  { %7874 = vmatpush3.msra.mxu1 %v308_v39 }
  0x2c   :  { %7875 = vmatprep.subr.mxu1 %v307_v40 }
  0x2d   :  { %7876 = vmatpush3.msra.mxu1 %v307_v40 }
  0x2e   :  { %185 = vrot.lane.b32.xlu1 %v7176_v33, %s8764_s12  ;;  %175 = vrot.lane.b32.xlu0 %v7176_v33, %s8766_s5 }
  0x2f   :  { %7877 = vmatprep.subr.mxu1 %v306_v41 }
  0x30   :  { %7878 = vmatpush3.msra.mxu1 %v306_v41 }
  0x31   :  { %7879 = vmatprep.subr.mxu1 %v305_v42 }
  0x32   :  { %7880 = vmatpush3.msra.mxu1 %v305_v42 }
  0x33   :  { %7881 = vmatprep.subr.mxu1 %v304_v43 }
  0x34   :  { %7882 = vmatpush3.msra.mxu1 %v304_v43 }
  0x35   :  { %7883 = vmatprep.subr.mxu1 %v303_v44 }
  0x36   :  { %7884 = vmatpush3.msra.mxu1 %v303_v44  ;;  %v437_v44 = vld [vmem:[%s10388_s3 + $0x8] sm:$0xff] }
  0x37   :  { %7885 = vmatprep.subr.mxu1 %v302_v4 }
  0x38   :  { %7886 = vmatpush3.msra.mxu1 %v302_v4 }
  0x39   :  { %7887 = vmatprep.subr.mxu1 %v301_v5 }
  0x3a   :  { %7888 = vmatpush3.msra.mxu1 %v301_v5 }
  0x3b   :  { %7889 = vmatprep.subr.mxu1 %v300_v6 }
  0x3c   :  { %7890 = vmatpush3.msra.mxu1 %v300_v6 }
  0x3d   :  { %7920 = vmatprep.subr.bf16.mxu1 %v8768_v24 }
  0x81   :  { %v68_v45 = vpop.permute.xlu1 %67 }
  0x82   :  { %v58_v46 = vpop.permute.xlu0 %57  ;;  %70 = vst.msk [vmem:[#allocation2 + $0x2] sm:$0x1] %vm49_vm0, %v68_v45 }
  0x83   :  { %60 = vst.msk [vmem:[#allocation2 + $0x1] sm:$0x1] %vm49_vm0, %v58_v46  ;;  %v7183_v46 = vld [vmem:[%s10388_s3 + $0x10] sm:$0xff] }
  0x88   :  { %v122_v47 = vpop.permute.xlu1 %121  ;;  %v82_v48 = vpop.permute.xlu0 %81 }
  0x8c   :  { %v124_v49 = vpop.permute.xlu1 %123  ;;  %v84_v50 = vpop.permute.xlu0 %83 }
  0x8d   :  { %v125_v51 = vsel %vm85_vm1, %v122_v47, %v124_v49  ;;  %v86_v52 = vsel %vm85_vm1, %v82_v48, %v84_v50  ;;  %v7184_v47 = vld [vmem:[%s10388_s3 + $0x18] sm:$0xff] }
  0x8e   :  { %127 = vst.msk [vmem:[#allocation2 + $0x7] sm:$0x1] %vm49_vm0, %v125_v51  ;;  %88 = vst.msk [vmem:[#allocation2 + $0x3] sm:$0x1] %vm49_vm0, %v86_v52  ;;  %v8624_v48 = vld [vmem:[#allocation3 + $0x8] sm:$0xff]  }
  0x90   :  { %v108_v53 = vpop.permute.xlu1 %107  ;;  %v98_v54 = vpop.permute.xlu0 %97 }
  0x91   :  { %110 = vst.msk [vmem:[#allocation2 + $0x6] sm:$0x1] %vm49_vm0, %v108_v53  ;;  %100 = vst.msk [vmem:[#allocation2 + $0x5] sm:$0x1] %vm49_vm0, %v98_v54 }
  0x94   :  { %v163_v55 = vpop.permute.xlu1 %162  ;;  %v161_v56 = vpop.permute.xlu0 %160 }
  0x95   :  { %v164_v57 = vsel %vm85_vm1, %v161_v56, %v163_v55  ;;  %v8625_v56 = vld [vmem:[#allocation3] sm:$0xff]  }
  0x96   :  { %166 = vst.msk [vmem:[#allocation2 + $0xb] sm:$0x1] %vm49_vm0, %v164_v57 }
  0x98   :  { %v202_v58 = vpop.permute.xlu1 %201  ;;  %v200_v59 = vpop.permute.xlu0 %199  ;;  %v206_v60 = vld [vmem:[#allocation2] sm:$0xff] }
  0x99   :  { %v203_v61 = vsel %vm85_vm1, %v200_v59, %v202_v58  ;;  %7856 = vmatprep.mubr.msk.f32.mxu0 %vm216_vm2, %v206_v60  ;;  %v7193_v60 = vld [vmem:[%s10388_s3 + $0x30] sm:$0xff] }
  0x9a   :  { %205 = vst.msk [vmem:[#allocation2 + $0xf] sm:$0x1] %vm49_vm0, %v203_v61  ;;  %v7194_v61 = vld [vmem:[%s10388_s3 + $0x38] sm:$0xff] }
  0x9c   :  { %v147_v62 = vpop.permute.xlu1 %146  ;;  %v137_v63 = vpop.permute.xlu0 %136 }
  0x9d   :  { %149 = vst.msk [vmem:[#allocation2 + $0xa] sm:$0x1] %vm49_vm0, %v147_v62  ;;  %139 = vst.msk [vmem:[#allocation2 + $0x9] sm:$0x1] %vm49_vm0, %v137_v63  ;;  %v7199_v62 = vld [vmem:[%s10388_s3 + $0x40] sm:$0xff]  ;;  %v7200_v63 = vld [vmem:[%s10388_s3 + $0x48] sm:$0xff] }
  0xa0   :  { %v186_v0 = vpop.permute.xlu1 %185  ;;  %v176_v1 = vpop.permute.xlu0 %175 }
  0xa1   :  { %188 = vst.msk [vmem:[#allocation2 + $0xe] sm:$0x1] %vm49_vm0, %v186_v0  ;;  %178 = vst.msk [vmem:[#allocation2 + $0xd] sm:$0x1] %vm49_vm0, %v176_v1  ;;  %v8626_v0 = vld [vmem:[#allocation3 + $0x18] sm:$0xff]   ;;  %v8627_v1 = vld [vmem:[#allocation3 + $0x20] sm:$0xff]  }
  0xa8   :  { %v207_v3 = vld [vmem:[#allocation2 + $0x8] sm:$0xff] }
  0xa9   :  { %7857 = vmatmul.mubr.msk.f32.vlgmr.msra.gmra.mxu0 %vm216_vm2, %v207_v3  ;;  %vm7150_vm2 = vcmask 1040384  }
  0xaa   :  { %7898 = vmatprep.mubr.msk.f32.mxu0 %vm399_vm3, %v436_v25 }
 0x169   :  { %v7858_v7 = vpop.f32.mrf.mxu0 }
 0x16a   :  { %v299_v10 = vmul.f32 %v7858_v7, %v7858_v7 }
 0x16b   :  { %v289_v8 = vpop.f32.mrf.mxu0 }
 0x16c   :  { %v298_v9 = vmul.f32 %v289_v8, %v289_v8 }
 0x16e   :  { %7891 = vmatprep.mubr.f32.mxu1 %v298_v9 }
 0x16f   :  { %7892 = vmatmul.mubr.f32.vlgmr.msra.gmra.mxu1 %v299_v10 }
 0x170   :  { %7921 = vmatpush3.bf16.msra.mxu1 %v8623_v23  ;;  %7922 = vmatprep.mubr.msk.bf16.mxu1 %vm8769_vm4, %v8768_v24 }
 0x171   :  { %7933 = vmatprep.subr.bf16.mxu1 %v8768_v24 }
 0x22f   :  { %v7893_v11 = vpop.f32.mrf.mxu1 }
 0x230   :  { %v392_v12 = vmax.f32 %v7893_v11, 1e-10 }
 0x231   :  { %v382_v13 = vpop.f32.mrf.mxu1 }
 0x232   :  { %8680 = vlog2.f32 %v392_v12  ;;  %v391_v14 = vmax.f32 %v382_v13, 1e-10 }
 0x234   :  { %8682 = vlog2.f32 %v391_v14 }
 0x23f   :  { %v8681_v15 = vpop.eup %8680 }
 0x240   :  { %v396_v16 = vmul.f32 0.6931472, %v8681_v15 }
 0x241   :  { %v8683_v17 = vpop.eup %8682 }
 0x242   :  { %v398_v18 = vmul.f32 4.3429446, %v396_v16  ;;  %v394_v19 = vmul.f32 0.6931472, %v8683_v17 }
 0x244   :  { %v411_v20 = vsel %vm399_vm3, %v398_v18, -inf  ;;  %v397_v21 = vmul.f32 4.3429446, %v394_v19  ;;  %v8628_v19 = vld [vmem:[%s10392_s7 + $0x8] sm:$0xff]  }
 0x245   :  { %412 = vmax.xlane.f32.xlu0 %v411_v20  ;;  %v8629_v20 = vld [vmem:[%s10392_s7] sm:$0xff]  }
 0x246   :  { %v400_v22 = vsel %vm399_vm3, %v397_v21, -inf }
 0x247   :  { %401 = vmax.xlane.f32.xlu1 %v400_v22 }
 0x2ce   :  { %v413_v26 = vpop.xlane.xlu0 %412 }
 0x2cf   :  { %v414_v27 = vrot.slane %v413_v26, 4 }
 0x2d0   :  { %v402_v28 = vpop.xlane.xlu1 %401 }
 0x2d1   :  { %v415_v29 = vmax.f32 %v413_v26, %v414_v27  ;;  %v403_v30 = vrot.slane %v402_v28, 4 }
 0x2d3   :  { %v416_v31 = vrot.slane %v415_v29, 2  ;;  %v404_v32 = vmax.f32 %v402_v28, %v403_v30  ;;  %v7205_v28 = vld [vmem:[%s10389_s4] ss:$0 sm:$0xff] }
 0x2d5   :  { %v417_v33 = vmax.f32 %v415_v29, %v416_v31  ;;  %v405_v34 = vrot.slane %v404_v32, 2 }
 0x2d7   :  { %v418_v35 = vrot.slane %v417_v33, 1  ;;  %v406_v36 = vmax.f32 %v404_v32, %v405_v34 }
 0x2d9   :  { %v419_v37 = vmax.f32 %v417_v33, %v418_v35  ;;  %v407_v38 = vrot.slane %v406_v36, 1 }
 0x2db   :  { %v7180_v39 = vadd.f32 -80.0, %v419_v37  ;;  %v408_v40 = vmax.f32 %v406_v36, %v407_v38  ;;  %v7206_v38 = vld [vmem:[%s10389_s4 + $0x1] ss:$0 sm:$0xff] }
 0x2dd   :  { %v421_v41 = vmax.f32 %v398_v18, %v7180_v39  ;;  %v7179_v42 = vadd.f32 -80.0, %v408_v40 }
 0x2df   :  { %v410_v43 = vmax.f32 %v397_v21, %v7179_v42  ;;  %7894 = vmatprep.subr.mxu0 %v421_v41 }
 0x2e0   :  { %7895 = vmatpush3.msra.mxu0 %v421_v41 }
 0x2e1   :  { %7896 = vmatprep.subr.mxu0 %v410_v43  ;;  %v705_v45 = vpack.c.bf16 %v421_v41, %v410_v43 }
 0x2e2   :  { %7897 = vmatpush3.msra.mxu0 %v410_v43 }
 0x2e3   :  { %7899 = vmatmul.mubr.msk.f32.vlgmr.msra.gmra.mxu0 %vm399_vm3, %v437_v44  ;;  %7901 = vmatprep.subr.mxu0 %v421_v41 }
 0x2e4   :  { %7923 = vmatmul.mubr.msk.bf16.vlgmr.msra.gmra.mxu1 %vm399_vm3, %v705_v45  ;;  %7902 = vmatpush3.msra.mxu0 %v421_v41 }
 0x2e5   :  { %7903 = vmatprep.subr.mxu0 %v410_v43  ;;  %7905 = vmatprep.mubr.msk.f32.mxu0 %vm399_vm3, %v7183_v46 }
 0x2e6   :  { %7904 = vmatpush3.msra.mxu0 %v410_v43  ;;  %7935 = vmatprep.mubr.msk.bf16.mxu1 %vm8769_vm4, %v8768_v24 }
 0x2e7   :  { %7906 = vmatmul.mubr.msk.f32.vlgmr.msra.gmra.mxu0 %vm399_vm3, %v7184_v47  ;;  %7908 = vmatprep.subr.bf16.mxu0 %v8768_v24 }
 0x2e8   :  { %7910 = vmatprep.mubr.msk.bf16.mxu0 %vm8769_vm4, %v8768_v24  ;;  %7909 = vmatpush3.bf16.msra.mxu0 %v8624_v48  ;;  %v7217_v48 = vld [vmem:[%s10391_s6 + $0x4] sm:$0xf] }
 0x2e9   :  { %7914 = vmatprep.subr.bf16.mxu0 %v8768_v24  ;;  %7934 = vmatpush3.bf16.msra.mxu1 %v8626_v0 }
 0x2ea   :  { %7952 = vmatprep.subr.bf16.mxu1 %v8768_v24 }
 0x3a3   :  { %v7900_v49 = vpop.f32.mrf.mxu0 }
 0x3a4   :  { %v9012_v50 = vpop.f32.mrf.mxu1 }
 0x3a5   :  { %v510_v51 = vpop.f32.mrf.mxu0 }
 0x3a6   :  { %v7924_v52 = vpop.f32.mrf.mxu1  ;;  %v519_v59 = vpack.c.bf16 %v7900_v49, %v510_v51  ;;  %v1250_v49 = vsel %vm1248_vm5, %v7217_v48, 0 }
 0x3a7   :  { %v7907_v53 = vpop.f32.mrf.mxu0 }
 0x3a8   :  { %v9014_v54 = vpop.f32.mrf.mxu1 }
 0x3a9   :  { %v595_v55 = vpop.f32.mrf.mxu0 }
 0x3aa   :  { %v604_v57 = vpack.c.bf16 %v7907_v53, %v595_v55  ;;  %v7925_v58 = vpop.f32.mrf.mxu1  ;;  %v7215_v53 = vld [vmem:[%s10389_s4 + $0x4] ss:$0 sm:$0xff] }
 0x3ac   :  { %7911 = vmatmul.mubr.msk.bf16.vlgmr.msra.gmra.mxu0 %vm399_vm3, %v604_v57  ;;  %v7216_v57 = vld [vmem:[%s10389_s4 + $0x5] ss:$0 sm:$0xff] }
 0x3ad   :  { %7915 = vmatpush3.bf16.msra.mxu0 %v8625_v56  ;;  %7916 = vmatprep.mubr.msk.bf16.mxu0 %vm8769_vm4, %v8768_v24  ;;  %v9085_v56 = vld [vmem:[%s10388_s3 + $0x50] sm:$0xff] }
 0x3ae   :  { %7926 = vmatprep.subr.mxu0 %v421_v41 }
 0x3b4   :  { %7917 = vmatmul.mubr.msk.bf16.vlgmr.msra.gmra.mxu0 %vm399_vm3, %v519_v59 }
 0x3b5   :  { %7927 = vmatpush3.msra.mxu0 %v421_v41  ;;  %7930 = vmatprep.mubr.msk.f32.mxu0 %vm399_vm3, %v7193_v60 }
 0x3b6   :  { %7928 = vmatprep.subr.mxu0 %v410_v43 }
 0x3b7   :  { %7929 = vmatpush3.msra.mxu0 %v410_v43 }
 0x3b8   :  { %7939 = vmatprep.subr.mxu0 %v421_v41 }
 0x3bc   :  { %7931 = vmatmul.mubr.msk.f32.vlgmr.msra.gmra.mxu0 %vm399_vm3, %v7194_v61 }
 0x3bd   :  { %7940 = vmatpush3.msra.mxu0 %v421_v41  ;;  %7943 = vmatprep.mubr.msk.f32.mxu0 %vm399_vm3, %v7199_v62 }
 0x3be   :  { %7941 = vmatprep.subr.mxu0 %v410_v43 }
 0x3bf   :  { %7942 = vmatpush3.msra.mxu0 %v410_v43  ;;  %v7207_v43 = vld [vmem:[%s10389_s4 + $0x2] ss:$0 sm:$0xff] }
 0x3c0   :  { %7944 = vmatmul.mubr.msk.f32.vlgmr.msra.gmra.mxu0 %vm399_vm3, %v7200_v63  ;;  %7946 = vmatprep.subr.bf16.mxu0 %v8768_v24 }
 0x3c1   :  { %7948 = vmatprep.mubr.msk.bf16.mxu0 %vm8769_vm4, %v8768_v24  ;;  %7947 = vmatpush3.bf16.msra.mxu0 %v8627_v1 }
 0x46c   :  { %v648_v3 = vpop.f32.mrf.mxu0 }
 0x46e   :  { %v7912_v4 = vpop.f32.mrf.mxu0 }
 0x470   :  { %v651_v5 = vpop.f32.mrf.mxu0 }
 0x472   :  { %v7913_v6 = vpop.f32.mrf.mxu0 }
 0x473   :  { %v9109_v6 = vld [vmem:[%s10388_s3 + $0x58] sm:$0xff] }
 0x474   :  { %v698_v7 = vpop.f32.mrf.mxu0 }
 0x475   :  { %v699_v8 = vadd.f32 %v698_v7, %v648_v3  ;;  %v9114_v7 = vld [vmem:[%s10388_s3 + $0x70] sm:$0xff] }
 0x476   :  { %v7918_v9 = vpop.f32.mrf.mxu0 }
 0x477   :  { %v756_v22 = vadd.f32 %v9012_v50, %v699_v8  ;;  %v7211_v50 = vld [vmem:[%s10389_s4 + $0x3] ss:$0 sm:$0xff]  ;;  %v9127_v9 = vld [vmem:[%s10388_s3 + $0x78] sm:$0xff] }
 0x478   :  { %v701_v10 = vpop.f32.mrf.mxu0 }
 0x479   :  { %v702_v11 = vadd.f32 %v701_v10, %v651_v5  ;;  %v1142_v10 = vld [vmem:[%s10391_s6] sm:$0xf] }
 0x47a   :  { %v7919_v12 = vpop.f32.mrf.mxu0 }
 0x47b   :  { %v757_v29 = vadd.f32 %v9014_v54, %v702_v11  ;;  %v1297_v11 = vsel %vm1248_vm5, %v1142_v10, 0 }
 0x47c   :  { %v7932_v13 = vpop.f32.mrf.mxu0 }
 0x47e   :  { %v833_v14 = vpop.f32.mrf.mxu0 }
 0x47f   :  { %v842_v15 = vpack.c.bf16 %v7932_v13, %v833_v14  ;;  %v7218_v14 = vld [vmem:[%s10391_s6 + $0x8] sm:$0xf] }
 0x480   :  { %v7945_v16 = vpop.f32.mrf.mxu0 }
 0x481   :  { %7936 = vmatmul.mubr.msk.bf16.vlgmr.msra.gmra.mxu1 %vm399_vm3, %v842_v15 }
 0x482   :  { %v970_v17 = vpop.f32.mrf.mxu0  ;;  %7956 = vmatprep.mubr.msk.bf16.mxu1 %vm8769_vm4, %v8768_v24  ;;  %7953 = vmatpush3.bf16.msra.mxu1 %v8628_v19 }
 0x483   :  { %v979_v18 = vpack.c.bf16 %v7945_v16, %v970_v17  ;;  %7954 = vmatprep.subr.bf16.mxu1 %v8768_v24 }
 0x485   :  { %7949 = vmatmul.mubr.msk.bf16.vlgmr.msra.gmra.mxu0 %vm399_vm3, %v979_v18  ;;  %v1429_v18 = vsel %vm1248_vm5, %v7218_v14, 0 }
 0x486   :  { %7955 = vmatpush3.bf16.msra.mxu1 %v8629_v20  ;;  %7964 = vmatprep.mubr.msk.f32.mxu0 %vm399_vm3, %v9085_v56 }
 0x487   :  { %7967 = vmatprep.subr.bf16.mxu1 %v8768_v24 }
 0x541   :  { %v886_v21 = vpop.f32.mrf.mxu1 }
 0x542   :  { %v893_v25 = vadd.f32 %v886_v21, %v756_v22 }
 0x543   :  { %v7937_v23 = vpop.f32.mrf.mxu1 }
 0x545   :  { %v889_v26 = vpop.f32.mrf.mxu1  ;;  %v1023_v27 = vpop.f32.mrf.mxu0 }
 0x546   :  { %v1030_v30 = vadd.f32 %v1023_v27, %v893_v25  ;;  %v894_v33 = vadd.f32 %v889_v26, %v757_v29 }
 0x547   :  { %v7938_v31 = vpop.f32.mrf.mxu1  ;;  %v7950_v32 = vpop.f32.mrf.mxu0 }
 0x548   :  { %v1037_v34 = vadd.f32 %v7205_v28, %v1030_v30  ;;  %v7230_v31 = vld [vmem:[%s10389_s4 + $0x6] ss:$0 sm:$0xff] }
 0x549   :  { %v1026_v35 = vpop.f32.mrf.mxu0 }
 0x54a   :  { %v1039_v36 = vmax.f32 %v1037_v34, 0.0  ;;  %v1031_v37 = vadd.f32 %v1026_v35, %v894_v33 }
 0x54b   :  { %v7951_v39 = vpop.f32.mrf.mxu0 }
 0x54c   :  { %v1038_v40 = vadd.f32 %v7205_v28, %v1031_v37  ;;  %v1046_v41 = vmul.f32 %v7206_v38, %v1039_v36  ;;  %v7231_v36 = vld [vmem:[%s10389_s4 + $0x7] ss:$0 sm:$0xff] }
 0x54e   :  { %v1040_v42 = vmax.f32 %v1038_v40, 0.0  ;;  %v9063_v45 = vadd.f32 %v7207_v43, %v1046_v41  ;;  %v7232_v41 = vld [vmem:[%s10389_s4 + $0x8] ss:$0 sm:$0xff] }
 0x550   :  { %v1047_v44 = vmul.f32 %v7206_v38, %v1040_v42 }
 0x552   :  { %v9065_v46 = vadd.f32 %v7207_v43, %v1047_v44 }
 0x554   :  { %v1064_v47 = vpack.c.bf16 %v9065_v46, %v9063_v45 }
 0x556   :  { %7957 = vmatmul.mubr.msk.bf16.vlgmr.msra.gmra.mxu1 %vm85_vm1, %v1064_v47 }
 0x557   :  { %7969 = vmatprep.mubr.msk.bf16.mxu1 %vm8769_vm4, %v8768_v24  ;;  %7968 = vmatpush3.bf16.msra.mxu1 %v1250_v49 }
 0x616   :  { %v1119_v51 = vpop.f32.mrf.mxu1 }
 0x617   :  { %v1120_v52 = vadd.f32 %v7211_v50, %v1119_v51 }
 0x618   :  { %v7958_v54 = vpop.f32.mrf.mxu1 }
 0x619   :  { %v1126_v55 = vmax.f32 %v1120_v52, 0.0 }
 0x61a   :  { %v1122_v58 = vpop.f32.mrf.mxu1 }
 0x61b   :  { %v1133_v59 = vmul.f32 %v7215_v53, %v1126_v55  ;;  %v1123_v60 = vadd.f32 %v7211_v50, %v1122_v58  ;;  %v7234_v58 = vld [vmem:[%s10391_s6 + $0x10] sm:$0xf] }
 0x61c   :  { %v7959_v61 = vpop.f32.mrf.mxu1 }
 0x61d   :  { %v9092_v62 = vadd.f32 %v7216_v57, %v1133_v59  ;;  %v1127_v63 = vmax.f32 %v1123_v60, 0.0  ;;  %v1605_v60 = vsel %vm1248_vm5, %v7234_v58, 0  ;;  %v7261_v58 = vld [vmem:[%s10392_s7 + $0x38] sm:$0xf] }
 0x61f   :  { %v1134_v0 = vmul.f32 %v7215_v53, %v1127_v63  ;;  %1152 = vrot.lane.b32.xlu1 %v9092_v62, %s8770_s11  ;;  %v7233_v63 = vld [vmem:[%s10391_s6 + $0xc] sm:$0xf] }
 0x621   :  { %v9096_v1 = vadd.f32 %v7216_v57, %v1134_v0  ;;  %v1652_v0 = vsel %vm1248_vm5, %v7233_v63, 0 }
 0x623   :  { %1154 = vrot.lane.b32.xlu0 %v9096_v1, %s8770_s11  ;;  %v9102_v3 = vpack.c.bf16 %v9096_v1, %v9092_v62 }
 0x627   :  { %1242 = vrot.lane.b32.xlu0 %v9102_v3, %s8770_s11 }
 0x691   :  { %v1153_v5 = vpop.permute.xlu1 %1152 }
 0x695   :  { %v1155_v4 = vpop.permute.xlu0 %1154 }
 0x696   :  { %7960 = vmatprep.subr.mxu0 %v1155_v4  ;;  %7979 = vmatprep.subr.mxu1 %v1155_v4 }
 0x697   :  { %7961 = vmatpush3.msra.mxu0 %v1155_v4 }
 0x698   :  { %7962 = vmatprep.subr.mxu0 %v1153_v5 }
 0x699   :  { %7963 = vmatpush3.msra.mxu0 %v1153_v5  ;;  %v1243_v8 = vpop.permute.xlu0 %1242 }
 0x69a   :  { %7965 = vmatmul.mubr.msk.f32.vlgmr.msra.gmra.mxu0 %vm399_vm3, %v9109_v6  ;;  %7970 = vmatmul.mubr.msk.bf16.vlgmr.msra.gmra.mxu1 %vm1244_vm6, %v1243_v8 }
 0x69b   :  { %7980 = vmatpush3.msra.mxu1 %v1155_v4  ;;  %7983 = vmatprep.mubr.msk.f32.mxu1 %vm399_vm3, %v9114_v7 }
 0x69c   :  { %7981 = vmatprep.subr.mxu1 %v1153_v5  ;;  %7973 = vmatprep.subr.bf16.mxu0 %v8768_v24 }
 0x69d   :  { %7982 = vmatpush3.msra.mxu1 %v1153_v5  ;;  %7975 = vmatprep.mubr.msk.bf16.mxu0 %vm8769_vm4, %v8768_v24  ;;  %v7235_v5 = vld [vmem:[%s10391_s6 + $0x14] sm:$0xf] }
 0x69e   :  { %7974 = vmatpush3.bf16.msra.mxu0 %v1297_v11  ;;  %v1775_v11 = vsel %vm1248_vm5, %v7235_v5, 0 }
 0x69f   :  { %7986 = vmatprep.subr.bf16.mxu0 %v8768_v24 }
 0x6a2   :  { %7984 = vmatmul.mubr.msk.f32.vlgmr.msra.gmra.mxu1 %vm399_vm3, %v9127_v9 }
 0x6a3   :  { %7996 = vmatprep.mubr.msk.f32.mxu1 %vm399_vm3, %v9085_v56 }
 0x75a   :  { %v7966_v12 = vpop.f32.mrf.mxu0  ;;  %v1286_v13 = vpop.f32.mrf.mxu1 }
 0x75c   :  { %v1230_v15 = vpop.f32.mrf.mxu0  ;;  %v7971_v16 = vpop.f32.mrf.mxu1 }
 0x75d   :  { %v1239_v17 = vpack.c.bf16 %v7966_v12, %v1230_v15 }
 0x75e   :  { %v1289_v19 = vpop.f32.mrf.mxu1 }
 0x75f   :  { %7976 = vmatmul.mubr.msk.bf16.vlgmr.msra.gmra.mxu0 %vm1244_vm6, %v1239_v17 }
 0x760   :  { %v7972_v20 = vpop.f32.mrf.mxu1  ;;  %7987 = vmatpush3.bf16.msra.mxu0 %v1429_v18  ;;  %7988 = vmatprep.mubr.msk.bf16.mxu0 %vm8769_vm4, %v8768_v24 }
 0x761   :  { %8005 = vmatprep.subr.bf16.mxu0 %v8768_v24 }
 0x762   :  { %v7985_v21 = vpop.f32.mrf.mxu1 }
 0x764   :  { %v1415_v22 = vpop.f32.mrf.mxu1 }
 0x765   :  { %v1424_v23 = vpack.c.bf16 %v7985_v21, %v1415_v22 }
 0x767   :  { %7989 = vmatmul.mubr.msk.bf16.vlgmr.msra.gmra.mxu0 %vm1244_vm6, %v1424_v23 }
 0x768   :  { %8007 = vmatprep.mubr.msk.bf16.mxu0 %vm8769_vm4, %v8768_v24  ;;  %8006 = vmatpush3.bf16.msra.mxu0 %v1652_v0 }
 0x769   :  { %8018 = vmatprep.subr.bf16.mxu0 %v8768_v24 }
 0x81f   :  { %v1333_v25 = vpop.f32.mrf.mxu0 }
 0x820   :  { %v1334_v29 = vadd.f32 %v1333_v25, %v1286_v13  ;;  %v7243_v25 = vld [vmem:[%s10389_s4 + $0x9] ss:$0 sm:$0xff] }
 0x821   :  { %v7977_v26 = vpop.f32.mrf.mxu0 }
 0x823   :  { %v1336_v27 = vpop.f32.mrf.mxu0 }
 0x824   :  { %v1337_v34 = vadd.f32 %v1336_v27, %v1289_v19 }
 0x825   :  { %v7978_v28 = vpop.f32.mrf.mxu0 }
 0x827   :  { %v1465_v30 = vpop.f32.mrf.mxu0 }
 0x828   :  { %v1472_v32 = vadd.f32 %v1465_v30, %v1334_v29  ;;  %v7244_v30 = vld [vmem:[%s10389_s4 + $0xa] ss:$0 sm:$0xff] }
 0x829   :  { %v7990_v33 = vpop.f32.mrf.mxu0 }
 0x82a   :  { %v1479_v35 = vadd.f32 %v7230_v31, %v1472_v32 }
 0x82b   :  { %v1468_v37 = vpop.f32.mrf.mxu0 }
 0x82c   :  { %v1481_v38 = vmax.f32 %v1479_v35, 0.0  ;;  %v1473_v39 = vadd.f32 %v1468_v37, %v1337_v34  ;;  %v7245_v35 = vld [vmem:[%s10389_s4 + $0xb] ss:$0 sm:$0xff] }
 0x82d   :  { %v7991_v40 = vpop.f32.mrf.mxu0 }
 0x82e   :  { %v1488_v42 = vmul.f32 %v7231_v36, %v1481_v38  ;;  %v1480_v43 = vadd.f32 %v7230_v31, %v1473_v39 }
 0x830   :  { %v1482_v44 = vmax.f32 %v1480_v43, 0.0  ;;  %v9158_v47 = vadd.f32 %v7232_v41, %v1488_v42 }
 0x832   :  { %v1489_v48 = vmul.f32 %v7231_v36, %v1482_v44  ;;  %1499 = vrot.lane.b32.xlu0 %v9158_v47, %s8771_s25 }
 0x834   :  { %v9162_v49 = vadd.f32 %v7232_v41, %v1489_v48 }
 0x836   :  { %1501 = vrot.lane.b32.xlu1 %v9162_v49, %s8771_s25  ;;  %v2194_v50 = vpack.c.bf16 %v9162_v49, %v9158_v47  ;;  %v7248_v49 = vld [vmem:[%s10391_s6 + $0x20] sm:$0xf] }
 0x8a4   :  { %v1500_v51 = vpop.permute.xlu0 %1499 }
 0x8a5   :  { %v1505_v52 = vadd.f32 %v1500_v51, %v9092_v62 }
 0x8a7   :  { %1515 = vrot.lane.b32.xlu0 %v1505_v52, %s8772_s27 }
 0x8a8   :  { %v1502_v53 = vpop.permute.xlu1 %1501 }
 0x8a9   :  { %v1506_v54 = vadd.f32 %v1502_v53, %v9096_v1 }
 0x8ab   :  { %1517 = vrot.lane.b32.xlu1 %v1506_v54, %s8772_s27  ;;  %v1597_v55 = vpack.c.bf16 %v1506_v54, %v1505_v52  ;;  %v7247_v54 = vld [vmem:[%s10391_s6 + $0x1c] sm:$0xf] }
 0x8af   :  { %1599 = vrot.lane.b32.xlu1 %v1597_v55, %s8772_s27 }
 0x919   :  { %v1516_v59 = vpop.permute.xlu0 %1515 }
 0x91d   :  { %v1518_v57 = vpop.permute.xlu1 %1517 }
 0x91e   :  { %7992 = vmatprep.subr.mxu1 %v1518_v57 }
 0x91f   :  { %7993 = vmatpush3.msra.mxu1 %v1518_v57 }
 0x920   :  { %7994 = vmatprep.subr.mxu1 %v1516_v59 }
 0x921   :  { %7995 = vmatpush3.msra.mxu1 %v1516_v59  ;;  %v1600_v61 = vpop.permute.xlu1 %1599 }
 0x922   :  { %7997 = vmatmul.mubr.msk.f32.vlgmr.msra.gmra.mxu1 %vm399_vm3, %v9109_v6  ;;  %7999 = vmatprep.subr.bf16.mxu1 %v8768_v24 }
 0x923   :  { %8000 = vmatpush3.bf16.msra.mxu1 %v1605_v60  ;;  %8001 = vmatprep.mubr.msk.bf16.mxu1 %vm8769_vm4, %v8768_v24 }
 0x924   :  { %8011 = vmatprep.subr.mxu1 %v1518_v57 }
 0x926   :  { %8002 = vmatmul.mubr.msk.bf16.vlgmr.msra.gmra.mxu1 %vm1244_vm6, %v1600_v61  ;;  %v2121_v61 = vsel %vm1248_vm5, %v7248_v49, 0 }
 0x927   :  { %8012 = vmatpush3.msra.mxu1 %v1518_v57  ;;  %8015 = vmatprep.mubr.msk.f32.mxu1 %vm399_vm3, %v9114_v7 }
 0x928   :  { %8013 = vmatprep.subr.mxu1 %v1516_v59 }
 0x929   :  { %8014 = vmatpush3.msra.mxu1 %v1516_v59 }
 0x92e   :  { %8016 = vmatmul.mubr.msk.f32.vlgmr.msra.gmra.mxu1 %vm399_vm3, %v9127_v9 }
 0x92f   :  { %8028 = vmatprep.mubr.msk.f32.mxu1 %vm399_vm3, %v9085_v56 }
 0x9e2   :  { %v7998_v4 = vpop.f32.mrf.mxu1 }
 0x9e4   :  { %v1587_v8 = vpop.f32.mrf.mxu1 }
 0x9e5   :  { %v1596_v10 = vpack.c.bf16 %v7998_v4, %v1587_v8 }
 0x9e6   :  { %v1641_v12 = vpop.f32.mrf.mxu1 }
 0x9e7   :  { %8008 = vmatmul.mubr.msk.bf16.vlgmr.msra.gmra.mxu0 %vm1244_vm6, %v1596_v10  ;;  %v7259_v10 = vld [vmem:[%s10392_s7 + $0x30] sm:$0xf] }
 0x9e8   :  { %v8003_v56 = vpop.f32.mrf.mxu1  ;;  %8019 = vmatpush3.bf16.msra.mxu0 %v1775_v11  ;;  %8020 = vmatprep.mubr.msk.bf16.mxu0 %vm8769_vm4, %v8768_v24 }
 0x9e9   :  { %8037 = vmatprep.subr.bf16.mxu0 %v8768_v24  ;;  %v2246_v56 = vsel %vm1248_vm5, %v7259_v10, 0 }
 0x9ea   :  { %v1644_v13 = vpop.f32.mrf.mxu1 }
 0x9ec   :  { %v8004_v14 = vpop.f32.mrf.mxu1 }
 0x9ee   :  { %v8017_v15 = vpop.f32.mrf.mxu1 }
 0x9f0   :  { %v1761_v16 = vpop.f32.mrf.mxu1 }
 0x9f1   :  { %v1770_v17 = vpack.c.bf16 %v8017_v15, %v1761_v16 }
 0x9f3   :  { %8021 = vmatmul.mubr.msk.bf16.vlgmr.msra.gmra.mxu0 %vm1244_vm6, %v1770_v17 }
 0x9f4   :  { %8039 = vmatprep.mubr.msk.bf16.mxu0 %vm8769_vm4, %v8768_v24 }
 0xaa7   :  { %v1688_v18 = vpop.f32.mrf.mxu0 }
 0xaa8   :  { %v1689_v22 = vadd.f32 %v1688_v18, %v1641_v12 }
 0xaa9   :  { %v8009_v19 = vpop.f32.mrf.mxu0 }
 0xaab   :  { %v1691_v20 = vpop.f32.mrf.mxu0 }
 0xaac   :  { %v1692_v28 = vadd.f32 %v1691_v20, %v1644_v13 }
 0xaad   :  { %v8010_v21 = vpop.f32.mrf.mxu0 }
 0xaae   :  { %v7262_v21 = vld [vmem:[%s10392_s7 + $0x3c] sm:$0xf] }
 0xab3   :  { %v1811_v23 = vpop.f32.mrf.mxu0 }
 0xab4   :  { %v1818_v26 = vadd.f32 %v1811_v23, %v1689_v22  ;;  %v2344_v22 = vsel %vm1248_vm5, %v7262_v21, 0 }
 0xab5   :  { %v8022_v27 = vpop.f32.mrf.mxu0 }
 0xab6   :  { %v1825_v29 = vadd.f32 %v7243_v25, %v1818_v26 }
 0xab7   :  { %v1814_v31 = vpop.f32.mrf.mxu0 }
 0xab8   :  { %v1827_v32 = vmax.f32 %v1825_v29, 0.0  ;;  %v1819_v33 = vadd.f32 %v1814_v31, %v1692_v28  ;;  %v7256_v29 = vld [vmem:[%s10389_s4 + $0xc] ss:$0 sm:$0xff] }
 0xab9   :  { %v8023_v34 = vpop.f32.mrf.mxu0 }
 0xaba   :  { %v1834_v36 = vmul.f32 %v7244_v30, %v1827_v32  ;;  %v1826_v37 = vadd.f32 %v7243_v25, %v1819_v33 }
 0xabc   :  { %v1828_v38 = vmax.f32 %v1826_v37, 0.0  ;;  %v1841_v39 = vadd.f32 %v7245_v35, %v1834_v36  ;;  %v7257_v37 = vld [vmem:[%s10389_s4 + $0xd] ss:$0 sm:$0xff] }
 0xabe   :  { %v1835_v40 = vmul.f32 %v7244_v30, %v1828_v38  ;;  %1845 = vrot.lane.b32.xlu1 %v1841_v39, %s8773_s19 }
 0xac0   :  { %v1842_v41 = vadd.f32 %v7245_v35, %v1835_v40 }
 0xac2   :  { %1847 = vrot.lane.b32.xlu0 %v1842_v41, %s8773_s19  ;;  %v2289_v42 = vpack.c.bf16 %v1842_v41, %v1841_v39 }
 0xb30   :  { %v1846_v43 = vpop.permute.xlu1 %1845 }
 0xb31   :  { %v1851_v44 = vadd.f32 %v1846_v43, %v9092_v62  ;;  %v1951_v62 = vsel %vm1248_vm5, %v7247_v54, 0  ;;  %v7258_v43 = vld [vmem:[%s10389_s4 + $0xe] ss:$0 sm:$0xff] }
 0xb33   :  { %1861 = vrot.lane.b32.xlu1 %v1851_v44, %s8774_s26 }
 0xb34   :  { %v1848_v48 = vpop.permute.xlu0 %1847 }
 0xb35   :  { %v1852_v51 = vadd.f32 %v1848_v48, %v9096_v1 }
 0xb37   :  { %1863 = vrot.lane.b32.xlu0 %v1852_v51, %s8774_s26  ;;  %v1943_v52 = vpack.c.bf16 %v1852_v51, %v1851_v44 }
 0xb3b   :  { %1945 = vrot.lane.b32.xlu0 %v1943_v52, %s8774_s26 }
 0xba5   :  { %v1862_v55 = vpop.permute.xlu1 %1861 }
 0xba9   :  { %v1864_v53 = vpop.permute.xlu0 %1863 }
 0xbaa   :  { %8024 = vmatprep.subr.mxu1 %v1864_v53 }
 0xbab   :  { %8025 = vmatpush3.msra.mxu1 %v1864_v53 }
 0xbac   :  { %8026 = vmatprep.subr.mxu1 %v1862_v55 }
 0xbad   :  { %8027 = vmatpush3.msra.mxu1 %v1862_v55  ;;  %v1946_v1 = vpop.permute.xlu0 %1945 }
 0xbae   :  { %8029 = vmatmul.mubr.msk.f32.vlgmr.msra.gmra.mxu1 %vm399_vm3, %v9109_v6  ;;  %8031 = vmatprep.subr.bf16.mxu1 %v8768_v24  ;;  %v7260_v6 = vld [vmem:[%s10392_s7 + $0x34] sm:$0xf] }
 0xbaf   :  { %8032 = vmatpush3.bf16.msra.mxu1 %v1951_v62  ;;  %8033 = vmatprep.mubr.msk.bf16.mxu1 %vm8769_vm4, %v8768_v24  ;;  %v2199_v57 = vsel %vm1248_vm5, %v7260_v6, 0  ;;  %v8630_v62 = vld [vmem:[%s10392_s7 + $0x68] sm:$0xff]  }
 0xbb0   :  { %8043 = vmatprep.subr.mxu1 %v1864_v53 }
 0xbb2   :  { %8034 = vmatmul.mubr.msk.bf16.vlgmr.msra.gmra.mxu1 %vm1244_vm6, %v1946_v1 }
 0xbb3   :  { %8044 = vmatpush3.msra.mxu1 %v1864_v53  ;;  %8047 = vmatprep.mubr.msk.f32.mxu1 %vm399_vm3, %v9114_v7  ;;  %v2294_v7 = vsel %vm1248_vm5, %v7261_v58, 0 }
 0xbb4   :  { %8045 = vmatprep.subr.mxu1 %v1862_v55 }
 0xbb5   :  { %8046 = vmatpush3.msra.mxu1 %v1862_v55 }
 0xbb6   :  { %8056 = vmatprep.subr.bf16.mxu1 %v8768_v24 }
 0xbba   :  { %8048 = vmatmul.mubr.msk.f32.vlgmr.msra.gmra.mxu1 %vm399_vm3, %v9127_v9  ;;  %v7246_v9 = vld [vmem:[%s10391_s6 + $0x18] sm:$0xf] }
 0xbbb   :  { %8057 = vmatpush3.bf16.msra.mxu1 %v2199_v57  ;;  %8058 = vmatprep.mubr.msk.bf16.mxu1 %vm8769_vm4, %v8768_v24  ;;  %v1998_v59 = vsel %vm1248_vm5, %v7246_v9, 0 }
 0xbbc   :  { %8068 = vmatprep.subr.bf16.mxu1 %v8768_v24  ;;  %8038 = vmatpush3.bf16.msra.mxu0 %v1998_v59 }
 0xbbd   :  { %8050 = vmatprep.subr.bf16.mxu0 %v8768_v24 }
 0xbbe   :  { %8059 = vmatmul.mubr.msk.bf16.vlgmr.msra.gmra.mxu1 %vm1244_vm6, %v2194_v50 }
 0xbbf   :  { %8069 = vmatpush3.bf16.msra.mxu1 %v2294_v7  ;;  %8070 = vmatprep.mubr.msk.bf16.mxu1 %vm8769_vm4, %v8768_v24  ;;  %v7267_v7 = vld [vmem:[%s10389_s4 + $0xf] ss:$0 sm:$0xff] }
 0xbc0   :  { %8080 = vmatprep.subr.mxu1 %v8768_v24 }
 0xbc6   :  { %8071 = vmatmul.mubr.msk.bf16.vlgmr.msra.gmra.mxu1 %vm1244_vm6, %v2289_v42 }
 0xbc7   :  { %8084 = vmatprep.mubr.msk.f32.mxu1 %vm8769_vm4, %v8768_v24 }
 0xc6e   :  { %v8030_v47 = vpop.f32.mrf.mxu1 }
 0xc70   :  { %v1933_v50 = vpop.f32.mrf.mxu1 }
 0xc71   :  { %v1942_v60 = vpack.c.bf16 %v8030_v47, %v1933_v50 }
 0xc72   :  { %v1987_v63 = vpop.f32.mrf.mxu1 }
 0xc73   :  { %8040 = vmatmul.mubr.msk.bf16.vlgmr.msra.gmra.mxu0 %vm1244_vm6, %v1942_v60 }
 0xc74   :  { %v8035_v0 = vpop.f32.mrf.mxu1  ;;  %8051 = vmatpush3.bf16.msra.mxu0 %v2121_v61  ;;  %8052 = vmatprep.mubr.msk.bf16.mxu0 %vm8769_vm4, %v8768_v24 }
 0xc75   :  { %8062 = vmatprep.subr.bf16.mxu0 %v8768_v24 }
 0xc76   :  { %v1990_v4 = vpop.f32.mrf.mxu1 }
 0xc78   :  { %v8036_v5 = vpop.f32.mrf.mxu1 }
 0xc7a   :  { %v8049_v8 = vpop.f32.mrf.mxu1 }
 0xc7c   :  { %v2107_v11 = vpop.f32.mrf.mxu1 }
 0xc7d   :  { %v2116_v12 = vpack.c.bf16 %v8049_v8, %v2107_v11  ;;  %v7269_v11 = vld [vmem:[%s10389_s4 + $0x11] ss:$0 sm:$0xff] }
 0xc7e   :  { %v2235_v13 = vpop.f32.mrf.mxu1 }
 0xc7f   :  { %8053 = vmatmul.mubr.msk.bf16.vlgmr.msra.gmra.mxu0 %vm1244_vm6, %v2116_v12 }
 0xc80   :  { %v8060_v14 = vpop.f32.mrf.mxu1  ;;  %8063 = vmatpush3.bf16.msra.mxu0 %v2246_v56  ;;  %8064 = vmatprep.mubr.msk.bf16.mxu0 %vm8769_vm4, %v8768_v24 }
 0xc81   :  { %8074 = vmatprep.subr.bf16.mxu0 %v8768_v24  ;;  %v8631_v14 = vld [vmem:[%s10392_s7 + $0x60] sm:$0xff]  }
 0xc82   :  { %v2238_v15 = vpop.f32.mrf.mxu1 }
 0xc84   :  { %v8061_v16 = vpop.f32.mrf.mxu1 }
 0xc86   :  { %v2330_v17 = vpop.f32.mrf.mxu1 }
 0xc87   :  { %8065 = vmatmul.mubr.msk.bf16.vlgmr.msra.gmra.mxu0 %vm1244_vm6, %v9102_v3 }
 0xc88   :  { %v8072_v18 = vpop.f32.mrf.mxu1  ;;  %8076 = vmatprep.mubr.msk.bf16.mxu0 %vm8769_vm4, %v8768_v24  ;;  %8075 = vmatpush3.bf16.msra.mxu0 %v2344_v22 }
 0xc89   :  { %8087 = vmatprep.subr.bf16.mxu0 %v8768_v24  ;;  %v8632_v18 = vld [vmem:[%s10392_s7 + $0x90] sm:$0xff]  }
 0xc8a   :  { %v2333_v19 = vpop.f32.mrf.mxu1 }
 0xc8c   :  { %v8073_v20 = vpop.f32.mrf.mxu1 }
 0xd33   :  { %v2034_v23 = vpop.f32.mrf.mxu0 }
 0xd34   :  { %v2035_v3 = vadd.f32 %v2034_v23, %v1987_v63 }
 0xd35   :  { %v8041_v25 = vpop.f32.mrf.mxu0 }
 0xd37   :  { %v2037_v26 = vpop.f32.mrf.mxu0 }
 0xd38   :  { %v2038_v32 = vadd.f32 %v2037_v26, %v1990_v4  ;;  %v7268_v4 = vld [vmem:[%s10389_s4 + $0x10] ss:$0 sm:$0xff] }
 0xd39   :  { %v8042_v27 = vpop.f32.mrf.mxu0 }
 0xd3f   :  { %v2157_v28 = vpop.f32.mrf.mxu0 }
 0xd40   :  { %v2164_v30 = vadd.f32 %v2157_v28, %v2035_v3  ;;  %v9340_v3 = vld [vmem:[%s10388_s3 + $0xf0] sm:$0xff] }
 0xd41   :  { %v8054_v31 = vpop.f32.mrf.mxu0  ;;  %v7281_v28 = vld [vmem:[%s10389_s4 + $0x13] ss:$0 sm:$0xff] }
 0xd42   :  { %v2171_v33 = vadd.f32 %v7256_v29, %v2164_v30 }
 0xd43   :  { %v2160_v34 = vpop.f32.mrf.mxu0 }
 0xd44   :  { %v2173_v35 = vmax.f32 %v2171_v33, 0.0  ;;  %v2165_v36 = vadd.f32 %v2160_v34, %v2038_v32 }
 0xd45   :  { %v8055_v38 = vpop.f32.mrf.mxu0 }
 0xd46   :  { %v2172_v39 = vadd.f32 %v7256_v29, %v2165_v36  ;;  %v2180_v41 = vmul.f32 %v7257_v37, %v2173_v35  ;;  %v9350_v38 = vld [vmem:[%s10388_s3 + $0xf8] sm:$0xff] }
 0xd47   :  { %v2282_v40 = vpop.f32.mrf.mxu0 }
 0xd48   :  { %v2174_v42 = vmax.f32 %v2172_v39, 0.0  ;;  %v2187_v52 = vadd.f32 %v7258_v43, %v2180_v41  ;;  %v2283_v1 = vadd.f32 %v2282_v40, %v2235_v13  ;;  %v9315_v13 = vld [vmem:[%s10388_s3 + $0xe0] sm:$0xff]  ;;  %v8633_v39 = vld [vmem:[%s10392_s7 + $0x18] sm:$0xff]   ;;  %v8634_v40 = vld [vmem:[%s10392_s7 + $0x10] sm:$0xff]  }
 0xd49   :  { %v8066_v44 = vpop.f32.mrf.mxu0 }
 0xd4a   :  { %v2181_v48 = vmul.f32 %v7257_v37, %v2174_v42  ;;  %v2337_v57 = vadd.f32 %v2330_v17, %v2283_v1  ;;  %v9387_v1 = vld [vmem:[%s10388_s3 + $0x80] sm:$0xff] }
 0xd4b   :  { %v2285_v51 = vpop.f32.mrf.mxu0 }
 0xd4c   :  { %v2188_v53 = vadd.f32 %v7258_v43, %v2181_v48  ;;  %v2286_v6 = vadd.f32 %v2285_v51, %v2238_v15 }
 0xd4d   :  { %v8067_v54 = vpop.f32.mrf.mxu0 }
 0xd4e   :  { %v2339_v55 = vpack.c.bf16 %v2188_v53, %v2187_v52  ;;  %v2338_v49 = vadd.f32 %v2333_v19, %v2286_v6  ;;  %v7275_v19 = vld [vmem:[%s10389_s4 + $0x12] ss:$0 sm:$0xff]  ;;  %v7292_v53 = vld [vmem:[%s10389_s4 + $0x14] ss:$0 sm:$0xff]  ;;  %v7297_v6 = vld [vmem:[%s10389_s4 + $0x16] ss:$0 sm:$0xff] }
 0xd50   :  { %8077 = vmatmul.mubr.msk.bf16.vlgmr.msra.gmra.mxu0 %vm1244_vm6, %v2339_v55 }
 0xd51   :  { %8091 = vmatprep.mubr.msk.bf16.mxu0 %vm8769_vm4, %v8768_v24  ;;  %8088 = vmatpush3.bf16.msra.mxu0 %v8630_v62 }
 0xd52   :  { %8089 = vmatprep.subr.bf16.mxu0 %v8768_v24 }
 0xd55   :  { %8090 = vmatpush3.bf16.msra.mxu0 %v8631_v14 }
 0xd56   :  { %8106 = vmatprep.subr.bf16.mxu0 %v8768_v24 }
 0xe10   :  { %v2380_v58 = vpop.f32.mrf.mxu0 }
 0xe11   :  { %v2387_v9 = vadd.f32 %v2380_v58, %v2337_v57 }
 0xe12   :  { %v8078_v59 = vpop.f32.mrf.mxu0 }
 0xe13   :  { %v2394_v47 = vadd.f32 %v7267_v7, %v2387_v9 }
 0xe14   :  { %v2383_v50 = vpop.f32.mrf.mxu0 }
 0xe15   :  { %v2388_v60 = vadd.f32 %v2383_v50, %v2338_v49  ;;  %v2396_v63 = vmax.f32 %v2394_v47, 0.0 }
 0xe16   :  { %v8079_v61 = vpop.f32.mrf.mxu0 }
 0xe17   :  { %v2395_v0 = vadd.f32 %v7267_v7, %v2388_v60  ;;  %v2403_v8 = vmul.f32 %v7268_v4, %v2396_v63  ;;  %v7299_v63 = vld [vmem:[%s10391_s6 + $0x28] sm:$0xf] }
 0xe19   :  { %v2397_v5 = vmax.f32 %v2395_v0, 0.0  ;;  %v2410_v56 = vadd.f32 %v7269_v11, %v2403_v8  ;;  %v9425_v8 = vld [vmem:[%s10388_s3 + $0xa0] sm:$0xff] }
 0xe1b   :  { %v2404_v10 = vmul.f32 %v7268_v4, %v2397_v5  ;;  %v9414_v4 = vld [vmem:[%s10388_s3 + $0x88] sm:$0xff]  ;;  %v2896_v5 = vsel %vm1248_vm5, %v7299_v63, 0 }
 0xe1d   :  { %v2411_v12 = vadd.f32 %v7269_v11, %v2404_v10  ;;  %v9433_v11 = vld [vmem:[%s10388_s3 + $0xa8] sm:$0xff] }
 0xe1f   :  { %8081 = vmatpush3.msra.mxu1 %v2411_v12 }
 0xe20   :  { %8082 = vmatprep.subr.mxu1 %v8768_v24 }
 0xe21   :  { %8083 = vmatpush3.msra.mxu1 %v2410_v56 }
 0xe22   :  { %8085 = vmatmul.mubr.msk.f32.vlgmr.msra.gmra.mxu1 %vm399_vm3, %v9315_v13  ;;  %8095 = vmatprep.subr.bf16.mxu1 %v8768_v24 }
 0xe23   :  { %8097 = vmatprep.mubr.msk.bf16.mxu1 %vm8769_vm4, %v8768_v24  ;;  %8096 = vmatpush3.bf16.msra.mxu1 %v8632_v18 }
 0xee2   :  { %v2481_v15 = vpop.f32.mrf.mxu1 }
 0xee3   :  { %v2490_v16 = vpack.c.bf16 %v2481_v15, %v2481_v15  ;;  %v7300_v15 = vld [vmem:[%s10391_s6 + $0x2c] sm:$0xf] }
 0xee4   :  { %v8086_v17 = vpop.f32.mrf.mxu1  ;;  %v3075_v18 = vsel %vm1248_vm5, %v7300_v15, 0 }
 0xee5   :  { %8092 = vmatmul.mubr.msk.bf16.vlgmr.msra.gmra.mxu0 %vm85_vm1, %v2490_v16 }
 0xee6   :  { %8110 = vmatprep.mubr.msk.bf16.mxu0 %vm8769_vm4, %v8768_v24  ;;  %8107 = vmatpush3.bf16.msra.mxu0 %v8633_v39  ;;  %v7313_v39 = vld [vmem:[%s10389_s4 + $0x18] ss:$0 sm:$0xff] }
 0xee7   :  { %8108 = vmatprep.subr.bf16.mxu0 %v8768_v24 }
 0xeea   :  { %8109 = vmatpush3.bf16.msra.mxu0 %v8634_v40 }
 0xeeb   :  { %8127 = vmatprep.subr.bf16.mxu0 %v8768_v24 }
 0xfa5   :  { %v2545_v20 = vpop.f32.mrf.mxu0 }
 0xfa6   :  { %v2546_v21 = vadd.f32 %v7275_v19, %v2545_v20 }
 0xfa7   :  { %v8093_v22 = vpop.f32.mrf.mxu0 }
 0xfa8   :  { %v2551_v23 = vmax.f32 %v2546_v21, 0.0 }
 0xfa9   :  { %v2548_v25 = vpop.f32.mrf.mxu0 }
 0xfaa   :  { %v2555_v26 = vpack.c.bf16 %v2551_v23, %v2551_v23 }
 0xfab   :  { %v8094_v27 = vpop.f32.mrf.mxu0 }
 0xfac   :  { %8098 = vmatmul.mubr.msk.bf16.vlgmr.msra.gmra.mxu1 %vm399_vm3, %v2555_v26 }
 0xfad   :  { %8103 = vmatprep.mubr.msk.f32.mxu1 %vm2616_vm7, %v9340_v3 }
0x106c   :  { %v2604_v29 = vpop.f32.mrf.mxu1 }
0x106d   :  { %v2605_v30 = vadd.f32 %v7281_v28, %v2604_v29 }
0x106e   :  { %v8099_v31 = vpop.f32.mrf.mxu1 }
0x106f   :  { %v7284_v32 = vmul.f32 -1.442695, %v2605_v30 }
0x1070   :  { %v2607_v33 = vpop.f32.mrf.mxu1 }
0x1071   :  { %8684 = vpow2.f32 %v7284_v32  ;;  %v7312_v33 = vld [vmem:[%s10389_s4 + $0x17] ss:$0 sm:$0xff] }
0x1072   :  { %v8100_v34 = vpop.f32.mrf.mxu1 }
0x107e   :  { %v8685_v35 = vpop.eup %8684 }
0x107f   :  { %v2613_v36 = vadd.f32 1.0, %v8685_v35 }
0x1081   :  { %8686 = vrcp.f32 %v2613_v36 }
0x108e   :  { %v8687_v37 = vpop.eup %8686 }
0x108f   :  { %8101 = vmatprep.subr.msk.mxu1 %vm2623_vm8, %v8687_v37 }
0x1090   :  { %8102 = vmatpush3.msk.msra.mxu1 %vm2623_vm8, %v8687_v37 }
0x1091   :  { %8104 = vmatmul.mubr.msk.f32.vlgmr.msra.gmra.mxu1 %vm2616_vm7, %v9350_v38 }
0x1092   :  { %8118 = vmatprep.mubr.msk.f32.mxu1 %vm399_vm3, %v9387_v1 }
0x1151   :  { %v8105_v41 = vpop.f32.mrf.mxu1 }
0x1152   :  { %v2703_v42 = vmul.f32 %v8105_v41, %v2411_v12  ;;  %v7298_v12 = vld [vmem:[%s10391_s6 + $0x24] sm:$0xf] }
0x1153   :  { %v2693_v43 = vpop.f32.mrf.mxu1 }
0x1154   :  { %v2702_v44 = vmul.f32 %v2693_v43, %v2410_v56  ;;  %v9365_v48 = vadd.f32 %v2703_v42, %v9065_v46  ;;  %v2943_v56 = vsel %vm1248_vm5, %v7298_v12, 0 }
0x1156   :  { %v9368_v51 = vadd.f32 %v2702_v44, %v9063_v45  ;;  %v7296_v45 = vld [vmem:[%s10389_s4 + $0x15] ss:$0 sm:$0xff]  ;;  %v7314_v44 = vld [vmem:[%s10389_s4 + $0x19] ss:$0 sm:$0xff] }
0x1158   :  { %v9372_v52 = vpack.c.bf16 %v9365_v48, %v9368_v51 }
0x115a   :  { %8111 = vmatmul.mubr.msk.bf16.vlgmr.msra.gmra.mxu0 %vm85_vm1, %v9372_v52 }
0x115b   :  { %8129 = vmatprep.mubr.msk.bf16.mxu0 %vm8769_vm4, %v8768_v24  ;;  %8128 = vmatpush3.bf16.msra.mxu0 %v2943_v56 }
0x115c   :  { %8140 = vmatprep.subr.bf16.mxu0 %v8768_v24 }
0x121a   :  { %v2766_v54 = vpop.f32.mrf.mxu0 }
0x121b   :  { %v2767_v46 = vadd.f32 %v7292_v53, %v2766_v54 }
0x121c   :  { %v8112_v55 = vpop.f32.mrf.mxu0 }
0x121d   :  { %v2773_v62 = vmax.f32 %v2767_v46, 0.0 }
0x121e   :  { %v2769_v57 = vpop.f32.mrf.mxu0 }
0x121f   :  { %v2780_v58 = vmul.f32 %v7296_v45, %v2773_v62  ;;  %v2770_v7 = vadd.f32 %v7292_v53, %v2769_v57 }
0x1220   :  { %v8113_v9 = vpop.f32.mrf.mxu0 }
0x1221   :  { %v9394_v59 = vadd.f32 %v7297_v6, %v2780_v58  ;;  %v2774_v47 = vmax.f32 %v2770_v7, 0.0 }
0x1223   :  { %v2781_v49 = vmul.f32 %v7296_v45, %v2774_v47  ;;  %2800 = vrot.lane.b32.xlu0 %v9394_v59, %s8770_s11 }
0x1225   :  { %v9398_v50 = vadd.f32 %v7297_v6, %v2781_v49 }
0x1227   :  { %2802 = vrot.lane.b32.xlu1 %v9398_v50, %s8770_s11  ;;  %v9404_v60 = vpack.c.bf16 %v9398_v50, %v9394_v59 }
0x122b   :  { %2890 = vrot.lane.b32.xlu1 %v9404_v60, %s8770_s11 }
0x1295   :  { %v2801_v0 = vpop.permute.xlu0 %2800 }
0x1299   :  { %v2803_v61 = vpop.permute.xlu1 %2802 }
0x129a   :  { %8114 = vmatprep.subr.mxu1 %v2803_v61 }
0x129b   :  { %8115 = vmatpush3.msra.mxu1 %v2803_v61 }
0x129c   :  { %8116 = vmatprep.subr.mxu1 %v2801_v0 }
0x129d   :  { %8117 = vmatpush3.msra.mxu1 %v2801_v0  ;;  %v2891_v10 = vpop.permute.xlu1 %2890 }
0x129e   :  { %8119 = vmatmul.mubr.msk.f32.vlgmr.msra.gmra.mxu1 %vm399_vm3, %v9414_v4  ;;  %8121 = vmatprep.subr.bf16.mxu1 %v8768_v24 }
0x129f   :  { %8122 = vmatpush3.bf16.msra.mxu1 %v2896_v5  ;;  %8123 = vmatprep.mubr.msk.bf16.mxu1 %vm8769_vm4, %v8768_v24 }
0x12a0   :  { %8133 = vmatprep.subr.mxu1 %v2803_v61 }
0x12a2   :  { %8124 = vmatmul.mubr.msk.bf16.vlgmr.msra.gmra.mxu1 %vm1244_vm6, %v2891_v10  ;;  %v7315_v10 = vld [vmem:[%s10391_s6 + $0x30] sm:$0xf] }
0x12a3   :  { %8134 = vmatpush3.msra.mxu1 %v2803_v61  ;;  %8137 = vmatprep.mubr.msk.f32.mxu1 %vm399_vm3, %v9425_v8  ;;  %v7316_v61 = vld [vmem:[%s10391_s6 + $0x34] sm:$0xf]  ;;  %v3298_v12 = vsel %vm1248_vm5, %v7315_v10, 0  ;;  %v7343_v10 = vld [vmem:[%s10392_s7 + $0x48] sm:$0xf] }
0x12a4   :  { %8135 = vmatprep.subr.mxu1 %v2801_v0 }
0x12a5   :  { %8136 = vmatpush3.msra.mxu1 %v2801_v0  ;;  %v3251_v0 = vsel %vm1248_vm5, %v7316_v61, 0 }
0x12aa   :  { %8138 = vmatmul.mubr.msk.f32.vlgmr.msra.gmra.mxu1 %vm399_vm3, %v9433_v11 }
0x12ab   :  { %8150 = vmatprep.mubr.msk.f32.mxu1 %vm399_vm3, %v9387_v1 }
0x135e   :  { %v8120_v14 = vpop.f32.mrf.mxu1 }
0x1360   :  { %v2878_v16 = vpop.f32.mrf.mxu1 }
0x1361   :  { %v2887_v17 = vpack.c.bf16 %v8120_v14, %v2878_v16  ;;  %v7317_v14 = vld [vmem:[%s10391_s6 + $0x38] sm:$0xf] }
0x1362   :  { %v2932_v19 = vpop.f32.mrf.mxu1 }
0x1363   :  { %8130 = vmatmul.mubr.msk.bf16.vlgmr.msra.gmra.mxu0 %vm1244_vm6, %v2887_v17  ;;  %v3421_v17 = vsel %vm1248_vm5, %v7317_v14, 0 }
0x1364   :  { %v8125_v20 = vpop.f32.mrf.mxu1  ;;  %8141 = vmatpush3.bf16.msra.mxu0 %v3075_v18  ;;  %8142 = vmatprep.mubr.msk.bf16.mxu0 %vm8769_vm4, %v8768_v24 }
0x1365   :  { %8159 = vmatprep.subr.bf16.mxu0 %v8768_v24 }
0x1366   :  { %v2935_v21 = vpop.f32.mrf.mxu1 }
0x1368   :  { %v8126_v22 = vpop.f32.mrf.mxu1 }
0x136a   :  { %v8139_v23 = vpop.f32.mrf.mxu1 }
0x136c   :  { %v3061_v25 = vpop.f32.mrf.mxu1 }
0x136d   :  { %v3070_v26 = vpack.c.bf16 %v8139_v23, %v3061_v25 }
0x136f   :  { %8143 = vmatmul.mubr.msk.bf16.vlgmr.msra.gmra.mxu0 %vm1244_vm6, %v3070_v26 }
0x1370   :  { %8161 = vmatprep.mubr.msk.bf16.mxu0 %vm8769_vm4, %v8768_v24  ;;  %8160 = vmatpush3.bf16.msra.mxu0 %v3298_v12 }
0x1371   :  { %8172 = vmatprep.subr.bf16.mxu0 %v8768_v24 }
0x1423   :  { %v2979_v27 = vpop.f32.mrf.mxu0 }
0x1424   :  { %v2980_v31 = vadd.f32 %v2979_v27, %v2932_v19 }
0x1425   :  { %v8131_v28 = vpop.f32.mrf.mxu0 }
0x1427   :  { %v2982_v29 = vpop.f32.mrf.mxu0 }
0x1428   :  { %v2983_v36 = vadd.f32 %v2982_v29, %v2935_v21 }
0x1429   :  { %v8132_v30 = vpop.f32.mrf.mxu0 }
0x142f   :  { %v3111_v32 = vpop.f32.mrf.mxu0 }
0x1430   :  { %v3118_v34 = vadd.f32 %v3111_v32, %v2980_v31  ;;  %v7325_v31 = vld [vmem:[%s10389_s4 + $0x1a] ss:$0 sm:$0xff] }
0x1431   :  { %v8144_v35 = vpop.f32.mrf.mxu0 }
0x1432   :  { %v3125_v37 = vadd.f32 %v7312_v33, %v3118_v34 }
0x1433   :  { %v3114_v40 = vpop.f32.mrf.mxu0 }
0x1434   :  { %v3127_v41 = vmax.f32 %v3125_v37, 0.0  ;;  %v3119_v42 = vadd.f32 %v3114_v40, %v2983_v36  ;;  %v7326_v36 = vld [vmem:[%s10389_s4 + $0x1b] ss:$0 sm:$0xff] }
0x1435   :  { %v8145_v43 = vpop.f32.mrf.mxu0 }
0x1436   :  { %v3134_v53 = vmul.f32 %v7313_v39, %v3127_v41  ;;  %v3126_v54 = vadd.f32 %v7312_v33, %v3119_v42  ;;  %v7327_v42 = vld [vmem:[%s10389_s4 + $0x1c] ss:$0 sm:$0xff] }
0x1438   :  { %v3128_v46 = vmax.f32 %v3126_v54, 0.0  ;;  %v9464_v45 = vadd.f32 %v7314_v44, %v3134_v53 }
0x143a   :  { %v3135_v55 = vmul.f32 %v7313_v39, %v3128_v46  ;;  %3145 = vrot.lane.b32.xlu1 %v9464_v45, %s8771_s25 }
0x143c   :  { %v9468_v62 = vadd.f32 %v7314_v44, %v3135_v55 }
0x143e   :  { %3147 = vrot.lane.b32.xlu0 %v9468_v62, %s8771_s25  ;;  %v3840_v6 = vpack.c.bf16 %v9468_v62, %v9464_v45  ;;  %v7330_v62 = vld [vmem:[%s10391_s6 + $0x44] sm:$0xf] }
0x143f   :  { %v3767_v14 = vsel %vm1248_vm5, %v7330_v62, 0  ;;  %v7349_v62 = vld [vmem:[%s10389_s4 + $0x20] ss:$0 sm:$0xff] }
0x14ac   :  { %v3146_v57 = vpop.permute.xlu1 %3145 }
0x14ad   :  { %v3151_v58 = vadd.f32 %v3146_v57, %v9394_v59 }
0x14af   :  { %3161 = vrot.lane.b32.xlu1 %v3151_v58, %s8772_s27 }
0x14b0   :  { %v3148_v7 = vpop.permute.xlu0 %3147 }
0x14b1   :  { %v3152_v9 = vadd.f32 %v3148_v7, %v9398_v50 }
0x14b3   :  { %3163 = vrot.lane.b32.xlu0 %v3152_v9, %s8772_s27  ;;  %v3243_v47 = vpack.c.bf16 %v3152_v9, %v3151_v58 }
0x14b7   :  { %3245 = vrot.lane.b32.xlu0 %v3243_v47, %s8772_s27 }
0x1521   :  { %v3162_v63 = vpop.permute.xlu1 %3161 }
0x1525   :  { %v3164_v49 = vpop.permute.xlu0 %3163 }
0x1526   :  { %8146 = vmatprep.subr.mxu1 %v3164_v49 }
0x1527   :  { %8147 = vmatpush3.msra.mxu1 %v3164_v49 }
0x1528   :  { %8148 = vmatprep.subr.mxu1 %v3162_v63 }
0x1529   :  { %8149 = vmatpush3.msra.mxu1 %v3162_v63  ;;  %v3246_v5 = vpop.permute.xlu0 %3245 }
0x152a   :  { %8151 = vmatmul.mubr.msk.f32.vlgmr.msra.gmra.mxu1 %vm399_vm3, %v9414_v4  ;;  %8153 = vmatprep.subr.bf16.mxu1 %v8768_v24 }
0x152b   :  { %8154 = vmatpush3.bf16.msra.mxu1 %v3251_v0  ;;  %8155 = vmatprep.mubr.msk.bf16.mxu1 %vm8769_vm4, %v8768_v24 }
0x152c   :  { %8165 = vmatprep.subr.mxu1 %v3164_v49 }
0x152e   :  { %8156 = vmatmul.mubr.msk.bf16.vlgmr.msra.gmra.mxu1 %vm1244_vm6, %v3246_v5 }
0x152f   :  { %8166 = vmatpush3.msra.mxu1 %v3164_v49  ;;  %8169 = vmatprep.mubr.msk.f32.mxu1 %vm399_vm3, %v9425_v8 }
0x1530   :  { %8167 = vmatprep.subr.mxu1 %v3162_v63 }
0x1531   :  { %8168 = vmatpush3.msra.mxu1 %v3162_v63  ;;  %v7329_v63 = vld [vmem:[%s10391_s6 + $0x40] sm:$0xf] }
0x1536   :  { %8170 = vmatmul.mubr.msk.f32.vlgmr.msra.gmra.mxu1 %vm399_vm3, %v9433_v11 }
0x1537   :  { %8182 = vmatprep.mubr.msk.f32.mxu1 %vm399_vm3, %v9387_v1 }
0x15ea   :  { %v8152_v56 = vpop.f32.mrf.mxu1 }
0x15ec   :  { %v3233_v15 = vpop.f32.mrf.mxu1 }
0x15ed   :  { %v3242_v16 = vpack.c.bf16 %v8152_v56, %v3233_v15 }
0x15ee   :  { %v3287_v18 = vpop.f32.mrf.mxu1 }
0x15ef   :  { %8162 = vmatmul.mubr.msk.bf16.vlgmr.msra.gmra.mxu0 %vm1244_vm6, %v3242_v16 }
0x15f0   :  { %v8157_v1 = vpop.f32.mrf.mxu1  ;;  %8173 = vmatpush3.bf16.msra.mxu0 %v3421_v17  ;;  %8174 = vmatprep.mubr.msk.bf16.mxu0 %vm8769_vm4, %v8768_v24 }
0x15f1   :  { %8191 = vmatprep.subr.bf16.mxu0 %v8768_v24 }
0x15f2   :  { %v3290_v19 = vpop.f32.mrf.mxu1 }
0x15f4   :  { %v8158_v20 = vpop.f32.mrf.mxu1 }
0x15f6   :  { %v8171_v21 = vpop.f32.mrf.mxu1 }
0x15f8   :  { %v3407_v22 = vpop.f32.mrf.mxu1 }
0x15f9   :  { %v3416_v23 = vpack.c.bf16 %v8171_v21, %v3407_v22 }
0x15fb   :  { %8175 = vmatmul.mubr.msk.bf16.vlgmr.msra.gmra.mxu0 %vm1244_vm6, %v3416_v23 }
0x15fc   :  { %8193 = vmatprep.mubr.msk.bf16.mxu0 %vm8769_vm4, %v8768_v24 }
0x16af   :  { %v3334_v25 = vpop.f32.mrf.mxu0 }
0x16b0   :  { %v3335_v29 = vadd.f32 %v3334_v25, %v3287_v18 }
0x16b1   :  { %v8163_v26 = vpop.f32.mrf.mxu0 }
0x16b3   :  { %v3337_v27 = vpop.f32.mrf.mxu0 }
0x16b4   :  { %v3338_v34 = vadd.f32 %v3337_v27, %v3290_v19  ;;  %v7341_v19 = vld [vmem:[%s10392_s7 + $0x40] sm:$0xf] }
0x16b5   :  { %v8164_v28 = vpop.f32.mrf.mxu0  ;;  %v3892_v22 = vsel %vm1248_vm5, %v7341_v19, 0 }
0x16bb   :  { %v3457_v30 = vpop.f32.mrf.mxu0 }
0x16bc   :  { %v3464_v32 = vadd.f32 %v3457_v30, %v3335_v29 }
0x16bd   :  { %v8176_v33 = vpop.f32.mrf.mxu0 }
0x16be   :  { %v3471_v35 = vadd.f32 %v7325_v31, %v3464_v32  ;;  %v7344_v32 = vld [vmem:[%s10392_s7 + $0x4c] sm:$0xf] }
0x16bf   :  { %v3460_v37 = vpop.f32.mrf.mxu0  ;;  %v3990_v33 = vsel %vm1248_vm5, %v7344_v32, 0  ;;  %v7357_v32 = vld [vmem:[%s10389_s4 + $0x23] ss:$0 sm:$0xff] }
0x16c0   :  { %v3473_v39 = vmax.f32 %v3471_v35, 0.0  ;;  %v3465_v40 = vadd.f32 %v3460_v37, %v3338_v34 }
0x16c1   :  { %v8177_v41 = vpop.f32.mrf.mxu0 }
0x16c2   :  { %v3480_v43 = vmul.f32 %v7326_v36, %v3473_v39  ;;  %v3472_v44 = vadd.f32 %v7325_v31, %v3465_v40  ;;  %v7338_v40 = vld [vmem:[%s10389_s4 + $0x1d] ss:$0 sm:$0xff] }
0x16c4   :  { %v3474_v53 = vmax.f32 %v3472_v44, 0.0  ;;  %v3487_v54 = vadd.f32 %v7327_v42, %v3480_v43 }
0x16c6   :  { %v3481_v46 = vmul.f32 %v7326_v36, %v3474_v53  ;;  %3491 = vrot.lane.b32.xlu0 %v3487_v54, %s8773_s19 }
0x16c8   :  { %v3488_v55 = vadd.f32 %v7327_v42, %v3481_v46 }
0x16ca   :  { %3493 = vrot.lane.b32.xlu1 %v3488_v55, %s8773_s19  ;;  %v3935_v57 = vpack.c.bf16 %v3488_v55, %v3487_v54  ;;  %v7339_v55 = vld [vmem:[%s10389_s4 + $0x1e] ss:$0 sm:$0xff] }
0x1738   :  { %v3492_v58 = vpop.permute.xlu0 %3491 }
0x1739   :  { %v3497_v7 = vadd.f32 %v3492_v58, %v9394_v59  ;;  %v3597_v59 = vsel %vm1248_vm5, %v7329_v63, 0 }
0x173b   :  { %3507 = vrot.lane.b32.xlu0 %v3497_v7, %s8774_s26 }
0x173c   :  { %v3494_v9 = vpop.permute.xlu1 %3493 }
0x173d   :  { %v3498_v47 = vadd.f32 %v3494_v9, %v9398_v50 }
0x173f   :  { %3509 = vrot.lane.b32.xlu1 %v3498_v47, %s8774_s26  ;;  %v3589_v49 = vpack.c.bf16 %v3498_v47, %v3497_v7 }
0x1743   :  { %3591 = vrot.lane.b32.xlu1 %v3589_v49, %s8774_s26  ;;  %v7340_v49 = vld [vmem:[%s10389_s4 + $0x1f] ss:$0 sm:$0xff] }
0x17ad   :  { %v3508_v0 = vpop.permute.xlu0 %3507 }
0x17b1   :  { %v3510_v61 = vpop.permute.xlu1 %3509 }
0x17b2   :  { %8178 = vmatprep.subr.mxu1 %v3510_v61 }
0x17b3   :  { %8179 = vmatpush3.msra.mxu1 %v3510_v61 }
0x17b4   :  { %8180 = vmatprep.subr.mxu1 %v3508_v0 }
0x17b5   :  { %8181 = vmatpush3.msra.mxu1 %v3508_v0  ;;  %v3592_v50 = vpop.permute.xlu1 %3591 }
0x17b6   :  { %8183 = vmatmul.mubr.msk.f32.vlgmr.msra.gmra.mxu1 %vm399_vm3, %v9414_v4  ;;  %8185 = vmatprep.subr.bf16.mxu1 %v8768_v24  ;;  %v7342_v4 = vld [vmem:[%s10392_s7 + $0x44] sm:$0xf] }
0x17b7   :  { %8186 = vmatpush3.bf16.msra.mxu1 %v3597_v59  ;;  %8187 = vmatprep.mubr.msk.bf16.mxu1 %vm8769_vm4, %v8768_v24  ;;  %v3845_v5 = vsel %vm1248_vm5, %v7342_v4, 0 }
0x17b8   :  { %8197 = vmatprep.subr.mxu1 %v3510_v61 }
0x17ba   :  { %8188 = vmatmul.mubr.msk.bf16.vlgmr.msra.gmra.mxu1 %vm1244_vm6, %v3592_v50 }
0x17bb   :  { %8198 = vmatpush3.msra.mxu1 %v3510_v61  ;;  %8201 = vmatprep.mubr.msk.f32.mxu1 %vm399_vm3, %v9425_v8  ;;  %v3940_v8 = vsel %vm1248_vm5, %v7343_v10, 0  ;;  %v8635_v10 = vld [vmem:[%s10392_s7 + $0x78] sm:$0xff]  }
0x17bc   :  { %8199 = vmatprep.subr.mxu1 %v3508_v0 }
0x17bd   :  { %8200 = vmatpush3.msra.mxu1 %v3508_v0 }
0x17be   :  { %8210 = vmatprep.subr.bf16.mxu1 %v8768_v24 }
0x17c2   :  { %8202 = vmatmul.mubr.msk.f32.vlgmr.msra.gmra.mxu1 %vm399_vm3, %v9433_v11  ;;  %v7328_v11 = vld [vmem:[%s10391_s6 + $0x3c] sm:$0xf] }
0x17c3   :  { %8211 = vmatpush3.bf16.msra.mxu1 %v3845_v5  ;;  %8212 = vmatprep.mubr.msk.bf16.mxu1 %vm8769_vm4, %v8768_v24  ;;  %v3644_v12 = vsel %vm1248_vm5, %v7328_v11, 0 }
0x17c4   :  { %8222 = vmatprep.subr.bf16.mxu1 %v8768_v24  ;;  %8192 = vmatpush3.bf16.msra.mxu0 %v3644_v12 }
0x17c5   :  { %8204 = vmatprep.subr.bf16.mxu0 %v8768_v24 }
0x17c6   :  { %8213 = vmatmul.mubr.msk.bf16.vlgmr.msra.gmra.mxu1 %vm1244_vm6, %v3840_v6 }
0x17c7   :  { %8223 = vmatpush3.bf16.msra.mxu1 %v3940_v8  ;;  %8224 = vmatprep.mubr.msk.bf16.mxu1 %vm8769_vm4, %v8768_v24 }
0x17c8   :  { %8234 = vmatprep.subr.mxu1 %v8768_v24 }
0x17ce   :  { %8225 = vmatmul.mubr.msk.bf16.vlgmr.msra.gmra.mxu1 %vm1244_vm6, %v3935_v57 }
0x17cf   :  { %8238 = vmatprep.mubr.msk.f32.mxu1 %vm8769_vm4, %v8768_v24 }
0x1876   :  { %v8184_v45 = vpop.f32.mrf.mxu1 }
0x1878   :  { %v3579_v6 = vpop.f32.mrf.mxu1 }
0x1879   :  { %v3588_v56 = vpack.c.bf16 %v8184_v45, %v3579_v6 }
0x187a   :  { %v3633_v15 = vpop.f32.mrf.mxu1 }
0x187b   :  { %8194 = vmatmul.mubr.msk.bf16.vlgmr.msra.gmra.mxu0 %vm1244_vm6, %v3588_v56 }
0x187c   :  { %v8189_v16 = vpop.f32.mrf.mxu1  ;;  %8205 = vmatpush3.bf16.msra.mxu0 %v3767_v14  ;;  %8206 = vmatprep.mubr.msk.bf16.mxu0 %vm8769_vm4, %v8768_v24 }
0x187d   :  { %8216 = vmatprep.subr.bf16.mxu0 %v8768_v24 }
0x187e   :  { %v3636_v17 = vpop.f32.mrf.mxu1 }
0x1880   :  { %v8190_v18 = vpop.f32.mrf.mxu1 }
0x1882   :  { %v8203_v1 = vpop.f32.mrf.mxu1 }
0x1884   :  { %v3753_v20 = vpop.f32.mrf.mxu1 }
0x1885   :  { %v3762_v21 = vpack.c.bf16 %v8203_v1, %v3753_v20  ;;  %v7350_v20 = vld [vmem:[%s10389_s4 + $0x21] ss:$0 sm:$0xff] }
0x1886   :  { %v3881_v23 = vpop.f32.mrf.mxu1 }
0x1887   :  { %8207 = vmatmul.mubr.msk.bf16.vlgmr.msra.gmra.mxu0 %vm1244_vm6, %v3762_v21 }
0x1888   :  { %v8214_v25 = vpop.f32.mrf.mxu1  ;;  %8217 = vmatpush3.bf16.msra.mxu0 %v3892_v22  ;;  %8218 = vmatprep.mubr.msk.bf16.mxu0 %vm8769_vm4, %v8768_v24 }
0x1889   :  { %8228 = vmatprep.subr.bf16.mxu0 %v8768_v24  ;;  %v7351_v25 = vld [vmem:[%s10389_s4 + $0x22] ss:$0 sm:$0xff] }
0x188a   :  { %v3884_v26 = vpop.f32.mrf.mxu1 }
0x188c   :  { %v8215_v27 = vpop.f32.mrf.mxu1 }
0x188e   :  { %v3976_v28 = vpop.f32.mrf.mxu1 }
0x188f   :  { %8219 = vmatmul.mubr.msk.bf16.vlgmr.msra.gmra.mxu0 %vm1244_vm6, %v9404_v60 }
0x1890   :  { %v8226_v29 = vpop.f32.mrf.mxu1  ;;  %8230 = vmatprep.mubr.msk.bf16.mxu0 %vm8769_vm4, %v8768_v24  ;;  %8229 = vmatpush3.bf16.msra.mxu0 %v3990_v33 }
0x1891   :  { %8241 = vmatprep.subr.bf16.mxu0 %v8768_v24 }
0x1892   :  { %v3979_v30 = vpop.f32.mrf.mxu1 }
0x1894   :  { %v8227_v31 = vpop.f32.mrf.mxu1 }
0x193b   :  { %v3680_v34 = vpop.f32.mrf.mxu0 }
0x193c   :  { %v3681_v60 = vadd.f32 %v3680_v34, %v3633_v15 }
0x193d   :  { %v8195_v35 = vpop.f32.mrf.mxu0 }
0x193f   :  { %v3683_v36 = vpop.f32.mrf.mxu0 }
0x1940   :  { %v3684_v43 = vadd.f32 %v3683_v36, %v3636_v17 }
0x1941   :  { %v8196_v37 = vpop.f32.mrf.mxu0 }
0x1947   :  { %v3803_v39 = vpop.f32.mrf.mxu0 }
0x1948   :  { %v3810_v41 = vadd.f32 %v3803_v39, %v3681_v60 }
0x1949   :  { %v8208_v42 = vpop.f32.mrf.mxu0 }
0x194a   :  { %v3817_v44 = vadd.f32 %v7338_v40, %v3810_v41 }
0x194b   :  { %v3806_v53 = vpop.f32.mrf.mxu0 }
0x194c   :  { %v3819_v54 = vmax.f32 %v3817_v44, 0.0  ;;  %v3811_v46 = vadd.f32 %v3806_v53, %v3684_v43 }
0x194d   :  { %v8209_v57 = vpop.f32.mrf.mxu0 }
0x194e   :  { %v3818_v58 = vadd.f32 %v7338_v40, %v3811_v46  ;;  %v3826_v9 = vmul.f32 %v7339_v55, %v3819_v54  ;;  %v7363_v40 = vld [vmem:[%s10389_s4 + $0x24] ss:$0 sm:$0xff] }
0x194f   :  { %v3928_v7 = vpop.f32.mrf.mxu0 }
0x1950   :  { %v3820_v47 = vmax.f32 %v3818_v58, 0.0  ;;  %v3833_v59 = vadd.f32 %v7340_v49, %v3826_v9  ;;  %v3929_v8 = vadd.f32 %v3928_v7, %v3881_v23  ;;  %v8639_v58 = vld [vmem:[%s10392_s7 + $0x20] sm:$0xff]  }
0x1951   :  { %v8220_v61 = vpop.f32.mrf.mxu0 }
0x1952   :  { %v3827_v63 = vmul.f32 %v7339_v55, %v3820_v47  ;;  %v3983_v12 = vadd.f32 %v3976_v28, %v3929_v8  ;;  %v8636_v28 = vld [vmem:[%s10392_s7 + $0x70] sm:$0xff]  }
0x1953   :  { %v3931_v0 = vpop.f32.mrf.mxu0 }
0x1954   :  { %v3834_v50 = vadd.f32 %v7340_v49, %v3827_v63  ;;  %v3932_v11 = vadd.f32 %v3931_v0, %v3884_v26  ;;  %v7374_v0 = vld [vmem:[%s10389_s4 + $0x25] ss:$0 sm:$0xff] }
0x1955   :  { %v8221_v4 = vpop.f32.mrf.mxu0 }
0x1956   :  { %v3985_v5 = vpack.c.bf16 %v3834_v50, %v3833_v59  ;;  %v3984_v15 = vadd.f32 %v3979_v30, %v3932_v11 }
0x1958   :  { %8231 = vmatmul.mubr.msk.bf16.vlgmr.msra.gmra.mxu0 %vm1244_vm6, %v3985_v5  ;;  %v9678_v5 = vld [vmem:[%s10388_s3 + $0xb0] sm:$0xff] }
0x1959   :  { %8245 = vmatprep.mubr.msk.bf16.mxu0 %vm8769_vm4, %v8768_v24  ;;  %8242 = vmatpush3.bf16.msra.mxu0 %v8635_v10  ;;  %v7379_v10 = vld [vmem:[%s10389_s4 + $0x27] ss:$0 sm:$0xff] }
0x195a   :  { %8243 = vmatprep.subr.bf16.mxu0 %v8768_v24 }
0x195d   :  { %8244 = vmatpush3.bf16.msra.mxu0 %v8636_v28 }
0x195e   :  { %8260 = vmatprep.subr.bf16.mxu0 %v8768_v24 }
0x1a18   :  { %v4026_v45 = vpop.f32.mrf.mxu0 }
0x1a19   :  { %v4033_v6 = vadd.f32 %v4026_v45, %v3983_v12 }
0x1a1a   :  { %v8232_v56 = vpop.f32.mrf.mxu0 }
0x1a1b   :  { %v4040_v14 = vadd.f32 %v7349_v62, %v4033_v6 }
0x1a1c   :  { %v4029_v16 = vpop.f32.mrf.mxu0 }
0x1a1d   :  { %v4034_v17 = vadd.f32 %v4029_v16, %v3984_v15  ;;  %v4042_v1 = vmax.f32 %v4040_v14, 0.0 }
0x1a1e   :  { %v8233_v18 = vpop.f32.mrf.mxu0 }
0x1a1f   :  { %v4041_v19 = vadd.f32 %v7349_v62, %v4034_v17  ;;  %v4049_v22 = vmul.f32 %v7350_v20, %v4042_v1  ;;  %v7381_v17 = vld [vmem:[%s10391_s6 + $0x4c] sm:$0xf]  ;;  %v9705_v1 = vld [vmem:[%s10388_s3 + $0xb8] sm:$0xff] }
0x1a21   :  { %v4043_v21 = vmax.f32 %v4041_v19, 0.0  ;;  %v4056_v27 = vadd.f32 %v7351_v25, %v4049_v22  ;;  %v4531_v19 = vsel %vm1248_vm5, %v7381_v17, 0  ;;  %v9724_v22 = vld [vmem:[%s10388_s3 + $0xd8] sm:$0xff] }
0x1a23   :  { %v4050_v23 = vmul.f32 %v7350_v20, %v4043_v21  ;;  %v9716_v20 = vld [vmem:[%s10388_s3 + $0xd0] sm:$0xff] }
0x1a25   :  { %v4057_v26 = vadd.f32 %v7351_v25, %v4050_v23  ;;  %v7380_v23 = vld [vmem:[%s10391_s6 + $0x48] sm:$0xf] }
0x1a26   :  { %v4578_v25 = vsel %vm1248_vm5, %v7380_v23, 0  ;;  %v7399_v23 = vld [vmem:[%s10391_s6 + $0x5c] sm:$0xf] }
0x1a27   :  { %8235 = vmatpush3.msra.mxu1 %v4057_v26 }
0x1a28   :  { %8236 = vmatprep.subr.mxu1 %v8768_v24 }
0x1a29   :  { %8237 = vmatpush3.msra.mxu1 %v4056_v27 }
0x1a2a   :  { %8239 = vmatmul.mubr.msk.f32.vlgmr.msra.gmra.mxu1 %vm399_vm3, %v9315_v13  ;;  %8249 = vmatprep.subr.bf16.mxu1 %v8768_v24  ;;  %v8637_v13 = vld [vmem:[%s10392_s7 + $0xa0] sm:$0xff]  }
0x1a2b   :  { %8251 = vmatprep.mubr.msk.bf16.mxu1 %vm8769_vm4, %v8768_v24  ;;  %8250 = vmatpush3.bf16.msra.mxu1 %v8637_v13 }
0x1aea   :  { %v4124_v29 = vpop.f32.mrf.mxu1 }
0x1aeb   :  { %v4133_v30 = vpack.c.bf16 %v4124_v29, %v4124_v29 }
0x1aec   :  { %v8240_v31 = vpop.f32.mrf.mxu1 }
0x1aed   :  { %8246 = vmatmul.mubr.msk.bf16.vlgmr.msra.gmra.mxu0 %vm85_vm1, %v4133_v30 }
0x1aee   :  { %8264 = vmatprep.mubr.msk.bf16.mxu0 %vm8769_vm4, %v8768_v24 }
0x1bad   :  { %v4188_v33 = vpop.f32.mrf.mxu0 }
0x1bae   :  { %v4189_v34 = vadd.f32 %v7357_v32, %v4188_v33 }
0x1baf   :  { %v8247_v35 = vpop.f32.mrf.mxu0 }
0x1bb0   :  { %v4194_v36 = vmax.f32 %v4189_v34, 0.0 }
0x1bb1   :  { %v4191_v37 = vpop.f32.mrf.mxu0 }
0x1bb2   :  { %v4198_v60 = vpack.c.bf16 %v4194_v36, %v4194_v36 }
0x1bb3   :  { %v8248_v39 = vpop.f32.mrf.mxu0 }
0x1bb4   :  { %8252 = vmatmul.mubr.msk.bf16.vlgmr.msra.gmra.mxu1 %vm399_vm3, %v4198_v60 }
0x1bb5   :  { %8257 = vmatprep.mubr.msk.f32.mxu1 %vm2616_vm7, %v9340_v3  ;;  %v8638_v3 = vld [vmem:[%s10392_s7 + $0x28] sm:$0xff]  }
0x1bb6   :  { %8261 = vmatpush3.bf16.msra.mxu0 %v8638_v3 }
0x1bb7   :  { %8262 = vmatprep.subr.bf16.mxu0 %v8768_v24 }
0x1bba   :  { %8263 = vmatpush3.bf16.msra.mxu0 %v8639_v58 }
0x1bbb   :  { %8281 = vmatprep.subr.bf16.mxu0 %v8768_v24 }
0x1c74   :  { %v4247_v41 = vpop.f32.mrf.mxu1 }
0x1c75   :  { %v4248_v42 = vadd.f32 %v7363_v40, %v4247_v41 }
0x1c76   :  { %v8253_v43 = vpop.f32.mrf.mxu1 }
0x1c77   :  { %v7366_v44 = vmul.f32 -1.442695, %v4248_v42  ;;  %v7394_v43 = vld [vmem:[%s10389_s4 + $0x28] ss:$0 sm:$0xff] }
0x1c78   :  { %v4250_v53 = vpop.f32.mrf.mxu1 }
0x1c79   :  { %8688 = vpow2.f32 %v7366_v44 }
0x1c7a   :  { %v8254_v54 = vpop.f32.mrf.mxu1 }
0x1c86   :  { %v8689_v46 = vpop.eup %8688 }
0x1c87   :  { %v4256_v55 = vadd.f32 1.0, %v8689_v46 }
0x1c89   :  { %8690 = vrcp.f32 %v4256_v55  ;;  %v7395_v55 = vld [vmem:[%s10389_s4 + $0x29] ss:$0 sm:$0xff] }
0x1c96   :  { %v8691_v57 = vpop.eup %8690 }
0x1c97   :  { %8255 = vmatprep.subr.msk.mxu1 %vm2623_vm8, %v8691_v57 }
0x1c98   :  { %8256 = vmatpush3.msk.msra.mxu1 %vm2623_vm8, %v8691_v57 }
0x1c99   :  { %8258 = vmatmul.mubr.msk.f32.vlgmr.msra.gmra.mxu1 %vm2616_vm7, %v9350_v38 }
0x1c9a   :  { %8272 = vmatprep.mubr.msk.f32.mxu1 %vm399_vm3, %v9678_v5 }
0x1d59   :  { %v8259_v7 = vpop.f32.mrf.mxu1 }
0x1d5a   :  { %v4338_v9 = vmul.f32 %v8259_v7, %v4057_v26 }
0x1d5b   :  { %v4328_v47 = vpop.f32.mrf.mxu1 }
0x1d5c   :  { %v4337_v49 = vmul.f32 %v4328_v47, %v4056_v27  ;;  %v9656_v38 = vadd.f32 %v4338_v9, %v9365_v48  ;;  %v7382_v27 = vld [vmem:[%s10391_s6 + $0x50] sm:$0xf]  ;;  %v7396_v9 = vld [vmem:[%s10389_s4 + $0x2a] ss:$0 sm:$0xff] }
0x1d5d   :  { %v4710_v30 = vsel %vm1248_vm5, %v7382_v27, 0  ;;  %v5056_v27 = vsel %vm1248_vm5, %v7399_v23, 0 }
0x1d5e   :  { %v9659_v61 = vadd.f32 %v4337_v49, %v9368_v51  ;;  %v7378_v51 = vld [vmem:[%s10389_s4 + $0x26] ss:$0 sm:$0xff] }
0x1d60   :  { %v9663_v63 = vpack.c.bf16 %v9656_v38, %v9659_v61 }
0x1d62   :  { %8265 = vmatmul.mubr.msk.bf16.vlgmr.msra.gmra.mxu0 %vm85_vm1, %v9663_v63 }
0x1d63   :  { %8283 = vmatprep.mubr.msk.bf16.mxu0 %vm8769_vm4, %v8768_v24  ;;  %8282 = vmatpush3.bf16.msra.mxu0 %v4578_v25 }
0x1d64   :  { %8294 = vmatprep.subr.bf16.mxu0 %v8768_v24 }
0x1e22   :  { %v4401_v59 = vpop.f32.mrf.mxu0 }
0x1e23   :  { %v4402_v48 = vadd.f32 %v7374_v0, %v4401_v59 }
0x1e24   :  { %v8266_v50 = vpop.f32.mrf.mxu0 }
0x1e25   :  { %v4408_v4 = vmax.f32 %v4402_v48, 0.0 }
0x1e26   :  { %v4404_v8 = vpop.f32.mrf.mxu0 }
0x1e27   :  { %v4415_v11 = vmul.f32 %v7378_v51, %v4408_v4  ;;  %v4405_v12 = vadd.f32 %v7374_v0, %v4404_v8 }
0x1e28   :  { %v8267_v45 = vpop.f32.mrf.mxu0 }
0x1e29   :  { %v9685_v62 = vadd.f32 %v7379_v10, %v4415_v11  ;;  %v4409_v6 = vmax.f32 %v4405_v12, 0.0 }
0x1e2b   :  { %v4416_v56 = vmul.f32 %v7378_v51, %v4409_v6  ;;  %4435 = vrot.lane.b32.xlu1 %v9685_v62, %s8770_s11  ;;  %v7398_v6 = vld [vmem:[%s10391_s6 + $0x58] sm:$0xf] }
0x1e2d   :  { %v9689_v14 = vadd.f32 %v7379_v10, %v4416_v56 }
0x1e2f   :  { %4437 = vrot.lane.b32.xlu0 %v9689_v14, %s8770_s11  ;;  %v9695_v15 = vpack.c.bf16 %v9689_v14, %v9685_v62 }
0x1e33   :  { %4525 = vrot.lane.b32.xlu0 %v9695_v15, %s8770_s11 }
0x1e9d   :  { %v4436_v18 = vpop.permute.xlu1 %4435 }
0x1ea1   :  { %v4438_v16 = vpop.permute.xlu0 %4437 }
0x1ea2   :  { %8268 = vmatprep.subr.mxu1 %v4438_v16 }
0x1ea3   :  { %8269 = vmatpush3.msra.mxu1 %v4438_v16 }
0x1ea4   :  { %8270 = vmatprep.subr.mxu1 %v4436_v18 }
0x1ea5   :  { %8271 = vmatpush3.msra.mxu1 %v4436_v18  ;;  %v4526_v21 = vpop.permute.xlu0 %4525 }
0x1ea6   :  { %8273 = vmatmul.mubr.msk.f32.vlgmr.msra.gmra.mxu1 %vm399_vm3, %v9705_v1  ;;  %8275 = vmatprep.subr.bf16.mxu1 %v8768_v24 }
0x1ea7   :  { %8276 = vmatpush3.bf16.msra.mxu1 %v4531_v19  ;;  %8277 = vmatprep.mubr.msk.bf16.mxu1 %vm8769_vm4, %v8768_v24 }
0x1ea8   :  { %8287 = vmatprep.subr.mxu1 %v4438_v16 }
0x1eaa   :  { %8278 = vmatmul.mubr.msk.bf16.vlgmr.msra.gmra.mxu1 %vm1244_vm6, %v4526_v21 }
0x1eab   :  { %8288 = vmatpush3.msra.mxu1 %v4438_v16  ;;  %8291 = vmatprep.mubr.msk.f32.mxu1 %vm399_vm3, %v9716_v20  ;;  %v4886_v16 = vsel %vm1248_vm5, %v7398_v6, 0 }
0x1eac   :  { %8289 = vmatprep.subr.mxu1 %v4436_v18 }
0x1ead   :  { %8290 = vmatpush3.msra.mxu1 %v4436_v18  ;;  %v7397_v18 = vld [vmem:[%s10391_s6 + $0x54] sm:$0xf] }
0x1eae   :  { %v4933_v19 = vsel %vm1248_vm5, %v7397_v18, 0 }
0x1eb2   :  { %8292 = vmatmul.mubr.msk.f32.vlgmr.msra.gmra.mxu1 %vm399_vm3, %v9724_v22 }
0x1eb3   :  { %8304 = vmatprep.mubr.msk.f32.mxu1 %vm399_vm3, %v9678_v5 }
0x1f66   :  { %v8274_v26 = vpop.f32.mrf.mxu1 }
0x1f68   :  { %v4513_v28 = vpop.f32.mrf.mxu1 }
0x1f69   :  { %v4522_v29 = vpack.c.bf16 %v8274_v26, %v4513_v28 }
0x1f6a   :  { %v4567_v31 = vpop.f32.mrf.mxu1 }
0x1f6b   :  { %8284 = vmatmul.mubr.msk.bf16.vlgmr.msra.gmra.mxu0 %vm1244_vm6, %v4522_v29 }
0x1f6c   :  { %v8279_v13 = vpop.f32.mrf.mxu1  ;;  %8295 = vmatpush3.bf16.msra.mxu0 %v4710_v30  ;;  %8296 = vmatprep.mubr.msk.bf16.mxu0 %vm8769_vm4, %v8768_v24 }
0x1f6d   :  { %8313 = vmatprep.subr.bf16.mxu0 %v8768_v24 }
0x1f6e   :  { %v4570_v32 = vpop.f32.mrf.mxu1 }
0x1f70   :  { %v8280_v33 = vpop.f32.mrf.mxu1 }
0x1f72   :  { %v8293_v34 = vpop.f32.mrf.mxu1 }
0x1f74   :  { %v4696_v35 = vpop.f32.mrf.mxu1 }
0x1f75   :  { %v4705_v36 = vpack.c.bf16 %v8293_v34, %v4696_v35 }
0x1f77   :  { %8297 = vmatmul.mubr.msk.bf16.vlgmr.msra.gmra.mxu0 %vm1244_vm6, %v4705_v36 }
0x1f78   :  { %8315 = vmatprep.mubr.msk.bf16.mxu0 %vm8769_vm4, %v8768_v24  ;;  %8314 = vmatpush3.bf16.msra.mxu0 %v4933_v19 }
0x1f79   :  { %8326 = vmatprep.subr.bf16.mxu0 %v8768_v24 }
0x202b   :  { %v4614_v37 = vpop.f32.mrf.mxu0 }
0x202c   :  { %v4615_v41 = vadd.f32 %v4614_v37, %v4567_v31 }
0x202d   :  { %v8285_v60 = vpop.f32.mrf.mxu0 }
0x202f   :  { %v4617_v39 = vpop.f32.mrf.mxu0 }
0x2030   :  { %v4618_v54 = vadd.f32 %v4617_v39, %v4570_v32  ;;  %v7407_v39 = vld [vmem:[%s10389_s4 + $0x2b] ss:$0 sm:$0xff] }
0x2031   :  { %v8286_v40 = vpop.f32.mrf.mxu0 }
0x2037   :  { %v4746_v42 = vpop.f32.mrf.mxu0 }
0x2038   :  { %v4753_v44 = vadd.f32 %v4746_v42, %v4615_v41 }
0x2039   :  { %v8298_v53 = vpop.f32.mrf.mxu0 }
0x203a   :  { %v4760_v46 = vadd.f32 %v7394_v43, %v4753_v44  ;;  %v7408_v44 = vld [vmem:[%s10389_s4 + $0x2c] ss:$0 sm:$0xff] }
0x203b   :  { %v4749_v57 = vpop.f32.mrf.mxu0 }
0x203c   :  { %v4762_v3 = vmax.f32 %v4760_v46, 0.0  ;;  %v4754_v58 = vadd.f32 %v4749_v57, %v4618_v54  ;;  %v7409_v57 = vld [vmem:[%s10389_s4 + $0x2d] ss:$0 sm:$0xff] }
0x203d   :  { %v8299_v7 = vpop.f32.mrf.mxu0 }
0x203e   :  { %v4769_v47 = vmul.f32 %v7395_v55, %v4762_v3  ;;  %v4761_v49 = vadd.f32 %v7394_v43, %v4754_v58 }
0x2040   :  { %v4763_v0 = vmax.f32 %v4761_v49, 0.0  ;;  %v9755_v59 = vadd.f32 %v7396_v9, %v4769_v47 }
0x2042   :  { %v4770_v48 = vmul.f32 %v7395_v55, %v4763_v0  ;;  %4780 = vrot.lane.b32.xlu0 %v9755_v59, %s8771_s25 }
0x2044   :  { %v9759_v51 = vadd.f32 %v7396_v9, %v4770_v48 }
0x2046   :  { %4782 = vrot.lane.b32.xlu1 %v9759_v51, %s8771_s25  ;;  %v5475_v50 = vpack.c.bf16 %v9759_v51, %v9755_v59  ;;  %v7412_v51 = vld [vmem:[%s10391_s6 + $0x68] sm:$0xf] }
0x2047   :  { %v5402_v19 = vsel %vm1248_vm5, %v7412_v51, 0 }
0x20b4   :  { %v4781_v4 = vpop.permute.xlu0 %4780 }
0x20b5   :  { %v4786_v10 = vadd.f32 %v4781_v4, %v9685_v62 }
0x20b7   :  { %4796 = vrot.lane.b32.xlu0 %v4786_v10, %s8772_s27 }
0x20b8   :  { %v4783_v8 = vpop.permute.xlu1 %4782 }
0x20b9   :  { %v4787_v11 = vadd.f32 %v4783_v8, %v9689_v14 }
0x20bb   :  { %4798 = vrot.lane.b32.xlu1 %v4787_v11, %s8772_s27  ;;  %v4878_v12 = vpack.c.bf16 %v4787_v11, %v4786_v10 }
0x20bf   :  { %4880 = vrot.lane.b32.xlu1 %v4878_v12, %s8772_s27 }
0x2129   :  { %v4797_v56 = vpop.permute.xlu0 %4796 }
0x212d   :  { %v4799_v45 = vpop.permute.xlu1 %4798 }
0x212e   :  { %8300 = vmatprep.subr.mxu1 %v4799_v45 }
0x212f   :  { %8301 = vmatpush3.msra.mxu1 %v4799_v45 }
0x2130   :  { %8302 = vmatprep.subr.mxu1 %v4797_v56 }
0x2131   :  { %8303 = vmatpush3.msra.mxu1 %v4797_v56  ;;  %v4881_v17 = vpop.permute.xlu1 %4880 }
0x2132   :  { %8305 = vmatmul.mubr.msk.f32.vlgmr.msra.gmra.mxu1 %vm399_vm3, %v9705_v1  ;;  %8307 = vmatprep.subr.bf16.mxu1 %v8768_v24 }
0x2133   :  { %8308 = vmatpush3.bf16.msra.mxu1 %v4886_v16  ;;  %8309 = vmatprep.mubr.msk.bf16.mxu1 %vm8769_vm4, %v8768_v24  ;;  %v7425_v16 = vld [vmem:[%s10392_s7 + $0x58] sm:$0xf] }
0x2134   :  { %8319 = vmatprep.subr.mxu1 %v4799_v45 }
0x2136   :  { %8310 = vmatmul.mubr.msk.bf16.vlgmr.msra.gmra.mxu1 %vm1244_vm6, %v4881_v17 }
0x2137   :  { %8320 = vmatpush3.msra.mxu1 %v4799_v45  ;;  %8323 = vmatprep.mubr.msk.f32.mxu1 %vm399_vm3, %v9716_v20  ;;  %v7411_v45 = vld [vmem:[%s10391_s6 + $0x64] sm:$0xf] }
0x2138   :  { %8321 = vmatprep.subr.mxu1 %v4797_v56 }
0x2139   :  { %8322 = vmatpush3.msra.mxu1 %v4797_v56 }
0x213e   :  { %8324 = vmatmul.mubr.msk.f32.vlgmr.msra.gmra.mxu1 %vm399_vm3, %v9724_v22 }
0x213f   :  { %8336 = vmatprep.mubr.msk.f32.mxu1 %vm399_vm3, %v9678_v5 }
0x21f2   :  { %v8306_v21 = vpop.f32.mrf.mxu1 }
0x21f4   :  { %v4868_v25 = vpop.f32.mrf.mxu1 }
0x21f5   :  { %v4877_v26 = vpack.c.bf16 %v8306_v21, %v4868_v25 }
0x21f6   :  { %v4922_v28 = vpop.f32.mrf.mxu1 }
0x21f7   :  { %8316 = vmatmul.mubr.msk.bf16.vlgmr.msra.gmra.mxu0 %vm1244_vm6, %v4877_v26 }
0x21f8   :  { %v8311_v5 = vpop.f32.mrf.mxu1  ;;  %8327 = vmatpush3.bf16.msra.mxu0 %v5056_v27  ;;  %8328 = vmatprep.mubr.msk.bf16.mxu0 %vm8769_vm4, %v8768_v24 }
0x21f9   :  { %8345 = vmatprep.subr.bf16.mxu0 %v8768_v24 }
0x21fa   :  { %v4925_v29 = vpop.f32.mrf.mxu1 }
0x21fc   :  { %v8312_v30 = vpop.f32.mrf.mxu1 }
0x21fe   :  { %v8325_v31 = vpop.f32.mrf.mxu1 }
0x2200   :  { %v5042_v13 = vpop.f32.mrf.mxu1 }
0x2201   :  { %v5051_v32 = vpack.c.bf16 %v8325_v31, %v5042_v13 }
0x2203   :  { %8329 = vmatmul.mubr.msk.bf16.vlgmr.msra.gmra.mxu0 %vm1244_vm6, %v5051_v32 }
0x2204   :  { %8347 = vmatprep.mubr.msk.bf16.mxu0 %vm8769_vm4, %v8768_v24 }
0x22b7   :  { %v4969_v33 = vpop.f32.mrf.mxu0 }
0x22b8   :  { %v4970_v37 = vadd.f32 %v4969_v33, %v4922_v28  ;;  %v7423_v28 = vld [vmem:[%s10392_s7 + $0x50] sm:$0xf] }
0x22b9   :  { %v8317_v34 = vpop.f32.mrf.mxu0  ;;  %v5527_v30 = vsel %vm1248_vm5, %v7423_v28, 0 }
0x22bb   :  { %v4972_v35 = vpop.f32.mrf.mxu0 }
0x22bc   :  { %v4973_v42 = vadd.f32 %v4972_v35, %v4925_v29 }
0x22bd   :  { %v8318_v36 = vpop.f32.mrf.mxu0 }
0x22c3   :  { %v5092_v60 = vpop.f32.mrf.mxu0 }
0x22c4   :  { %v5099_v40 = vadd.f32 %v5092_v60, %v4970_v37  ;;  %v7426_v60 = vld [vmem:[%s10392_s7 + $0x5c] sm:$0xf] }
0x22c5   :  { %v8330_v41 = vpop.f32.mrf.mxu0 }
0x22c6   :  { %v5106_v43 = vadd.f32 %v7407_v39, %v5099_v40 }
0x22c7   :  { %v5095_v53 = vpop.f32.mrf.mxu0 }
0x22c8   :  { %v5108_v54 = vmax.f32 %v5106_v43, 0.0  ;;  %v5100_v46 = vadd.f32 %v5095_v53, %v4973_v42  ;;  %v7420_v53 = vld [vmem:[%s10389_s4 + $0x2e] ss:$0 sm:$0xff] }
0x22c9   :  { %v8331_v55 = vpop.f32.mrf.mxu0 }
0x22ca   :  { %v5115_v3 = vmul.f32 %v7408_v44, %v5108_v54  ;;  %v5107_v58 = vadd.f32 %v7407_v39, %v5100_v46  ;;  %v5625_v39 = vsel %vm1248_vm5, %v7426_v60, 0  ;;  %v8643_v60 = vld [vmem:[%s10393_s8 + $0x10] sm:$0xff]  }
0x22cc   :  { %v5109_v7 = vmax.f32 %v5107_v58, 0.0  ;;  %v5122_v9 = vadd.f32 %v7409_v57, %v5115_v3 }
0x22ce   :  { %v5116_v47 = vmul.f32 %v7408_v44, %v5109_v7  ;;  %5126 = vrot.lane.b32.xlu1 %v5122_v9, %s8773_s19 }
0x22d0   :  { %v5123_v49 = vadd.f32 %v7409_v57, %v5116_v47 }
0x22d2   :  { %5128 = vrot.lane.b32.xlu0 %v5123_v49, %s8773_s19  ;;  %v5570_v0 = vpack.c.bf16 %v5123_v49, %v5122_v9  ;;  %v7421_v9 = vld [vmem:[%s10389_s4 + $0x2f] ss:$0 sm:$0xff] }
0x2340   :  { %v5127_v48 = vpop.permute.xlu1 %5126 }
0x2341   :  { %v5132_v4 = vadd.f32 %v5127_v48, %v9685_v62  ;;  %v5232_v62 = vsel %vm1248_vm5, %v7411_v45, 0 }
0x2343   :  { %5142 = vrot.lane.b32.xlu1 %v5132_v4, %s8774_s26 }
0x2344   :  { %v5129_v10 = vpop.permute.xlu0 %5128 }
0x2345   :  { %v5133_v8 = vadd.f32 %v5129_v10, %v9689_v14  ;;  %v7422_v10 = vld [vmem:[%s10389_s4 + $0x30] ss:$0 sm:$0xff] }
0x2347   :  { %5144 = vrot.lane.b32.xlu0 %v5133_v8, %s8774_s26  ;;  %v5224_v11 = vpack.c.bf16 %v5133_v8, %v5132_v4 }
0x234b   :  { %5226 = vrot.lane.b32.xlu0 %v5224_v11, %s8774_s26 }
0x23b5   :  { %v5143_v6 = vpop.permute.xlu1 %5142 }
0x23b9   :  { %v5145_v12 = vpop.permute.xlu0 %5144 }
0x23ba   :  { %8332 = vmatprep.subr.mxu1 %v5145_v12 }
0x23bb   :  { %8333 = vmatpush3.msra.mxu1 %v5145_v12 }
0x23bc   :  { %8334 = vmatprep.subr.mxu1 %v5143_v6 }
0x23bd   :  { %8335 = vmatpush3.msra.mxu1 %v5143_v6  ;;  %v5227_v14 = vpop.permute.xlu0 %5226 }
0x23be   :  { %8337 = vmatmul.mubr.msk.f32.vlgmr.msra.gmra.mxu1 %vm399_vm3, %v9705_v1  ;;  %8339 = vmatprep.subr.bf16.mxu1 %v8768_v24  ;;  %v7424_v1 = vld [vmem:[%s10392_s7 + $0x54] sm:$0xf] }
0x23bf   :  { %8340 = vmatpush3.bf16.msra.mxu1 %v5232_v62  ;;  %8341 = vmatprep.mubr.msk.bf16.mxu1 %vm8769_vm4, %v8768_v24  ;;  %v5480_v56 = vsel %vm1248_vm5, %v7424_v1, 0  ;;  %v8640_v1 = vld [vmem:[%s10392_s7 + $0x88] sm:$0xff]  }
0x23c0   :  { %8351 = vmatprep.subr.mxu1 %v5145_v12 }
0x23c2   :  { %8342 = vmatmul.mubr.msk.bf16.vlgmr.msra.gmra.mxu1 %vm1244_vm6, %v5227_v14 }
0x23c3   :  { %8352 = vmatpush3.msra.mxu1 %v5145_v12  ;;  %8355 = vmatprep.mubr.msk.f32.mxu1 %vm399_vm3, %v9716_v20  ;;  %v5575_v20 = vsel %vm1248_vm5, %v7425_v16, 0 }
0x23c4   :  { %8353 = vmatprep.subr.mxu1 %v5143_v6 }
0x23c5   :  { %8354 = vmatpush3.msra.mxu1 %v5143_v6 }
0x23c6   :  { %8364 = vmatprep.subr.bf16.mxu1 %v8768_v24 }
0x23ca   :  { %8356 = vmatmul.mubr.msk.f32.vlgmr.msra.gmra.mxu1 %vm399_vm3, %v9724_v22  ;;  %v7410_v22 = vld [vmem:[%s10391_s6 + $0x60] sm:$0xf] }
0x23cb   :  { %8365 = vmatpush3.bf16.msra.mxu1 %v5480_v56  ;;  %8366 = vmatprep.mubr.msk.bf16.mxu1 %vm8769_vm4, %v8768_v24  ;;  %v5279_v17 = vsel %vm1248_vm5, %v7410_v22, 0 }
0x23cc   :  { %8376 = vmatprep.subr.bf16.mxu1 %v8768_v24  ;;  %8346 = vmatpush3.bf16.msra.mxu0 %v5279_v17  ;;  %v7431_v17 = vld [vmem:[%s10389_s4 + $0x31] ss:$0 sm:$0xff] }
0x23cd   :  { %8358 = vmatprep.subr.bf16.mxu0 %v8768_v24 }
0x23ce   :  { %8367 = vmatmul.mubr.msk.bf16.vlgmr.msra.gmra.mxu1 %vm1244_vm6, %v5475_v50 }
0x23cf   :  { %8377 = vmatpush3.bf16.msra.mxu1 %v5575_v20  ;;  %8378 = vmatprep.mubr.msk.bf16.mxu1 %vm8769_vm4, %v8768_v24 }
0x23d0   :  { %8388 = vmatprep.subr.mxu1 %v8768_v24 }
0x23d6   :  { %8379 = vmatmul.mubr.msk.bf16.vlgmr.msra.gmra.mxu1 %vm1244_vm6, %v5570_v0 }
0x23d7   :  { %8392 = vmatprep.mubr.msk.f32.mxu1 %vm8769_vm4, %v8768_v24 }
0x247e   :  { %v8338_v59 = vpop.f32.mrf.mxu1 }
0x2480   :  { %v5214_v50 = vpop.f32.mrf.mxu1 }
0x2481   :  { %v5223_v18 = vpack.c.bf16 %v8338_v59, %v5214_v50 }
0x2482   :  { %v5268_v21 = vpop.f32.mrf.mxu1 }
0x2483   :  { %8348 = vmatmul.mubr.msk.bf16.vlgmr.msra.gmra.mxu0 %vm1244_vm6, %v5223_v18 }
0x2484   :  { %v8343_v23 = vpop.f32.mrf.mxu1  ;;  %8359 = vmatpush3.bf16.msra.mxu0 %v5402_v19  ;;  %8360 = vmatprep.mubr.msk.bf16.mxu0 %vm8769_vm4, %v8768_v24 }
0x2485   :  { %8370 = vmatprep.subr.bf16.mxu0 %v8768_v24 }
0x2486   :  { %v5271_v25 = vpop.f32.mrf.mxu1 }
0x2488   :  { %v8344_v26 = vpop.f32.mrf.mxu1 }
0x248a   :  { %v8357_v27 = vpop.f32.mrf.mxu1 }
0x248c   :  { %v5388_v5 = vpop.f32.mrf.mxu1 }
0x248d   :  { %v5397_v29 = vpack.c.bf16 %v8357_v27, %v5388_v5  ;;  %v7432_v27 = vld [vmem:[%s10389_s4 + $0x32] ss:$0 sm:$0xff] }
0x248e   :  { %v5516_v31 = vpop.f32.mrf.mxu1 }
0x248f   :  { %8361 = vmatmul.mubr.msk.bf16.vlgmr.msra.gmra.mxu0 %vm1244_vm6, %v5397_v29 }
0x2490   :  { %v8368_v13 = vpop.f32.mrf.mxu1  ;;  %8371 = vmatpush3.bf16.msra.mxu0 %v5527_v30  ;;  %8372 = vmatprep.mubr.msk.bf16.mxu0 %vm8769_vm4, %v8768_v24  ;;  %v7433_v30 = vld [vmem:[%s10389_s4 + $0x33] ss:$0 sm:$0xff] }
0x2491   :  { %8382 = vmatprep.subr.bf16.mxu0 %v8768_v24 }
0x2492   :  { %v5519_v32 = vpop.f32.mrf.mxu1 }
0x2494   :  { %v8369_v33 = vpop.f32.mrf.mxu1 }
0x2495   :  { %v8641_v33 = vld [vmem:[%s10392_s7 + $0x80] sm:$0xff]  }
0x2496   :  { %v5611_v34 = vpop.f32.mrf.mxu1 }
0x2497   :  { %8373 = vmatmul.mubr.msk.bf16.vlgmr.msra.gmra.mxu0 %vm1244_vm6, %v9695_v15 }
0x2498   :  { %v8380_v35 = vpop.f32.mrf.mxu1  ;;  %8384 = vmatprep.mubr.msk.bf16.mxu0 %vm8769_vm4, %v8768_v24  ;;  %8383 = vmatpush3.bf16.msra.mxu0 %v5625_v39  ;;  %v8644_v39 = vld [vmem:[%s10392_s7 + $0xb0] sm:$0xff]  }
0x2499   :  { %8395 = vmatprep.subr.bf16.mxu0 %v8768_v24  ;;  %v8642_v35 = vld [vmem:[%s10393_s8 + $0x18] sm:$0xff]  }
0x249a   :  { %v5614_v36 = vpop.f32.mrf.mxu1 }
0x249c   :  { %v8381_v37 = vpop.f32.mrf.mxu1 }
0x2543   :  { %v5315_v40 = vpop.f32.mrf.mxu0 }
0x2544   :  { %v5316_v15 = vadd.f32 %v5315_v40, %v5268_v21  ;;  %v7439_v40 = vld [vmem:[%s10389_s4 + $0x34] ss:$0 sm:$0xff] }
0x2545   :  { %v8349_v41 = vpop.f32.mrf.mxu0 }
0x2547   :  { %v5318_v42 = vpop.f32.mrf.mxu0 }
0x2548   :  { %v5319_v55 = vadd.f32 %v5318_v42, %v5271_v25 }
0x2549   :  { %v8350_v43 = vpop.f32.mrf.mxu0 }
0x254f   :  { %v5438_v44 = vpop.f32.mrf.mxu0 }
0x2550   :  { %v5445_v54 = vadd.f32 %v5438_v44, %v5316_v15 }
0x2551   :  { %v8362_v46 = vpop.f32.mrf.mxu0 }
0x2552   :  { %v5452_v57 = vadd.f32 %v7420_v53, %v5445_v54  ;;  %v8717_v46 = vld [vmem:[%s10388_s3 + $0xf0] sm:$0xff] }
0x2553   :  { %v5441_v3 = vpop.f32.mrf.mxu0 }
0x2554   :  { %v5454_v58 = vmax.f32 %v5452_v57, 0.0  ;;  %v5446_v7 = vadd.f32 %v5441_v3, %v5319_v55 }
0x2555   :  { %v8363_v47 = vpop.f32.mrf.mxu0 }
0x2556   :  { %v5453_v49 = vadd.f32 %v7420_v53, %v5446_v7  ;;  %v5461_v48 = vmul.f32 %v7421_v9, %v5454_v58  ;;  %v7445_v58 = vld [vmem:[%s10389_s4 + $0x35] ss:$0 sm:$0xff] }
0x2557   :  { %v5563_v0 = vpop.f32.mrf.mxu0 }
0x2558   :  { %v5455_v4 = vmax.f32 %v5453_v49, 0.0  ;;  %v5468_v45 = vadd.f32 %v7422_v10, %v5461_v48  ;;  %v5564_v56 = vadd.f32 %v5563_v0, %v5516_v31 }
0x2559   :  { %v8374_v8 = vpop.f32.mrf.mxu0 }
0x255a   :  { %v5462_v11 = vmul.f32 %v7421_v9, %v5455_v4  ;;  %v5618_v20 = vadd.f32 %v5611_v34, %v5564_v56 }
0x255b   :  { %v5566_v12 = vpop.f32.mrf.mxu0 }
0x255c   :  { %v5469_v6 = vadd.f32 %v7422_v10, %v5462_v11  ;;  %v5567_v16 = vadd.f32 %v5566_v12, %v5519_v32  ;;  %v8716_v32 = vld [vmem:[%s10388_s3 + $0xe0] sm:$0xff]  ;;  %v8645_v11 = vld [vmem:[%s10393_s8 + $0x8] sm:$0xff]   ;;  %v8718_v12 = vld [vmem:[%s10388_s3 + $0xf8] sm:$0xff] }
0x255d   :  { %v8375_v62 = vpop.f32.mrf.mxu0 }
0x255e   :  { %v5620_v14 = vpack.c.bf16 %v5469_v6, %v5468_v45  ;;  %v5619_v18 = vadd.f32 %v5614_v36, %v5567_v16  ;;  %v8646_v45 = vld [vmem:[%s10393_s8] sm:$0xff]   ;;  %v8647_v6 = vld [vmem:[%s10393_s8 + $0x28] sm:$0xff]  }
0x255f   :  { %v8648_v62 = vld [vmem:[%s10393_s8 + $0x20] sm:$0xff]  }
0x2560   :  { %8385 = vmatmul.mubr.msk.bf16.vlgmr.msra.gmra.mxu0 %vm1244_vm6, %v5620_v14 }
0x2561   :  { %8399 = vmatprep.mubr.msk.bf16.mxu0 %vm8769_vm4, %v8768_v24  ;;  %8396 = vmatpush3.bf16.msra.mxu0 %v8640_v1 }
0x2562   :  { %8397 = vmatprep.subr.bf16.mxu0 %v8768_v24 }
0x2565   :  { %8398 = vmatpush3.bf16.msra.mxu0 %v8641_v33 }
0x2566   :  { %8414 = vmatprep.subr.bf16.mxu0 %v8768_v24 }
0x2620   :  { %v5661_v22 = vpop.f32.mrf.mxu0 }
0x2621   :  { %v5668_v59 = vadd.f32 %v5661_v22, %v5618_v20  ;;  %v9996_v22 = vld [vmem:[%s10393_s8 + $0x58] sm:$0xff]  }
0x2622   :  { %v8386_v51 = vpop.f32.mrf.mxu0 }
0x2623   :  { %v5675_v50 = vadd.f32 %v7431_v17, %v5668_v59 }
0x2624   :  { %v5664_v19 = vpop.f32.mrf.mxu0 }
0x2625   :  { %v5669_v21 = vadd.f32 %v5664_v19, %v5619_v18  ;;  %v5677_v25 = vmax.f32 %v5675_v50, 0.0  ;;  %v10003_v50 = vld [vmem:[%s10393_s8 + $0x50] sm:$0xff]   ;;  %v10012_v18 = vld [vmem:[%s10393_s8 + $0x48] sm:$0xff]   ;;  %v10020_v19 = vld [vmem:[%s10393_s8 + $0x40] sm:$0xff]  }
0x2626   :  { %v8387_v23 = vpop.f32.mrf.mxu0 }
0x2627   :  { %v5676_v26 = vadd.f32 %v7431_v17, %v5669_v21  ;;  %v5684_v5 = vmul.f32 %v7432_v27, %v5677_v25  ;;  %v10026_v21 = vld [vmem:[%s10393_s8 + $0x88] sm:$0xff]   ;;  %v10032_v23 = vld [vmem:[%s10393_s8 + $0x38] sm:$0xff]   ;;  %v10040_v25 = vld [vmem:[%s10393_s8 + $0x80] sm:$0xff]  }
0x2629   :  { %v5678_v28 = vmax.f32 %v5676_v26, 0.0  ;;  %v9911_v13 = vadd.f32 %v7433_v30, %v5684_v5  ;;  %v10046_v26 = vld [vmem:[%s10393_s8 + $0x30] sm:$0xff]   ;;  %v10069_v5 = vld [vmem:[%s10393_s8 + $0x68] sm:$0xff]  }
0x262b   :  { %v5685_v29 = vmul.f32 %v7432_v27, %v5678_v28  ;;  %v10054_v27 = vld [vmem:[%s10393_s8 + $0x78] sm:$0xff]   ;;  %v10062_v28 = vld [vmem:[%s10393_s8 + $0x70] sm:$0xff]  }
0x262d   :  { %v9909_v31 = vadd.f32 %v7433_v30, %v5685_v29  ;;  %v10076_v29 = vld [vmem:[%s10393_s8 + $0x60] sm:$0xff]  }
0x262f   :  { %8389 = vmatpush3.msra.mxu1 %v9909_v31 }
0x2630   :  { %8390 = vmatprep.subr.mxu1 %v8768_v24 }
0x2631   :  { %8391 = vmatpush3.msra.mxu1 %v9911_v13 }
0x2632   :  { %8393 = vmatmul.mubr.msk.f32.vlgmr.msra.gmra.mxu1 %vm399_vm3, %v8716_v32  ;;  %8403 = vmatprep.subr.bf16.mxu1 %v8768_v24 }
0x2633   :  { %8405 = vmatprep.mubr.msk.bf16.mxu1 %vm8769_vm4, %v8768_v24  ;;  %8404 = vmatpush3.bf16.msra.mxu1 %v8644_v39 }
0x26f2   :  { %v5759_v34 = vpop.f32.mrf.mxu1 }
0x26f3   :  { %v5768_v36 = vpack.c.bf16 %v5759_v34, %v5759_v34 }
0x26f4   :  { %v8394_v37 = vpop.f32.mrf.mxu1 }
0x26f5   :  { %8400 = vmatmul.mubr.msk.bf16.vlgmr.msra.gmra.mxu0 %vm85_vm1, %v5768_v36  ;;  %v7462_v36 = vld [vmem:[%s10389_s4 + $0x37] ss:$0 sm:$0xff] }
0x26f6   :  { %8415 = vmatpush3.bf16.msra.mxu0 %v8642_v35  ;;  %8418 = vmatprep.mubr.msk.bf16.mxu0 %vm8769_vm4, %v8768_v24 }
0x26f7   :  { %8416 = vmatprep.subr.bf16.mxu0 %v8768_v24 }
0x26fa   :  { %8417 = vmatpush3.bf16.msra.mxu0 %v8643_v60 }
0x26fb   :  { %8430 = vmatprep.subr.bf16.mxu0 %v8768_v24 }
0x26fd   :  { %8419 = vmatmul.mubr.msk.bf16.vlgmr.msra.gmra.mxu0 %vm85_vm1, %v9663_v63 }
0x26fe   :  { %8434 = vmatprep.mubr.msk.bf16.mxu0 %vm8769_vm4, %v8768_v24  ;;  %8431 = vmatpush3.bf16.msra.mxu0 %v8647_v6 }
0x26ff   :  { %8432 = vmatprep.subr.bf16.mxu0 %v8768_v24 }
0x2702   :  { %8433 = vmatpush3.bf16.msra.mxu0 %v8648_v62 }
0x2703   :  { %8454 = vmatprep.subr.bf16.mxu0 %v8768_v24 }
0x27b5   :  { %v5823_v41 = vpop.f32.mrf.mxu0 }
0x27b6   :  { %v5824_v42 = vadd.f32 %v7439_v40, %v5823_v41  ;;  %v7463_v40 = vld [vmem:[%s10389_s4 + $0x38] ss:$0 sm:$0xff] }
0x27b7   :  { %v8401_v43 = vpop.f32.mrf.mxu0 }
0x27b8   :  { %v5829_v15 = vmax.f32 %v5824_v42, 0.0 }
0x27b9   :  { %v5826_v44 = vpop.f32.mrf.mxu0 }
0x27ba   :  { %v5833_v53 = vpack.c.bf16 %v5829_v15, %v5829_v15 }
0x27bb   :  { %v8402_v54 = vpop.f32.mrf.mxu0 }
0x27bc   :  { %8406 = vmatmul.mubr.msk.bf16.vlgmr.msra.gmra.mxu1 %vm399_vm3, %v5833_v53 }
0x27bd   :  { %v9949_v63 = vpop.f32.mrf.mxu0  ;;  %8411 = vmatprep.mubr.msk.f32.mxu1 %vm2616_vm7, %v8717_v46 }
0x27bf   :  { %v8420_v55 = vpop.f32.mrf.mxu0 }
0x27c1   :  { %v9955_v57 = vpop.f32.mrf.mxu0 }
0x27c3   :  { %v8421_v3 = vpop.f32.mrf.mxu0 }
0x287c   :  { %v5882_v7 = vpop.f32.mrf.mxu1 }
0x287d   :  { %v5883_v9 = vadd.f32 %v7445_v58, %v5882_v7 }
0x287e   :  { %v8407_v47 = vpop.f32.mrf.mxu1 }
0x287f   :  { %v7448_v49 = vmul.f32 -1.442695, %v5883_v9 }
0x2880   :  { %v5885_v0 = vpop.f32.mrf.mxu1 }
0x2881   :  { %8692 = vpow2.f32 %v7448_v49  ;;  %v10105_v49 = vld [vmem:[%s10393_s8 + $0xb8] sm:$0xff]  }
0x2882   :  { %v8408_v48 = vpop.f32.mrf.mxu1 }
0x288e   :  { %v8693_v4 = vpop.eup %8692 }
0x288f   :  { %v5891_v10 = vadd.f32 1.0, %v8693_v4 }
0x2891   :  { %8694 = vrcp.f32 %v5891_v10  ;;  %v10113_v10 = vld [vmem:[%s10393_s8 + $0xb0] sm:$0xff]  }
0x289e   :  { %v8695_v8 = vpop.eup %8694 }
0x289f   :  { %8409 = vmatprep.subr.msk.mxu1 %vm2623_vm8, %v8695_v8 }
0x28a0   :  { %8410 = vmatpush3.msk.msra.mxu1 %vm2623_vm8, %v8695_v8 }
0x28a1   :  { %8412 = vmatmul.mubr.msk.f32.vlgmr.msra.gmra.mxu1 %vm2616_vm7, %v8718_v12  ;;  %8422 = vmatprep.subr.bf16.mxu1 %v8768_v24 }
0x28a2   :  { %8423 = vmatpush3.bf16.msra.mxu1 %v8645_v11  ;;  %8426 = vmatprep.mubr.msk.bf16.mxu1 %vm8769_vm4, %v8768_v24 }
0x28a3   :  { %8424 = vmatprep.subr.bf16.mxu1 %v8768_v24 }
0x28a6   :  { %8425 = vmatpush3.bf16.msra.mxu1 %v8646_v45  ;;  %v10123_v45 = vld [vmem:[%s10393_s8 + $0xa8] sm:$0xff]  }
0x28a7   :  { %8438 = vmatprep.subr.bf16.mxu1 %v8768_v24 }
0x28a9   :  { %8427 = vmatmul.mubr.msk.bf16.vlgmr.msra.gmra.mxu1 %vm85_vm1, %v9372_v52 }
0x28aa   :  { %8450 = vmatprep.mubr.msk.bf16.mxu1 %vm8769_vm4, %v8768_v24  ;;  %8439 = vmatpush3.bf16.msra.mxu1 %v10026_v21 }
0x28ab   :  { %8440 = vmatprep.subr.bf16.mxu1 %v8768_v24 }
0x28ae   :  { %8441 = vmatpush3.bf16.msra.mxu1 %v10040_v25 }
0x28af   :  { %8442 = vmatprep.subr.bf16.mxu1 %v8768_v24 }
0x28b2   :  { %8443 = vmatpush3.bf16.msra.mxu1 %v10054_v27 }
0x28b3   :  { %8444 = vmatprep.subr.bf16.mxu1 %v8768_v24 }
0x28b6   :  { %8445 = vmatpush3.bf16.msra.mxu1 %v10062_v28 }
0x28b7   :  { %8446 = vmatprep.subr.bf16.mxu1 %v8768_v24 }
0x28ba   :  { %8447 = vmatpush3.bf16.msra.mxu1 %v10069_v5 }
0x28bb   :  { %8448 = vmatprep.subr.bf16.mxu1 %v8768_v24 }
0x28be   :  { %8449 = vmatpush3.bf16.msra.mxu1 %v10076_v29 }
0x28bf   :  { %8470 = vmatprep.subr.bf16.mxu1 %v8768_v24 }
0x2961   :  { %v8413_v14 = vpop.f32.mrf.mxu1 }
0x2962   :  { %v5973_v52 = vmul.f32 %v8413_v14, %v9909_v31  ;;  %v10130_v14 = vld [vmem:[%s10393_s8 + $0xa0] sm:$0xff]  }
0x2963   :  { %v5963_v1 = vpop.f32.mrf.mxu1 }
0x2964   :  { %v5972_v56 = vmul.f32 %v5963_v1, %v9911_v13  ;;  %v5975_v16 = vadd.f32 %v5973_v52, %v9656_v38  ;;  %v7461_v13 = vld [vmem:[%s10389_s4 + $0x36] ss:$0 sm:$0xff] }
0x2966   :  { %v5974_v20 = vadd.f32 %v5972_v56, %v9659_v61  ;;  %v10137_v56 = vld [vmem:[%s10393_s8 + $0x98] sm:$0xff]  }
0x2968   :  { %v6094_v17 = vpack.c.bf16 %v5975_v16, %v5974_v20 }
0x2969   :  { %v6083_v59 = vpop.f32.mrf.mxu1 }
0x296a   :  { %8435 = vmatmul.mubr.msk.bf16.vlgmr.msra.gmra.mxu0 %vm85_vm1, %v6094_v17  ;;  %v6084_v30 = vadd.f32 %v6083_v59, %v9949_v63  ;;  %v10144_v17 = vld [vmem:[%s10393_s8 + $0x90] sm:$0xff]  }
0x296b   :  { %v8428_v51 = vpop.f32.mrf.mxu1  ;;  %8455 = vmatpush3.bf16.msra.mxu0 %v9996_v22  ;;  %8466 = vmatprep.mubr.msk.bf16.mxu0 %vm8769_vm4, %v8768_v24 }
0x296c   :  { %8456 = vmatprep.subr.bf16.mxu0 %v8768_v24 }
0x296d   :  { %v6086_v38 = vpop.f32.mrf.mxu1 }
0x296e   :  { %v6087_v34 = vadd.f32 %v6086_v38, %v9955_v57 }
0x296f   :  { %v8429_v61 = vpop.f32.mrf.mxu1  ;;  %8457 = vmatpush3.bf16.msra.mxu0 %v10003_v50 }
0x2970   :  { %8458 = vmatprep.subr.bf16.mxu0 %v8768_v24 }
0x2973   :  { %8459 = vmatpush3.bf16.msra.mxu0 %v10012_v18 }
0x2974   :  { %8460 = vmatprep.subr.bf16.mxu0 %v8768_v24 }
0x2977   :  { %8461 = vmatpush3.bf16.msra.mxu0 %v10020_v19 }
0x2978   :  { %8462 = vmatprep.subr.bf16.mxu0 %v8768_v24 }
0x297b   :  { %8463 = vmatpush3.bf16.msra.mxu0 %v10032_v23 }
0x297c   :  { %8464 = vmatprep.subr.bf16.mxu0 %v8768_v24 }
0x297f   :  { %8465 = vmatpush3.bf16.msra.mxu0 %v10046_v26 }
0x2980   :  { %8486 = vmatprep.subr.bf16.mxu0 %v8768_v24 }
0x2a2a   :  { %v6144_v31 = vpop.f32.mrf.mxu0 }
0x2a2b   :  { %v6151_v32 = vadd.f32 %v6144_v31, %v6084_v30 }
0x2a2c   :  { %v8436_v33 = vpop.f32.mrf.mxu0 }
0x2a2d   :  { %v6158_v35 = vadd.f32 %v7461_v13, %v6151_v32 }
0x2a2e   :  { %v6147_v37 = vpop.f32.mrf.mxu0 }
0x2a2f   :  { %v6160_v60 = vmax.f32 %v6158_v35, 0.0  ;;  %v6152_v39 = vadd.f32 %v6147_v37, %v6087_v34 }
0x2a30   :  { %v8437_v41 = vpop.f32.mrf.mxu0 }
0x2a31   :  { %v6167_v42 = vmul.f32 %v7462_v36, %v6160_v60  ;;  %v6159_v43 = vadd.f32 %v7461_v13, %v6152_v39  ;;  %v10155_v13 = vld [vmem:[%s10393_s8 + $0xc0] sm:$0xff]  }
0x2a33   :  { %v10091_v15 = vadd.f32 %v7463_v40, %v6167_v42  ;;  %v6161_v44 = vmax.f32 %v6159_v43, 0.0 }
0x2a35   :  { %v6244_v53 = vsel %vm6243_vm9, %v10091_v15, 0.0  ;;  %v6168_v54 = vmul.f32 %v7462_v36, %v6161_v44  ;;  %v6271_v63 = vpack.c.bf16 %v10091_v15, %v10091_v15  ;;  %v10164_v44 = vld [vmem:[%s10389_s4 + $0x39] ss:$0 sm:$0xff] }
0x2a36   :  { %v6245_v46 = vrot.slane %v6244_v53, 4 }
0x2a37   :  { %v10097_v55 = vadd.f32 %v7463_v40, %v6168_v54  ;;  %8467 = vmatmul.mubr.msk.bf16.vlgmr.msra.gmra.mxu0 %vm6243_vm9, %v6271_v63 }
0x2a38   :  { %v6246_v57 = vadd.f32 %v6245_v46, %v6244_v53  ;;  %8488 = vmatprep.mubr.msk.bf16.mxu0 %vm8769_vm4, %v8768_v24  ;;  %8487 = vmatpush3.bf16.msra.mxu0 %v10155_v13 }
0x2a39   :  { %8492 = vmatprep.subr.bf16.mxu0 %v8768_v24 }
0x2a3a   :  { %v6247_v3 = vrot.slane %v6246_v57, 2 }
0x2a3c   :  { %v6248_v58 = vadd.f32 %v6247_v3, %v6246_v57  ;;  %v10170_v57 = vld [vmem:[%s10389_s4 + $0x3a] ss:$0 sm:$0xff] }
0x2a3e   :  { %v6249_v7 = vrot.slane %v6248_v58, 1 }
0x2a40   :  { %v6250_v9 = vadd.f32 %v6249_v7, %v6248_v58  ;;  %v10175_v7 = vld [vmem:[%s10389_s4 + $0x3b] ss:$0 sm:$0xff] }
0x2a42   :  { %v6252_v47 = vmul.f32 0.125, %v6250_v9 }
0x2a44   :  { %v6253_v0 = vsub.f32 %v10091_v15, %v6252_v47  ;;  %v6272_v48 = vpack.c.bf16 %v6252_v47, %v6252_v47 }
0x2a46   :  { %v6254_v4 = vmul.f32 %v6253_v0, %v6253_v0  ;;  %8451 = vmatmul.mubr.msk.bf16.vlgmr.msra.gmra.mxu1 %vm6243_vm9, %v6272_v48 }
0x2a47   :  { %8471 = vmatpush3.bf16.msra.mxu1 %v10105_v49  ;;  %8482 = vmatprep.mubr.msk.bf16.mxu1 %vm8769_vm4, %v8768_v24 }
0x2a48   :  { %v6255_v8 = vsel %vm6243_vm9, %v6254_v4, 0.0  ;;  %8472 = vmatprep.subr.bf16.mxu1 %v8768_v24  ;;  %v10185_v4 = vld [vmem:[%s10393_s8 + $0xf0] sm:$0xff]  }
0x2a49   :  { %v6256_v11 = vrot.slane %v6255_v8, 4 }
0x2a4b   :  { %v6257_v12 = vadd.f32 %v6256_v11, %v6255_v8  ;;  %8473 = vmatpush3.bf16.msra.mxu1 %v10113_v10  ;;  %v10192_v8 = vld [vmem:[%s10393_s8 + $0xe8] sm:$0xff]   ;;  %v10199_v11 = vld [vmem:[%s10393_s8 + $0xe0] sm:$0xff]  }
0x2a4c   :  { %8474 = vmatprep.subr.bf16.mxu1 %v8768_v24 }
0x2a4d   :  { %v6258_v6 = vrot.slane %v6257_v12, 2 }
0x2a4f   :  { %v6259_v62 = vadd.f32 %v6258_v6, %v6257_v12  ;;  %8475 = vmatpush3.bf16.msra.mxu1 %v10123_v45  ;;  %v10206_v12 = vld [vmem:[%s10393_s8 + $0xd8] sm:$0xff]   ;;  %v10213_v6 = vld [vmem:[%s10393_s8 + $0xd0] sm:$0xff]  }
0x2a50   :  { %8476 = vmatprep.subr.bf16.mxu1 %v8768_v24 }
0x2a51   :  { %v6260_v52 = vrot.slane %v6259_v62, 1 }
0x2a53   :  { %v6261_v1 = vadd.f32 %v6260_v52, %v6259_v62  ;;  %8477 = vmatpush3.bf16.msra.mxu1 %v10130_v14  ;;  %v10220_v62 = vld [vmem:[%s10393_s8 + $0xc8] sm:$0xff]   ;;  %v10227_v52 = vld [vmem:[%s10393_s8 + $0x120] sm:$0xff]  }
0x2a54   :  { %8478 = vmatprep.subr.bf16.mxu1 %v8768_v24 }
0x2a55   :  { %v6262_v16 = vmul.f32 0.125, %v6261_v1  ;;  %v10234_v1 = vld [vmem:[%s10393_s8 + $0x118] sm:$0xff]  }
0x2a57   :  { %v6263_v20 = vmax.f32 %v6262_v16, 1e-12  ;;  %8479 = vmatpush3.bf16.msra.mxu1 %v10137_v56  ;;  %v10241_v16 = vld [vmem:[%s10393_s8 + $0x110] sm:$0xff]  }
0x2a58   :  { %8480 = vmatprep.subr.bf16.mxu1 %v8768_v24 }
0x2a59   :  { %8696 = vrsqrt.f32 %v6263_v20  ;;  %vm6266_vm10 = vcmp.eq.f32.partialorder %v6263_v20, inf  ;;  %v6269_v38 = vand.u32 2147483648, %v6263_v20  ;;  %vm6268_vm11 = vcmp.eq.f32.partialorder %v6263_v20, 0.0 }
0x2a5b   :  { %8481 = vmatpush3.bf16.msra.mxu1 %v10144_v17 }
0x2a5c   :  { %8508 = vmatprep.subr.bf16.mxu1 %v8768_v24 }
0x2a66   :  { %v8697_v59 = vpop.eup %8696 }
0x2a67   :  { %v6265_v51 = vmul.f32 %v8697_v59, %v6263_v20  ;;  %v10254_v59 = vld [vmem:[%s10393_s8 + $0x100] sm:$0xff]  }
0x2a69   :  { %v6267_v61 = vsel %vm6266_vm10, %v6263_v20, %v6265_v51  ;;  %v10247_v20 = vld [vmem:[%s10393_s8 + $0x108] sm:$0xff]   ;;  %v10261_v51 = vld [vmem:[%s10393_s8 + $0xf8] sm:$0xff]  }
0x2a6a   :  { %v6270_v30 = vsel %vm6268_vm11, %v6269_v38, %v6267_v61  ;;  %v10269_v38 = vld [vmem:[%s10389_s4 + $0x3c] ss:$0 sm:$0xff] }
0x2a6b   :  { %v6435_v31 = vpack.c.bf16 %v6270_v30, %v6270_v30 }
0x2a6d   :  { %8483 = vmatmul.mubr.msk.bf16.vlgmr.msra.gmra.mxu1 %vm6243_vm9, %v6435_v31 }
0x2a6e   :  { %8520 = vmatprep.mubr.msk.bf16.mxu1 %vm8769_vm4, %v8768_v24  ;;  %8509 = vmatpush3.bf16.msra.mxu1 %v10185_v4 }
0x2a6f   :  { %8510 = vmatprep.subr.bf16.mxu1 %v8768_v24 }
0x2a72   :  { %8511 = vmatpush3.bf16.msra.mxu1 %v10192_v8 }
0x2a73   :  { %8512 = vmatprep.subr.bf16.mxu1 %v8768_v24 }
0x2a76   :  { %8513 = vmatpush3.bf16.msra.mxu1 %v10199_v11 }
0x2a77   :  { %8514 = vmatprep.subr.bf16.mxu1 %v8768_v24 }
0x2a7a   :  { %8515 = vmatpush3.bf16.msra.mxu1 %v10206_v12 }
0x2a7b   :  { %8516 = vmatprep.subr.bf16.mxu1 %v8768_v24 }
0x2a7e   :  { %8517 = vmatpush3.bf16.msra.mxu1 %v10213_v6 }
0x2a7f   :  { %8518 = vmatprep.subr.bf16.mxu1 %v8768_v24 }
0x2a82   :  { %8519 = vmatpush3.bf16.msra.mxu1 %v10220_v62 }
0x2a83   :  { %8540 = vmatprep.subr.bf16.mxu1 %v8768_v24 }
0x2af7   :  { %v6429_v32 = vpop.f32.mrf.mxu0 }
0x2af9   :  { %v8468_v33 = vpop.f32.mrf.mxu0 }
0x2afb   :  { %v6432_v34 = vpop.f32.mrf.mxu0 }
0x2afd   :  { %v8469_v35 = vpop.f32.mrf.mxu0 }
0x2b06   :  { %v6346_v36 = vpop.f32.mrf.mxu1 }
0x2b07   :  { %v6355_v40 = vrot.slane %v6346_v36, %v8831_v2 }
0x2b08   :  { %v8452_v37 = vpop.f32.mrf.mxu1 }
0x2b09   :  { %v6430_v42 = vadd.f32 %v6429_v32, %v6355_v40 }
0x2b0a   :  { %v6349_v60 = vpop.f32.mrf.mxu1 }
0x2b0c   :  { %v8453_v39 = vpop.f32.mrf.mxu1 }
0x2b2d   :  { %v6509_v41 = vpop.f32.mrf.mxu1 }
0x2b2e   :  { %v6518_v43 = vrot.slane %v6509_v41, %v8831_v2 }
0x2b2f   :  { %v8484_v53 = vpop.f32.mrf.mxu1 }
0x2b30   :  { %v6519_v54 = vadd.f32 %v6518_v43, %v6430_v42 }
0x2b31   :  { %v6512_v63 = vpop.f32.mrf.mxu1 }
0x2b32   :  { %v6524_v46 = vadd.f32 %v10164_v44, %v6519_v54 }
0x2b33   :  { %v8485_v3 = vpop.f32.mrf.mxu1 }
0x2b34   :  { %v6525_v58 = vmax.f32 %v6524_v46, 0.0 }
0x2b36   :  { %v6530_v9 = vmul.f32 %v10170_v57, %v6525_v58 }
0x2b38   :  { %v6535_v47 = vadd.f32 %v10175_v7, %v6530_v9 }
0x2b3a   :  { %8698 = vtanh.f32 %v6535_v47 }
0x2b47   :  { %v8699_v0 = vpop.eup %8698 }
0x2b48   :  { %v6537_v48 = vpack.c.bf16 %v8699_v0, %v8699_v0 }
0x2b4a   :  { %8489 = vmatmul.mubr.msk.bf16.vlgmr.msra.gmra.mxu0 %vm399_vm3, %v6537_v48 }
0x2b4b   :  { %8504 = vmatprep.mubr.msk.bf16.mxu0 %vm8769_vm4, %v8768_v24  ;;  %8493 = vmatpush3.bf16.msra.mxu0 %v10227_v52 }
0x2b4c   :  { %8494 = vmatprep.subr.bf16.mxu0 %v8768_v24 }
0x2b4f   :  { %8495 = vmatpush3.bf16.msra.mxu0 %v10234_v1 }
0x2b50   :  { %8496 = vmatprep.subr.bf16.mxu0 %v8768_v24 }
0x2b53   :  { %8497 = vmatpush3.bf16.msra.mxu0 %v10241_v16 }
0x2b54   :  { %8498 = vmatprep.subr.bf16.mxu0 %v8768_v24 }
0x2b57   :  { %8499 = vmatpush3.bf16.msra.mxu0 %v10247_v20 }
0x2b58   :  { %8500 = vmatprep.subr.bf16.mxu0 %v8768_v24 }
0x2b5b   :  { %8501 = vmatpush3.bf16.msra.mxu0 %v10254_v59 }
0x2b5c   :  { %8502 = vmatprep.subr.bf16.mxu0 %v8768_v24 }
0x2b5f   :  { %8503 = vmatpush3.bf16.msra.mxu0 %v10261_v51 }
0x2b60   :  { %8524 = vmatprep.subr.bf16.mxu0 %v8768_v24 }
0x2c0a   :  { %v6585_v61 = vpop.f32.mrf.mxu0 }
0x2c0b   :  { %v6586_v30 = vadd.f32 %v10269_v38, %v6585_v61  ;;  %v6797_v61 = vsel %vm6243_vm9, %v10097_v55, 0.0 }
0x2c0c   :  { %v8490_v31 = vpop.f32.mrf.mxu0 }
0x2c0d   :  { %v6591_v32 = vsel %vm6243_vm9, %v6586_v30, -inf }
0x2c0e   :  { %v6592_v33 = vrot.slane %v6591_v32, 4  ;;  %v6588_v34 = vpop.f32.mrf.mxu0 }
0x2c10   :  { %v6593_v35 = vmax.f32 %v6591_v32, %v6592_v33  ;;  %v8491_v36 = vpop.f32.mrf.mxu0  ;;  %v6798_v32 = vrot.slane %v6797_v61, 4 }
0x2c12   :  { %v6594_v37 = vrot.slane %v6593_v35, 2 }
0x2c14   :  { %v6595_v60 = vmax.f32 %v6593_v35, %v6594_v37  ;;  %v6799_v35 = vadd.f32 %v6798_v32, %v6797_v61 }
0x2c16   :  { %v6596_v39 = vrot.slane %v6595_v60, 1 }
0x2c18   :  { %v6597_v40 = vmax.f32 %v6595_v60, %v6596_v39  ;;  %v6800_v60 = vrot.slane %v6799_v35, 2 }
0x2c1a   :  { %v6598_v41 = vsub.f32 %v6586_v30, %v6597_v40 }
0x2c1c   :  { %v6599_v42 = vmul.f32 1.442695, %v6598_v41 }
0x2c1e   :  { %8700 = vpow2.f32 %v6599_v42  ;;  %v6801_v42 = vadd.f32 %v6800_v60, %v6799_v35 }
0x2c2b   :  { %v8701_v43 = vpop.eup %8700 }
0x2c2c   :  { %v6601_v53 = vsel %vm6243_vm9, %v8701_v43, 0.0 }
0x2c2d   :  { %v6602_v54 = vrot.slane %v6601_v53, 4 }
0x2c2f   :  { %v6603_v63 = vadd.f32 %v6602_v54, %v6601_v53  ;;  %v6802_v54 = vrot.slane %v6801_v42, 1 }
0x2c31   :  { %v6604_v46 = vrot.slane %v6603_v63, 2 }
0x2c33   :  { %v6605_v3 = vadd.f32 %v6604_v46, %v6603_v63 }
0x2c35   :  { %v6606_v58 = vrot.slane %v6605_v3, 1 }
0x2c37   :  { %v6607_v9 = vadd.f32 %v6606_v58, %v6605_v3  ;;  %v6803_v3 = vadd.f32 %v6802_v54, %v6801_v42 }
0x2c39   :  { %8702 = vrcp.f32 %v6607_v9  ;;  %v6804_v9 = vmul.f32 0.125, %v6803_v3 }
0x2c46   :  { %v8703_v47 = vpop.eup %8702 }
0x2c47   :  { %v6609_v0 = vmul.f32 %v8703_v47, %v8701_v43 }
0x2c49   :  { %v6610_v48 = vmul.f32 %v6609_v0, %v10091_v15 }
0x2c4b   :  { %v6611_v30 = vsel %vm6243_vm9, %v6610_v48, 0.0  ;;  %v6805_v48 = vsub.f32 %v10097_v55, %v6804_v9 }
0x2c4c   :  { %v6612_v31 = vrot.slane %v6611_v30, 4 }
0x2c4d   :  { %v6806_v61 = vmul.f32 %v6805_v48, %v6805_v48 }
0x2c4e   :  { %v6613_v33 = vadd.f32 %v6612_v31, %v6611_v30 }
0x2c50   :  { %v6614_v34 = vrot.slane %v6613_v33, 2 }
0x2c52   :  { %v6615_v36 = vadd.f32 %v6614_v34, %v6613_v33 }
0x2c54   :  { %v6616_v37 = vrot.slane %v6615_v36, 1 }
0x2c56   :  { %v6617_v39 = vadd.f32 %v6616_v37, %v6615_v36 }
0x2c58   :  { %v6618_v40 = vsub.f32 %v10091_v15, %v6617_v39  ;;  %v6636_v41 = vpack.c.bf16 %v6617_v39, %v6617_v39 }
0x2c5a   :  { %v6619_v43 = vmul.f32 %v6618_v40, %v6609_v0  ;;  %8521 = vmatmul.mubr.msk.bf16.vlgmr.msra.gmra.mxu1 %vm6243_vm9, %v6636_v41 }
0x2c5b   :  { %8541 = vmatpush3.bf16.msra.mxu1 %v9996_v22  ;;  %8552 = vmatprep.mubr.msk.bf16.mxu1 %vm8769_vm4, %v8768_v24 }
0x2c5c   :  { %v6620_v53 = vmul.f32 %v6619_v43, %v6618_v40  ;;  %8542 = vmatprep.subr.bf16.mxu1 %v8768_v24 }
0x2c5e   :  { %v6621_v63 = vsel %vm6243_vm9, %v6620_v53, 0.0 }
0x2c5f   :  { %v6622_v46 = vrot.slane %v6621_v63, 4  ;;  %8543 = vmatpush3.bf16.msra.mxu1 %v10003_v50 }
0x2c60   :  { %8544 = vmatprep.subr.bf16.mxu1 %v8768_v24 }
0x2c61   :  { %v6623_v15 = vadd.f32 %v6622_v46, %v6621_v63 }
0x2c63   :  { %v6624_v58 = vrot.slane %v6623_v15, 2  ;;  %8545 = vmatpush3.bf16.msra.mxu1 %v10012_v18  ;;  %v6823_v18 = vpack.c.bf16 %v10097_v55, %v10097_v55 }
0x2c64   :  { %8546 = vmatprep.subr.bf16.mxu1 %v8768_v24 }
0x2c65   :  { %v6625_v22 = vadd.f32 %v6624_v58, %v6623_v15 }
0x2c67   :  { %v6626_v47 = vrot.slane %v6625_v22, 1  ;;  %8547 = vmatpush3.bf16.msra.mxu1 %v10020_v19  ;;  %v6807_v19 = vsel %vm6243_vm9, %v6806_v61, 0.0 }
0x2c68   :  { %8548 = vmatprep.subr.bf16.mxu1 %v8768_v24 }
0x2c69   :  { %v6627_v0 = vadd.f32 %v6626_v47, %v6625_v22 }
0x2c6b   :  { %v6628_v50 = vmax.f32 %v6627_v0, 1e-12  ;;  %8549 = vmatpush3.bf16.msra.mxu1 %v10032_v23  ;;  %v6808_v23 = vrot.slane %v6807_v19, 4 }
0x2c6c   :  { %8550 = vmatprep.subr.bf16.mxu1 %v8768_v24 }
0x2c6d   :  { %8704 = vrsqrt.f32 %v6628_v50  ;;  %v6809_v30 = vadd.f32 %v6808_v23, %v6807_v19  ;;  %vm6631_vm12 = vcmp.eq.f32.partialorder %v6628_v50, inf  ;;  %v6634_v32 = vand.u32 2147483648, %v6628_v50 }
0x2c6e   :  { %vm6633_vm13 = vcmp.eq.f32.partialorder %v6628_v50, 0.0 }
0x2c6f   :  { %8551 = vmatpush3.bf16.msra.mxu1 %v10046_v26  ;;  %v6810_v33 = vrot.slane %v6809_v30, 2 }
0x2c70   :  { %8572 = vmatprep.subr.bf16.mxu1 %v8768_v24 }
0x2c71   :  { %v6811_v37 = vadd.f32 %v6810_v33, %v6809_v30 }
0x2c72   :  { %8553 = vmatmul.mubr.msk.bf16.vlgmr.msra.gmra.mxu1 %vm6243_vm9, %v6823_v18 }
0x2c73   :  { %8573 = vmatpush3.bf16.msra.mxu1 %v10155_v13  ;;  %8574 = vmatprep.mubr.msk.bf16.mxu1 %vm8769_vm4, %v8768_v24  ;;  %v6812_v13 = vrot.slane %v6811_v37, 1 }
0x2c74   :  { %8578 = vmatprep.subr.bf16.mxu1 %v8768_v24 }
0x2c75   :  { %v6813_v60 = vadd.f32 %v6812_v13, %v6811_v37 }
0x2c77   :  { %v6814_v39 = vmul.f32 0.125, %v6813_v60 }
0x2c7a   :  { %v8705_v31 = vpop.eup %8704 }
0x2c7b   :  { %v6630_v26 = vmul.f32 %v8705_v31, %v6628_v50 }
0x2c7d   :  { %v6632_v34 = vsel %vm6631_vm12, %v6628_v50, %v6630_v26 }
0x2c7e   :  { %v6635_v35 = vsel %vm6633_vm13, %v6634_v32, %v6632_v34 }
0x2c7f   :  { %v6637_v36 = vpack.c.bf16 %v6635_v35, %v6635_v35 }
0x2c81   :  { %8505 = vmatmul.mubr.msk.bf16.vlgmr.msra.gmra.mxu0 %vm6243_vm9, %v6637_v36 }
0x2c82   :  { %8525 = vmatpush3.bf16.msra.mxu0 %v10026_v21  ;;  %8536 = vmatprep.mubr.msk.bf16.mxu0 %vm8769_vm4, %v8768_v24  ;;  %v6815_v21 = vmax.f32 %v6814_v39, 1e-12 }
0x2c83   :  { %8526 = vmatprep.subr.bf16.mxu0 %v8768_v24 }
0x2c84   :  { %8706 = vrsqrt.f32 %v6815_v21  ;;  %vm6818_vm14 = vcmp.eq.f32.partialorder %v6815_v21, inf  ;;  %vm6820_vm15 = vcmp.eq.f32.partialorder %v6815_v21, 0.0 }
0x2c86   :  { %8527 = vmatpush3.bf16.msra.mxu0 %v10040_v25  ;;  %v6824_v25 = vpack.c.bf16 %v6804_v9, %v6804_v9 }
0x2c87   :  { %8528 = vmatprep.subr.bf16.mxu0 %v8768_v24 }
0x2c8a   :  { %8529 = vmatpush3.bf16.msra.mxu0 %v10054_v27 }
0x2c8b   :  { %8530 = vmatprep.subr.bf16.mxu0 %v8768_v24 }
0x2c8e   :  { %8531 = vmatpush3.bf16.msra.mxu0 %v10062_v28 }
0x2c8f   :  { %8532 = vmatprep.subr.bf16.mxu0 %v8768_v24 }
0x2c91   :  { %v8707_v27 = vpop.eup %8706 }
0x2c92   :  { %8533 = vmatpush3.bf16.msra.mxu0 %v10069_v5  ;;  %v6817_v28 = vmul.f32 %v8707_v27, %v6815_v21 }
0x2c93   :  { %8534 = vmatprep.subr.bf16.mxu0 %v8768_v24 }
0x2c94   :  { %v6819_v5 = vsel %vm6818_vm14, %v6815_v21, %v6817_v28 }
0x2c96   :  { %8535 = vmatpush3.bf16.msra.mxu0 %v10076_v29  ;;  %v6821_v29 = vand.u32 2147483648, %v6815_v21 }
0x2c97   :  { %8556 = vmatprep.subr.bf16.mxu0 %v8768_v24 }
0x2c99   :  { %8537 = vmatmul.mubr.msk.bf16.vlgmr.msra.gmra.mxu0 %vm6243_vm9, %v6824_v25 }
0x2c9a   :  { %8557 = vmatpush3.bf16.msra.mxu0 %v10105_v49  ;;  %8568 = vmatprep.mubr.msk.bf16.mxu0 %vm8769_vm4, %v8768_v24  ;;  %v6822_v49 = vsel %vm6820_vm15, %v6821_v29, %v6819_v5 }
0x2c9b   :  { %8558 = vmatprep.subr.bf16.mxu0 %v8768_v24 }
0x2c9e   :  { %8559 = vmatpush3.bf16.msra.mxu0 %v10113_v10  ;;  %v6915_v10 = vpack.c.bf16 %v6822_v49, %v6822_v49 }
0x2c9f   :  { %8560 = vmatprep.subr.bf16.mxu0 %v8768_v24 }
0x2ca2   :  { %8561 = vmatpush3.bf16.msra.mxu0 %v10123_v45 }
0x2ca3   :  { %8562 = vmatprep.subr.bf16.mxu0 %v8768_v24 }
0x2ca6   :  { %8563 = vmatpush3.bf16.msra.mxu0 %v10130_v14 }
0x2ca7   :  { %8564 = vmatprep.subr.bf16.mxu0 %v8768_v24 }
0x2caa   :  { %8565 = vmatpush3.bf16.msra.mxu0 %v10137_v56 }
0x2cab   :  { %8566 = vmatprep.subr.bf16.mxu0 %v8768_v24 }
0x2cae   :  { %8567 = vmatpush3.bf16.msra.mxu0 %v10144_v17 }
0x2caf   :  { %8594 = vmatprep.subr.bf16.mxu0 %v8768_v24 }
0x2cb1   :  { %8569 = vmatmul.mubr.msk.bf16.vlgmr.msra.gmra.mxu0 %vm6243_vm9, %v6915_v10 }
0x2cb2   :  { %8595 = vmatpush3.bf16.msra.mxu0 %v10185_v4  ;;  %8606 = vmatprep.mubr.msk.bf16.mxu0 %vm8769_vm4, %v8768_v24 }
0x2cb3   :  { %8596 = vmatprep.subr.bf16.mxu0 %v8768_v24 }
0x2cb6   :  { %8597 = vmatpush3.bf16.msra.mxu0 %v10192_v8 }
0x2cb7   :  { %8598 = vmatprep.subr.bf16.mxu0 %v8768_v24 }
0x2cba   :  { %8599 = vmatpush3.bf16.msra.mxu0 %v10199_v11 }
0x2cbb   :  { %8600 = vmatprep.subr.bf16.mxu0 %v8768_v24 }
0x2cbe   :  { %8601 = vmatpush3.bf16.msra.mxu0 %v10206_v12 }
0x2cbf   :  { %8602 = vmatprep.subr.bf16.mxu0 %v8768_v24 }
0x2cc2   :  { %8603 = vmatpush3.bf16.msra.mxu0 %v10213_v6 }
0x2cc3   :  { %8604 = vmatprep.subr.bf16.mxu0 %v8768_v24 }
0x2cc6   :  { %8605 = vmatpush3.bf16.msra.mxu0 %v10220_v62 }
0x2d1a   :  { %v6790_v45 = vpop.f32.mrf.mxu1 }
0x2d1c   :  { %v8522_v14 = vpop.f32.mrf.mxu1 }
0x2d1e   :  { %v6793_v56 = vpop.f32.mrf.mxu1 }
0x2d20   :  { %v8523_v17 = vpop.f32.mrf.mxu1 }
0x2d32   :  { %v6909_v4 = vpop.f32.mrf.mxu1 }
0x2d34   :  { %v8554_v8 = vpop.f32.mrf.mxu1 }
0x2d36   :  { %v6912_v40 = vpop.f32.mrf.mxu1 }
0x2d38   :  { %v8555_v11 = vpop.f32.mrf.mxu1 }
0x2d41   :  { %v6711_v41 = vpop.f32.mrf.mxu0 }
0x2d42   :  { %v10348_v42 = vadd.f32 %v6790_v45, %v6711_v41 }
0x2d43   :  { %v8506_v12 = vpop.f32.mrf.mxu0 }
0x2d45   :  { %v6714_v43 = vpop.f32.mrf.mxu0 }
0x2d47   :  { %v8507_v53 = vpop.f32.mrf.mxu0 }
0x2d59   :  { %v6862_v54 = vpop.f32.mrf.mxu0 }
0x2d5a   :  { %v6871_v62 = vrot.slane %v6862_v54, %v8831_v2 }
0x2d5b   :  { %v8538_v6 = vpop.f32.mrf.mxu0 }
0x2d5c   :  { %v6910_v3 = vadd.f32 %v6909_v4, %v6871_v62 }
0x2d5d   :  { %v6865_v63 = vpop.f32.mrf.mxu0 }
0x2d5f   :  { %v8539_v46 = vpop.f32.mrf.mxu0 }
0x2d71   :  { %v6953_v15 = vpop.f32.mrf.mxu0 }
0x2d72   :  { %v6962_v58 = vrot.slane %v6953_v15, %v8831_v2 }
0x2d73   :  { %v8570_v22 = vpop.f32.mrf.mxu0 }
0x2d74   :  { %v6963_v9 = vadd.f32 %v6962_v58, %v6910_v3 }
0x2d75   :  { %v6956_v47 = vpop.f32.mrf.mxu0 }
0x2d76   :  { %v6964_v0 = vadd.f32 %v10164_v44, %v6963_v9 }
0x2d77   :  { %v8571_v48 = vpop.f32.mrf.mxu0 }
0x2d78   :  { %v6965_v50 = vmax.f32 %v6964_v0, 0.0  ;;  %v6242_v0 = vld [vmem:[%s10389_s4 + $0x3d] sm:$0x1] }
0x2d7a   :  { %v6966_v61 = vmul.f32 %v10170_v57, %v6965_v50 }
0x2d7c   :  { %v6967_v18 = vadd.f32 %v10175_v7, %v6966_v61 }
0x2d7e   :  { %8708 = vtanh.f32 %v6967_v18  ;;  %v6796_v18 = vadd.f32 %v10348_v42, %v6242_v0 }
0x2d8b   :  { %v8709_v19 = vpop.eup %8708 }
0x2d8c   :  { %v6969_v23 = vpack.c.bf16 %v8709_v19, %v8709_v19 }
0x2d8e   :  { %8575 = vmatmul.mubr.msk.bf16.vlgmr.msra.gmra.mxu1 %vm399_vm3, %v6969_v23  ;;  %vm7152_vm3 = vcmask 254976  }
0x2d8f   :  { %8579 = vmatpush3.bf16.msra.mxu1 %v10227_v52  ;;  %8590 = vmatprep.mubr.msk.bf16.mxu1 %vm8769_vm4, %v8768_v24 }
0x2d90   :  { %8580 = vmatprep.subr.bf16.mxu1 %v8768_v24 }
0x2d93   :  { %8581 = vmatpush3.bf16.msra.mxu1 %v10234_v1 }
0x2d94   :  { %8582 = vmatprep.subr.bf16.mxu1 %v8768_v24 }
0x2d97   :  { %8583 = vmatpush3.bf16.msra.mxu1 %v10241_v16 }
0x2d98   :  { %8584 = vmatprep.subr.bf16.mxu1 %v8768_v24 }
0x2d9b   :  { %8585 = vmatpush3.bf16.msra.mxu1 %v10247_v20 }
0x2d9c   :  { %8586 = vmatprep.subr.bf16.mxu1 %v8768_v24 }
0x2d9f   :  { %8587 = vmatpush3.bf16.msra.mxu1 %v10254_v59 }
0x2da0   :  { %8588 = vmatprep.subr.bf16.mxu1 %v8768_v24 }
0x2da3   :  { %8589 = vmatpush3.bf16.msra.mxu1 %v10261_v51 }
0x2e4e   :  { %v7007_v2 = vpop.f32.mrf.mxu1 }
0x2e4f   :  { %v7008_v44 = vadd.f32 %v10269_v38, %v7007_v2 }
0x2e50   :  { %v8576_v57 = vpop.f32.mrf.mxu1 }
0x2e51   :  { %v7013_v7 = vsel %vm6243_vm9, %v7008_v44, -inf }
0x2e52   :  { %v7014_v52 = vrot.slane %v7013_v7, 4  ;;  %v7010_v1 = vpop.f32.mrf.mxu1 }
0x2e54   :  { %v7015_v16 = vmax.f32 %v7013_v7, %v7014_v52  ;;  %v8577_v30 = vpop.f32.mrf.mxu1 }
0x2e56   :  { %v7016_v31 = vrot.slane %v7015_v16, 2 }
0x2e58   :  { %v7017_v20 = vmax.f32 %v7015_v16, %v7016_v31 }
0x2e5a   :  { %v7018_v26 = vrot.slane %v7017_v20, 1 }
0x2e5c   :  { %v7019_v32 = vmax.f32 %v7017_v20, %v7018_v26 }
0x2e5e   :  { %v7020_v33 = vsub.f32 %v7008_v44, %v7019_v32 }
0x2e60   :  { %v7021_v59 = vmul.f32 1.442695, %v7020_v33 }
0x2e62   :  { %8710 = vpow2.f32 %v7021_v59 }
0x2e6f   :  { %v8711_v24 = vpop.eup %8710 }
0x2e70   :  { %v7023_v51 = vsel %vm6243_vm9, %v8711_v24, 0.0 }
0x2e71   :  { %v7024_v34 = vrot.slane %v7023_v51, 4 }
0x2e73   :  { %v7025_v35 = vadd.f32 %v7024_v34, %v7023_v51 }
0x2e75   :  { %v7026_v38 = vrot.slane %v7025_v35, 2 }
0x2e77   :  { %v7027_v36 = vadd.f32 %v7026_v38, %v7025_v35 }
0x2e79   :  { %v7028_v37 = vrot.slane %v7027_v36, 1 }
0x2e7b   :  { %v7029_v13 = vadd.f32 %v7028_v37, %v7027_v36 }
0x2e7d   :  { %8712 = vrcp.f32 %v7029_v13 }
0x2e8a   :  { %v8713_v60 = vpop.eup %8712 }
0x2e8b   :  { %v7031_v39 = vmul.f32 %v8713_v60, %v8711_v24 }
0x2e8d   :  { %v7032_v21 = vmul.f32 %v7031_v39, %v10097_v55 }
0x2e8f   :  { %v7033_v25 = vsel %vm6243_vm9, %v7032_v21, 0.0 }
0x2e90   :  { %v7034_v27 = vrot.slane %v7033_v25, 4 }
0x2e92   :  { %v7035_v28 = vadd.f32 %v7034_v27, %v7033_v25 }
0x2e94   :  { %v7036_v5 = vrot.slane %v7035_v28, 2 }
0x2e96   :  { %v7037_v29 = vadd.f32 %v7036_v5, %v7035_v28 }
0x2e98   :  { %v7038_v49 = vrot.slane %v7037_v29, 1 }
0x2e9a   :  { %v7039_v10 = vadd.f32 %v7038_v49, %v7037_v29 }
0x2e9c   :  { %v7040_v45 = vsub.f32 %v10097_v55, %v7039_v10  ;;  %v7058_v14 = vpack.c.bf16 %v7039_v10, %v7039_v10 }
0x2e9e   :  { %v7041_v56 = vmul.f32 %v7040_v45, %v7031_v39  ;;  %8607 = vmatmul.mubr.msk.bf16.vlgmr.msra.gmra.mxu0 %vm6243_vm9, %v7058_v14 }
0x2ea0   :  { %v7042_v17 = vmul.f32 %v7041_v56, %v7040_v45 }
0x2ea2   :  { %v7043_v4 = vsel %vm6243_vm9, %v7042_v17, 0.0 }
0x2ea3   :  { %v7044_v8 = vrot.slane %v7043_v4, 4 }
0x2ea5   :  { %v7045_v40 = vadd.f32 %v7044_v8, %v7043_v4 }
0x2ea7   :  { %v7046_v11 = vrot.slane %v7045_v40, 2 }
0x2ea9   :  { %v7047_v41 = vadd.f32 %v7046_v11, %v7045_v40 }
0x2eab   :  { %v7048_v12 = vrot.slane %v7047_v41, 1 }
0x2ead   :  { %v7049_v43 = vadd.f32 %v7048_v12, %v7047_v41 }
0x2eaf   :  { %v7050_v53 = vmax.f32 %v7049_v43, 1e-12 }
0x2eb1   :  { %8714 = vrsqrt.f32 %v7050_v53  ;;  %vm7053_vm0 = vcmp.eq.f32.partialorder %v7050_v53, inf  ;;  %v7056_v63 = vand.u32 2147483648, %v7050_v53  ;;  %vm7055_vm1 = vcmp.eq.f32.partialorder %v7050_v53, 0.0 }
0x2ebe   :  { %v8715_v54 = vpop.eup %8714 }
0x2ebf   :  { %v7052_v6 = vmul.f32 %v8715_v54, %v7050_v53 }
0x2ec1   :  { %v7054_v55 = vsel %vm7053_vm0, %v7050_v53, %v7052_v6 }
0x2ec2   :  { %v7057_v46 = vsel %vm7055_vm1, %v7056_v63, %v7054_v55 }
0x2ec3   :  { %v7059_v62 = vpack.c.bf16 %v7057_v46, %v7057_v46 }
0x2ec5   :  { %8591 = vmatmul.mubr.msk.bf16.vlgmr.msra.gmra.mxu1 %vm6243_vm9, %v7059_v62 }
0x2f5e   :  { %v7140_v15 = vpop.f32.mrf.mxu0 }
0x2f60   :  { %v8608_v3 = vpop.f32.mrf.mxu0 }
0x2f62   :  { %v7143_v58 = vpop.f32.mrf.mxu0 }
0x2f64   :  { %v8609_v22 = vpop.f32.mrf.mxu0 }
0x2f85   :  { %v7097_v9 = vpop.f32.mrf.mxu1 }
0x2f86   :  { %v7141_v47 = vadd.f32 %v7140_v15, %v7097_v9 }
0x2f87   :  { %v8592_v48 = vpop.f32.mrf.mxu1 }
0x2f88   :  { %v7146_v50 = vadd.f32 %v7141_v47, %v6242_v0 }
0x2f89   :  { %v7100_v61 = vpop.f32.mrf.mxu1 }
0x2f8a   :  { %v7148_v19 = vrot.slane %v7146_v50, 7 }
0x2f8b   :  { %v8593_v23 = vpop.f32.mrf.mxu1 }
0x2f8c   :  { %v7151_v2 = vsel %vm7150_vm2, %v6796_v18, %v7148_v19 }
0x2f8d   :  { %7153 = vst.msk [vmem:[#allocation6] sm:$0x3] %vm7152_vm3, %v7151_v2 }
0x2f8e   :  { %8750 = shalt.err (!%p8747_p9)
}
0x2f8f   :  { %7163 = dma.vmem_to_hbm [thread:$0]  %s7161_s13, 32, %s10394_s9, [#allocation5]  }
0x2f90   :  { %8761 = dma.done.wait [#allocation5], 32  }
0x2f91   :  { %8762 = vsyncadd [#allocation5], 4294967264 }
0x2f92   :  { %7167 = vsyncpa [#allocation4], 1 }
0x2f93   :  { %7168 = vsyncpa [#allocation5], 1 }

</bundles_post_ra>
